<compile_context>
chip_gen: v5e
topology: v5e:2x2
jax: 0.10.0
libtpu: 0.0.40
codegen_flags: <defaults>
</compile_context>

<pallas_src>
import math

import jax
import jax.numpy as jnp
from jax.experimental import pallas as pl
from jax.experimental.pallas import tpu as pltpu

# ----------------------------- model dimensions -----------------------------
B = 2                                   # batch
L_RAW = 170                             # raw audio samples
C0 = 16                                 # conv feature-extractor channels
K0, S0 = 10, 5                          # conv0 kernel / stride
K1, S1 = 3, 2                           # conv1 kernel / stride
T1 = (L_RAW - K0) // S0 + 1             # 33 frames after conv0
T_TOKENS = (T1 - K1) // S1 + 1          # 16 encoding tokens after conv1
H = 32                                  # transformer hidden (stands in for 768)
NHEADS = 4
HD = H // NHEADS
FF = 64                                 # feed-forward intermediate
NLAYERS = 2
G = 4                                   # pos-conv groups
KP = 4                                  # pos-conv kernel (even -> drop last frame)
NUM_CLASSES = 4
NCLS_PAD = 128                          # lane-dense padded class dim for the head
EPS = 1e-5

VMEM = pl.BlockSpec(memory_space=pltpu.MemorySpace.VMEM)


# ----------------------------- in-kernel helpers ------------------------------
def _mxu_dot(a, b):
    """MXU matmul: bf16 operands, f32 accumulation (v5e/v6e/v7x friendly)."""
    return jnp.dot(a.astype(jnp.bfloat16), b.astype(jnp.bfloat16),
                   preferred_element_type=jnp.float32)


def _layernorm(x, g, b, eps=EPS):
    mu = jnp.mean(x, axis=-1, keepdims=True)
    var = jnp.mean(jnp.square(x - mu), axis=-1, keepdims=True)
    return (x - mu) * jax.lax.rsqrt(var + eps) * g + b


# ------------------------------ Pallas kernels -------------------------------
def _conv0_gn_kernel(p_ref, w_ref, g_ref, b_ref, o_ref):
    """conv0 (as matmul on im2col patches) + GroupNorm(C0, C0) + GELU."""
    w = w_ref[...]                                        # (K0, C0)
    for b in range(B):                                    # tiny, fully unrolled
        xb = _mxu_dot(p_ref[b], w)                        # (T1, C0)
        mu = jnp.mean(xb, axis=0, keepdims=True)          # per-channel over time
        var = jnp.mean(jnp.square(xb - mu), axis=0, keepdims=True)
        yb = (xb - mu) * jax.lax.rsqrt(var + EPS) * g_ref[...] + b_ref[...]
        o_ref[b] = jax.nn.gelu(yb, approximate=True)


def _conv1_fp_kernel(p_ref, w1_ref, lng_ref, lnb_ref, wfp_ref, bfp_ref, o_ref):
    """conv1 matmul + GELU, then feature projection LayerNorm + Linear(C0->H)."""
    x = jax.nn.gelu(_mxu_dot(p_ref[...], w1_ref[...]), approximate=True)   # (B*T, C0)
    x = _layernorm(x, lng_ref[...], lnb_ref[...])
    o_ref[...] = _mxu_dot(x, wfp_ref[...]) + bfp_ref[...]                  # (B*T, H)


def _posconv_kernel(hp_ref, taps_ref, pb_ref, lng_ref, lnb_ref, o_ref):
    """Grouped positional conv (per-tap matmuls) + GELU + residual + encoder LN.

    hp_ref is the time-padded hidden state: (B, T + KP - 1, H) with KP//2 zero
    frames prepended and KP-1-KP//2 appended (matches padding=KP//2 + dropping
    the last output frame for the even kernel, like wav2vec2's SamePadLayer).
    """
    for b in range(B):
        hb = hp_ref[b]                                    # (T+KP-1, H)
        acc = jnp.zeros((T_TOKENS, H), jnp.float32) + pb_ref[...]
        for k in range(KP):
            acc = acc + _mxu_dot(hb[k:k + T_TOKENS, :], taps_ref[k])
        pe = jax.nn.gelu(acc, approximate=True)
        res = hb[KP // 2:KP // 2 + T_TOKENS, :] + pe
        o_ref[b] = _layernorm(res, lng_ref[...], lnb_ref[...])


def _layer_impl(h_ref, mask_ref, wqkv_ref, bqkv_ref, wo_ref, bo_ref,
                ln1g_ref, ln1b_ref, wff1_ref, bff1_ref,
                wff2_ref, bff2_ref, ln2g_ref, ln2b_ref):
    """One fused wav2vec2 transformer layer (post-norm).  Returns (B*T, H) f32."""
    x = h_ref[...]                                        # (B*T, H)
    n = x.shape[0]
    qkv = _mxu_dot(x, wqkv_ref[...]) + bqkv_ref[...]      # fused QKV, (B*T, 3H)
    wo = wo_ref[...]
    mask = mask_ref[...]                                  # (B*T, B*T) block-diag 0 / -1e9
    scale = 1.0 / math.sqrt(HD)

    # All heads in one kernel invocation; batch mixing prevented by the additive
    # mask so every matmul stays 2D and lane-dense (32-wide scores).
    attn = jnp.zeros((n, H), jnp.float32) + bo_ref[...]
    for hh in range(NHEADS):
        q = qkv[:, hh * HD:(hh + 1) * HD]
        k = qkv[:, H + hh * HD:H + (hh + 1) * HD]
        v = qkv[:, 2 * H + hh * HD:2 * H + (hh + 1) * HD]
        s = jnp.einsum('qd,kd->qk', q.astype(jnp.bfloat16), k.astype(jnp.bfloat16),
                       preferred_element_type=jnp.float32) * scale + mask
        s = s - jnp.max(s, axis=-1, keepdims=True)
        pr = jnp.exp(s)
        pr = pr * pl.reciprocal(jnp.sum(pr, axis=-1, keepdims=True), approx=True)
        o_h = _mxu_dot(pr, v)                             # (B*T, HD)
        attn = attn + _mxu_dot(o_h, wo[hh * HD:(hh + 1) * HD, :])

    h1 = _layernorm(x + attn, ln1g_ref[...], ln1b_ref[...])
    ff = jax.nn.gelu(_mxu_dot(h1, wff1_ref[...]) + bff1_ref[...], approximate=True)
    ff = _mxu_dot(ff, wff2_ref[...]) + bff2_ref[...]
    return _layernorm(h1 + ff, ln2g_ref[...], ln2b_ref[...])


def _layer_kernel(h_ref, mask_ref, wqkv_ref, bqkv_ref, wo_ref, bo_ref,
                  ln1g_ref, ln1b_ref, wff1_ref, bff1_ref,
                  wff2_ref, bff2_ref, ln2g_ref, ln2b_ref, o_ref):
    o_ref[...] = _layer_impl(h_ref, mask_ref, wqkv_ref, bqkv_ref, wo_ref, bo_ref,
                             ln1g_ref, ln1b_ref, wff1_ref, bff1_ref,
                             wff2_ref, bff2_ref, ln2g_ref, ln2b_ref)


def _layer_head_kernel(h_ref, mask_ref, wqkv_ref, bqkv_ref, wo_ref, bo_ref,
                       ln1g_ref, ln1b_ref, wff1_ref, bff1_ref,
                       wff2_ref, bff2_ref, ln2g_ref, ln2b_ref,
                       sel_ref, wrep_ref, bp_ref, o_ref):
    """Last transformer layer fused with the classifier head.

    Head: AvgPool1d(H) over the hidden dim -> (B, T), Linear(T -> classes)
    (weight pre-padded/tiled to a lane-dense 128-wide output), ReLU.
    """
    h2 = _layer_impl(h_ref, mask_ref, wqkv_ref, bqkv_ref, wo_ref, bo_ref,
                     ln1g_ref, ln1b_ref, wff1_ref, bff1_ref,
                     wff2_ref, bff2_ref, ln2g_ref, ln2b_ref)      # (B*T, H)
    pooled = jnp.mean(h2, axis=-1, keepdims=True)                 # (B*T, 1)
    contrib = pooled * wrep_ref[...]                              # (B*T, NCLS_PAD)
    logits = jnp.dot(sel_ref[...], contrib,
                     preferred_element_type=jnp.float32) + bp_ref[...]   # (B, NCLS_PAD)
    o_ref[...] = jnp.maximum(logits, 0.0)


# ------------------------------- JAX glue ------------------------------------
def im2col_time_major(x, kernel, stride):
    """x: (B, L, C) -> (B, T_out, C*kernel) via static strided slices (no gather)."""
    bsz, length, c = x.shape
    t_out = (length - kernel) // stride + 1
    span = stride * (t_out - 1) + 1
    cols = [x[:, k:k + span:stride, :] for k in range(kernel)]    # each (B, T_out, C)
    return jnp.stack(cols, axis=-1).reshape(bsz, t_out, c * kernel)


def build_pos_taps(w_grouped):
    """Grouped pos-conv weight (H, H//G, KP) -> per-tap block-diagonal (KP, H, H)."""
    gsz = H // G
    taps = jnp.zeros((KP, H, H), jnp.float32)
    for g in range(G):
        blk = jnp.transpose(w_grouped[g * gsz:(g + 1) * gsz], (2, 1, 0))  # (KP, cin, cout)
        taps = taps.at[:, g * gsz:(g + 1) * gsz, g * gsz:(g + 1) * gsz].set(blk)
    return taps


def forward(audio, p):
    # ---- conv feature extractor (im2col via shifted strided slices) ----
    patches0 = im2col_time_major(audio[:, :, None], K0, S0)          # (B, T1, K0)
    feat = pl.pallas_call(
        _conv0_gn_kernel,
        out_shape=jax.ShapeDtypeStruct((B, T1, C0), jnp.float32),
        in_specs=[VMEM] * 4, out_specs=VMEM,
    )(patches0, p["conv0_wm"], p["gn_g"], p["gn_b"])                  # (B, T1, C0)

    patches1 = im2col_time_major(feat, K1, S1).reshape(B * T_TOKENS, C0 * K1)
    h = pl.pallas_call(
        _conv1_fp_kernel,
        out_shape=jax.ShapeDtypeStruct((B * T_TOKENS, H), jnp.float32),
        in_specs=[VMEM] * 6, out_specs=VMEM,
    )(patches1, p["conv1_wm"], p["fp_ln_g"], p["fp_ln_b"], p["fp_w"], p["fp_b"])

    # ---- positional conv embedding + residual + encoder LayerNorm ----
    hp = jnp.pad(h.reshape(B, T_TOKENS, H),
                 ((0, 0), (KP // 2, KP - 1 - KP // 2), (0, 0)))
    h = pl.pallas_call(
        _posconv_kernel,
        out_shape=jax.ShapeDtypeStruct((B, T_TOKENS, H), jnp.float32),
        in_specs=[VMEM] * 5, out_specs=VMEM,
    )(hp, p["pos_taps"], p["pos_b"], p["enc_ln_g"], p["enc_ln_b"])
    h = h.reshape(B * T_TOKENS, H)

    # Block-diagonal additive mask keeps the all-head / all-token attention
    # matmuls 2D and batch-separated; batch_sel re-gathers per-batch rows for
    # the head.  Both are tiny constants built in glue (no in-kernel iota/div).
    tok_batch = jnp.arange(B * T_TOKENS) // T_TOKENS
    attn_mask = jnp.where(tok_batch[:, None] == tok_batch[None, :],
                          0.0, -1e9).astype(jnp.float32)             # (B*T, B*T)
    batch_sel = jnp.where(tok_batch[None, :] == jnp.arange(B)[:, None],
                          1.0, 0.0).astype(jnp.float32)              # (B, B*T)

    # ---- transformer encoder: one fused pallas_call per layer ----
    for lp in p["layers"][:-1]:
        h = pl.pallas_call(
            _layer_kernel,
            out_shape=jax.ShapeDtypeStruct((B * T_TOKENS, H), jnp.float32),
            in_specs=[VMEM] * 14, out_specs=VMEM,
        )(h, attn_mask, lp["qkv_w"], lp["qkv_b"], lp["o_w"], lp["o_b"],
          lp["ln1_g"], lp["ln1_b"], lp["ff1_w"], lp["ff1_b"],
          lp["ff2_w"], lp["ff2_b"], lp["ln2_g"], lp["ln2_b"])

    # ---- last layer fused with the head (AvgPool1d -> Dropout(eval) -> Linear -> ReLU) ----
    lp = p["layers"][-1]
    logits = pl.pallas_call(
        _layer_head_kernel,
        out_shape=jax.ShapeDtypeStruct((B, NCLS_PAD), jnp.float32),
        in_specs=[VMEM] * 17, out_specs=VMEM,
    )(h, attn_mask, lp["qkv_w"], lp["qkv_b"], lp["o_w"], lp["o_b"],
      lp["ln1_g"], lp["ln1_b"], lp["ff1_w"], lp["ff1_b"],
      lp["ff2_w"], lp["ff2_b"], lp["ln2_g"], lp["ln2_b"],
      batch_sel, p["proj_w_rep"], p["proj_b_pad"])
    return logits[:, :NUM_CLASSES]


# ------------------------------ parameter init -------------------------------
def init_params(key):
    keys = iter(jax.random.split(key, 64))

    def dense(shape, scale=0.02):
        return scale * jax.random.normal(next(keys), shape, dtype=jnp.float32)

    ones = lambda *s: jnp.ones(s, jnp.float32)
    zeros = lambda *s: jnp.zeros(s, jnp.float32)

    conv0_w = dense((C0, 1, K0))          # PyTorch Conv1d weight (Cout, Cin, K)
    conv1_w = dense((C0, C0, K1))
    pos_w = dense((H, H // G, KP))        # grouped pos-conv weight
    proj_w = dense((T_TOKENS, NUM_CLASSES))
    proj_w_pad = jnp.zeros((T_TOKENS, NCLS_PAD), jnp.float32).at[:, :NUM_CLASSES].set(proj_w)

    p = {
        "conv0_wm": conv0_w.reshape(C0, K0).T,                 # (K0, C0)
        "gn_g": ones(1, C0), "gn_b": zeros(1, C0),
        "conv1_wm": conv1_w.reshape(C0, C0 * K1).T,            # (C0*K1, C0), (cin, k) major
        "fp_ln_g": ones(1, C0), "fp_ln_b": zeros(1, C0),
        "fp_w": dense((C0, H)), "fp_b": zeros(1, H),
        "pos_taps": build_pos_taps(pos_w),                     # (KP, H, H) block-diagonal
        "pos_b": zeros(1, H),
        "enc_ln_g": ones(1, H), "enc_ln_b": zeros(1, H),
        "proj_w_rep": jnp.tile(proj_w_pad, (B, 1)),            # (B*T, NCLS_PAD) lane-dense
        "proj_b_pad": zeros(1, NCLS_PAD),
        "layers": [],
    }
    for _ in range(NLAYERS):
        p["layers"].append({
            "qkv_w": dense((H, 3 * H)), "qkv_b": zeros(1, 3 * H),   # fused Q|K|V
            "o_w": dense((H, H)), "o_b": zeros(1, H),
            "ln1_g": ones(1, H), "ln1_b": zeros(1, H),
            "ff1_w": dense((H, FF)), "ff1_b": zeros(1, FF),
            "ff2_w": dense((FF, H)), "ff2_b": zeros(1, H),
            "ln2_g": ones(1, H), "ln2_b": zeros(1, H),
        })
    return p


if __name__ == "__main__":
    root = jax.random.PRNGKey(0)
    pkey, akey = jax.random.split(root)
    params = init_params(pkey)
    audio = jax.random.normal(akey, (B, L_RAW), dtype=jnp.float32)

    logits = jax.jit(forward)(audio, params)
    logits = jax.block_until_ready(logits)

    assert logits.shape == (B, NUM_CLASSES), logits.shape
    assert logits.dtype == jnp.float32
    assert bool(jnp.all(jnp.isfinite(logits)))
    assert bool(jnp.all(logits >= 0.0))   # ReLU output
    print("KERNEL_OK")
</pallas_src>

<mosaic_0001>
module attributes {stable_mosaic.version = 11 : i64} {
  func.func @_conv0_gn_kernel(%arg0: memref<2x33x10xf32, #tpu.memory_space<vmem>>, %arg1: memref<10x16xf32, #tpu.memory_space<vmem>>, %arg2: memref<1x16xf32, #tpu.memory_space<vmem>>, %arg3: memref<1x16xf32, #tpu.memory_space<vmem>>, %arg4: memref<2x33x16xf32, #tpu.memory_space<vmem>>) attributes {dimension_semantics = [], scalar_prefetch = 0 : i64, scratch_operands = 0 : i64, tpu.core_type = #tpu.core_type<tc>} {
    %c0 = arith.constant 0 : index
    %c0_0 = arith.constant 0 : index
    %0 = vector.load %arg1[%c0, %c0_0] : memref<10x16xf32, #tpu.memory_space<vmem>>, vector<10x16xf32>
    %c0_1 = arith.constant 0 : index
    %c0_2 = arith.constant 0 : index
    %c0_3 = arith.constant 0 : index
    %1 = vector.load %arg0[%c0_1, %c0_2, %c0_3] : memref<2x33x10xf32, #tpu.memory_space<vmem>>, vector<1x33x10xf32>
    %2 = vector.shape_cast %1 : vector<1x33x10xf32> to vector<33x10xf32>
    %3 = arith.truncf %2 : vector<33x10xf32> to vector<33x10xbf16>
    %4 = arith.truncf %0 : vector<10x16xf32> to vector<10x16xbf16>
    %cst = arith.constant dense<0.000000e+00> : vector<33x16xf32>
    %5 = tpu.matmul %3, %4, %cst {dimension_numbers = #tpu.dot_dimension_numbers<[1], [0], [0], [1], [0, 0, 1, 1], [], []>} : vector<33x10xbf16>, vector<10x16xbf16>, vector<33x16xf32> -> vector<33x16xf32>
    %cst_4 = arith.constant dense<0.000000e+00> : vector<16xf32>
    %6 = vector.multi_reduction <add>, %5, %cst_4 [0] : vector<33x16xf32> to vector<16xf32>
    %7 = vector.shape_cast %6 : vector<16xf32> to vector<1x16xf32>
    %cst_5 = arith.constant 3.300000e+01 : f32
    %8 = vector.broadcast %cst_5 : f32 to vector<1x16xf32>
    %9 = arith.divf %7, %8 : vector<1x16xf32>
    %10 = vector.broadcast %9 : vector<1x16xf32> to vector<33x16xf32>
    %11 = arith.subf %5, %10 : vector<33x16xf32>
    %12 = arith.mulf %11, %11 : vector<33x16xf32>
    %cst_6 = arith.constant dense<0.000000e+00> : vector<16xf32>
    %13 = vector.multi_reduction <add>, %12, %cst_6 [0] : vector<33x16xf32> to vector<16xf32>
    %14 = vector.shape_cast %13 : vector<16xf32> to vector<1x16xf32>
    %cst_7 = arith.constant 3.300000e+01 : f32
    %15 = vector.broadcast %cst_7 : f32 to vector<1x16xf32>
    %16 = arith.divf %14, %15 : vector<1x16xf32>
    %17 = vector.broadcast %9 : vector<1x16xf32> to vector<33x16xf32>
    %18 = arith.subf %5, %17 : vector<33x16xf32>
    %cst_8 = arith.constant 9.99999974E-6 : f32
    %19 = vector.broadcast %cst_8 : f32 to vector<1x16xf32>
    %20 = arith.addf %16, %19 : vector<1x16xf32>
    %21 = math.rsqrt %20 : vector<1x16xf32>
    %22 = vector.broadcast %21 : vector<1x16xf32> to vector<33x16xf32>
    %23 = arith.mulf %18, %22 : vector<33x16xf32>
    %c0_9 = arith.constant 0 : index
    %c0_10 = arith.constant 0 : index
    %24 = vector.load %arg2[%c0_9, %c0_10] : memref<1x16xf32, #tpu.memory_space<vmem>>, vector<1x16xf32>
    %25 = vector.broadcast %24 : vector<1x16xf32> to vector<33x16xf32>
    %26 = arith.mulf %23, %25 : vector<33x16xf32>
    %c0_11 = arith.constant 0 : index
    %c0_12 = arith.constant 0 : index
    %27 = vector.load %arg3[%c0_11, %c0_12] : memref<1x16xf32, #tpu.memory_space<vmem>>, vector<1x16xf32>
    %28 = vector.broadcast %27 : vector<1x16xf32> to vector<33x16xf32>
    %29 = arith.addf %26, %28 : vector<33x16xf32>
    %30 = arith.mulf %29, %29 : vector<33x16xf32>
    %31 = arith.mulf %29, %30 : vector<33x16xf32>
    %cst_13 = arith.constant 4.471500e-02 : f32
    %32 = vector.broadcast %cst_13 : f32 to vector<33x16xf32>
    %33 = arith.mulf %32, %31 : vector<33x16xf32>
    %34 = arith.addf %29, %33 : vector<33x16xf32>
    %cst_14 = arith.constant 0.797884583 : f32
    %35 = vector.broadcast %cst_14 : f32 to vector<33x16xf32>
    %36 = arith.mulf %35, %34 : vector<33x16xf32>
    %37 = math.tanh %36 : vector<33x16xf32>
    %cst_15 = arith.constant 1.000000e+00 : f32
    %38 = vector.broadcast %cst_15 : f32 to vector<33x16xf32>
    %39 = arith.addf %38, %37 : vector<33x16xf32>
    %cst_16 = arith.constant 5.000000e-01 : f32
    %40 = vector.broadcast %cst_16 : f32 to vector<33x16xf32>
    %41 = arith.mulf %40, %39 : vector<33x16xf32>
    %42 = arith.mulf %29, %41 : vector<33x16xf32>
    %c0_17 = arith.constant 0 : index
    %c0_18 = arith.constant 0 : index
    %c0_19 = arith.constant 0 : index
    %43 = vector.load %arg4[%c0_17, %c0_18, %c0_19] : memref<2x33x16xf32, #tpu.memory_space<vmem>>, vector<1x33x16xf32>
    %44 = vector.shape_cast %43 : vector<1x33x16xf32> to vector<33x16xf32>
    %45 = vector.shape_cast %42 : vector<33x16xf32> to vector<1x33x16xf32>
    tpu.vector_store %arg4[%c0_17, %c0_18, %c0_19], %45 {strides = array<i32>} : memref<2x33x16xf32, #tpu.memory_space<vmem>>, vector<1x33x16xf32>,
    %c1 = arith.constant 1 : index
    %c0_20 = arith.constant 0 : index
    %c0_21 = arith.constant 0 : index
    %46 = vector.load %arg0[%c1, %c0_20, %c0_21] : memref<2x33x10xf32, #tpu.memory_space<vmem>>, vector<1x33x10xf32>
    %47 = vector.shape_cast %46 : vector<1x33x10xf32> to vector<33x10xf32>
    %48 = arith.truncf %47 : vector<33x10xf32> to vector<33x10xbf16>
    %49 = arith.truncf %0 : vector<10x16xf32> to vector<10x16xbf16>
    %cst_22 = arith.constant dense<0.000000e+00> : vector<33x16xf32>
    %50 = tpu.matmul %48, %49, %cst_22 {dimension_numbers = #tpu.dot_dimension_numbers<[1], [0], [0], [1], [0, 0, 1, 1], [], []>} : vector<33x10xbf16>, vector<10x16xbf16>, vector<33x16xf32> -> vector<33x16xf32>
    %cst_23 = arith.constant dense<0.000000e+00> : vector<16xf32>
    %51 = vector.multi_reduction <add>, %50, %cst_23 [0] : vector<33x16xf32> to vector<16xf32>
    %52 = vector.shape_cast %51 : vector<16xf32> to vector<1x16xf32>
    %cst_24 = arith.constant 3.300000e+01 : f32
    %53 = vector.broadcast %cst_24 : f32 to vector<1x16xf32>
    %54 = arith.divf %52, %53 : vector<1x16xf32>
    %55 = vector.broadcast %54 : vector<1x16xf32> to vector<33x16xf32>
    %56 = arith.subf %50, %55 : vector<33x16xf32>
    %57 = arith.mulf %56, %56 : vector<33x16xf32>
    %cst_25 = arith.constant dense<0.000000e+00> : vector<16xf32>
    %58 = vector.multi_reduction <add>, %57, %cst_25 [0] : vector<33x16xf32> to vector<16xf32>
    %59 = vector.shape_cast %58 : vector<16xf32> to vector<1x16xf32>
    %cst_26 = arith.constant 3.300000e+01 : f32
    %60 = vector.broadcast %cst_26 : f32 to vector<1x16xf32>
    %61 = arith.divf %59, %60 : vector<1x16xf32>
    %62 = vector.broadcast %54 : vector<1x16xf32> to vector<33x16xf32>
    %63 = arith.subf %50, %62 : vector<33x16xf32>
    %cst_27 = arith.constant 9.99999974E-6 : f32
    %64 = vector.broadcast %cst_27 : f32 to vector<1x16xf32>
    %65 = arith.addf %61, %64 : vector<1x16xf32>
    %66 = math.rsqrt %65 : vector<1x16xf32>
    %67 = vector.broadcast %66 : vector<1x16xf32> to vector<33x16xf32>
    %68 = arith.mulf %63, %67 : vector<33x16xf32>
    %c0_28 = arith.constant 0 : index
    %c0_29 = arith.constant 0 : index
    %69 = vector.load %arg2[%c0_28, %c0_29] : memref<1x16xf32, #tpu.memory_space<vmem>>, vector<1x16xf32>
    %70 = vector.broadcast %69 : vector<1x16xf32> to vector<33x16xf32>
    %71 = arith.mulf %68, %70 : vector<33x16xf32>
    %c0_30 = arith.constant 0 : index
    %c0_31 = arith.constant 0 : index
    %72 = vector.load %arg3[%c0_30, %c0_31] : memref<1x16xf32, #tpu.memory_space<vmem>>, vector<1x16xf32>
    %73 = vector.broadcast %72 : vector<1x16xf32> to vector<33x16xf32>
    %74 = arith.addf %71, %73 : vector<33x16xf32>
    %75 = arith.mulf %74, %74 : vector<33x16xf32>
    %76 = arith.mulf %74, %75 : vector<33x16xf32>
    %cst_32 = arith.constant 4.471500e-02 : f32
    %77 = vector.broadcast %cst_32 : f32 to vector<33x16xf32>
    %78 = arith.mulf %77, %76 : vector<33x16xf32>
    %79 = arith.addf %74, %78 : vector<33x16xf32>
    %cst_33 = arith.constant 0.797884583 : f32
    %80 = vector.broadcast %cst_33 : f32 to vector<33x16xf32>
    %81 = arith.mulf %80, %79 : vector<33x16xf32>
    %82 = math.tanh %81 : vector<33x16xf32>
    %cst_34 = arith.constant 1.000000e+00 : f32
    %83 = vector.broadcast %cst_34 : f32 to vector<33x16xf32>
    %84 = arith.addf %83, %82 : vector<33x16xf32>
    %cst_35 = arith.constant 5.000000e-01 : f32
    %85 = vector.broadcast %cst_35 : f32 to vector<33x16xf32>
    %86 = arith.mulf %85, %84 : vector<33x16xf32>
    %87 = arith.mulf %74, %86 : vector<33x16xf32>
    %c1_36 = arith.constant 1 : index
    %c0_37 = arith.constant 0 : index
    %c0_38 = arith.constant 0 : index
    %88 = vector.load %arg4[%c1_36, %c0_37, %c0_38] : memref<2x33x16xf32, #tpu.memory_space<vmem>>, vector<1x33x16xf32>
    %89 = vector.shape_cast %88 : vector<1x33x16xf32> to vector<33x16xf32>
    %90 = vector.shape_cast %87 : vector<33x16xf32> to vector<1x33x16xf32>
    tpu.vector_store %arg4[%c1_36, %c0_37, %c0_38], %90 {strides = array<i32>} : memref<2x33x16xf32, #tpu.memory_space<vmem>>, vector<1x33x16xf32>,
    return
  }
}

module attributes {stable_mosaic.version = 11 : i64} {
  func.func @_conv1_fp_kernel(%arg0: memref<32x48xf32, #tpu.memory_space<vmem>>, %arg1: memref<48x16xf32, #tpu.memory_space<vmem>>, %arg2: memref<1x16xf32, #tpu.memory_space<vmem>>, %arg3: memref<1x16xf32, #tpu.memory_space<vmem>>, %arg4: memref<16x32xf32, #tpu.memory_space<vmem>>, %arg5: memref<1x32xf32, #tpu.memory_space<vmem>>, %arg6: memref<32x32xf32, #tpu.memory_space<vmem>>) attributes {dimension_semantics = [], scalar_prefetch = 0 : i64, scratch_operands = 0 : i64, tpu.core_type = #tpu.core_type<tc>} {
    %c0 = arith.constant 0 : index
    %c0_0 = arith.constant 0 : index
    %0 = vector.load %arg0[%c0, %c0_0] : memref<32x48xf32, #tpu.memory_space<vmem>>, vector<32x48xf32>
    %c0_1 = arith.constant 0 : index
    %c0_2 = arith.constant 0 : index
    %1 = vector.load %arg1[%c0_1, %c0_2] : memref<48x16xf32, #tpu.memory_space<vmem>>, vector<48x16xf32>
    %2 = arith.truncf %0 : vector<32x48xf32> to vector<32x48xbf16>
    %3 = arith.truncf %1 : vector<48x16xf32> to vector<48x16xbf16>
    %cst = arith.constant dense<0.000000e+00> : vector<32x16xf32>
    %4 = tpu.matmul %2, %3, %cst {dimension_numbers = #tpu.dot_dimension_numbers<[1], [0], [0], [1], [0, 0, 1, 1], [], []>} : vector<32x48xbf16>, vector<48x16xbf16>, vector<32x16xf32> -> vector<32x16xf32>
    %5 = arith.mulf %4, %4 : vector<32x16xf32>
    %6 = arith.mulf %4, %5 : vector<32x16xf32>
    %cst_3 = arith.constant 4.471500e-02 : f32
    %7 = vector.broadcast %cst_3 : f32 to vector<32x16xf32>
    %8 = arith.mulf %7, %6 : vector<32x16xf32>
    %9 = arith.addf %4, %8 : vector<32x16xf32>
    %cst_4 = arith.constant 0.797884583 : f32
    %10 = vector.broadcast %cst_4 : f32 to vector<32x16xf32>
    %11 = arith.mulf %10, %9 : vector<32x16xf32>
    %12 = math.tanh %11 : vector<32x16xf32>
    %cst_5 = arith.constant 1.000000e+00 : f32
    %13 = vector.broadcast %cst_5 : f32 to vector<32x16xf32>
    %14 = arith.addf %13, %12 : vector<32x16xf32>
    %cst_6 = arith.constant 5.000000e-01 : f32
    %15 = vector.broadcast %cst_6 : f32 to vector<32x16xf32>
    %16 = arith.mulf %15, %14 : vector<32x16xf32>
    %17 = arith.mulf %4, %16 : vector<32x16xf32>
    %c0_7 = arith.constant 0 : index
    %c0_8 = arith.constant 0 : index
    %18 = vector.load %arg2[%c0_7, %c0_8] : memref<1x16xf32, #tpu.memory_space<vmem>>, vector<1x16xf32>
    %c0_9 = arith.constant 0 : index
    %c0_10 = arith.constant 0 : index
    %19 = vector.load %arg3[%c0_9, %c0_10] : memref<1x16xf32, #tpu.memory_space<vmem>>, vector<1x16xf32>
    %cst_11 = arith.constant dense<0.000000e+00> : vector<32xf32>
    %20 = vector.multi_reduction <add>, %17, %cst_11 [1] : vector<32x16xf32> to vector<32xf32>
    %21 = vector.shape_cast %20 : vector<32xf32> to vector<32x1xf32>
    %cst_12 = arith.constant 1.600000e+01 : f32
    %22 = vector.broadcast %cst_12 : f32 to vector<32x1xf32>
    %23 = arith.divf %21, %22 : vector<32x1xf32>
    %24 = vector.broadcast %23 : vector<32x1xf32> to vector<32x16xf32>
    %25 = arith.subf %17, %24 : vector<32x16xf32>
    %26 = arith.mulf %25, %25 : vector<32x16xf32>
    %cst_13 = arith.constant dense<0.000000e+00> : vector<32xf32>
    %27 = vector.multi_reduction <add>, %26, %cst_13 [1] : vector<32x16xf32> to vector<32xf32>
    %28 = vector.shape_cast %27 : vector<32xf32> to vector<32x1xf32>
    %cst_14 = arith.constant 1.600000e+01 : f32
    %29 = vector.broadcast %cst_14 : f32 to vector<32x1xf32>
    %30 = arith.divf %28, %29 : vector<32x1xf32>
    %31 = vector.broadcast %23 : vector<32x1xf32> to vector<32x16xf32>
    %32 = arith.subf %17, %31 : vector<32x16xf32>
    %cst_15 = arith.constant 9.99999974E-6 : f32
    %33 = vector.broadcast %cst_15 : f32 to vector<32x1xf32>
    %34 = arith.addf %30, %33 : vector<32x1xf32>
    %35 = math.rsqrt %34 : vector<32x1xf32>
    %36 = vector.broadcast %35 : vector<32x1xf32> to vector<32x16xf32>
    %37 = arith.mulf %32, %36 : vector<32x16xf32>
    %38 = vector.broadcast %18 : vector<1x16xf32> to vector<32x16xf32>
    %39 = arith.mulf %37, %38 : vector<32x16xf32>
    %40 = vector.broadcast %19 : vector<1x16xf32> to vector<32x16xf32>
    %41 = arith.addf %39, %40 : vector<32x16xf32>
    %c0_16 = arith.constant 0 : index
    %c0_17 = arith.constant 0 : index
    %42 = vector.load %arg4[%c0_16, %c0_17] : memref<16x32xf32, #tpu.memory_space<vmem>>, vector<16x32xf32>
    %43 = arith.truncf %41 : vector<32x16xf32> to vector<32x16xbf16>
    %44 = arith.truncf %42 : vector<16x32xf32> to vector<16x32xbf16>
    %cst_18 = arith.constant dense<0.000000e+00> : vector<32x32xf32>
    %45 = tpu.matmul %43, %44, %cst_18 {dimension_numbers = #tpu.dot_dimension_numbers<[1], [0], [0], [1], [0, 0, 1, 1], [], []>} : vector<32x16xbf16>, vector<16x32xbf16>, vector<32x32xf32> -> vector<32x32xf32>
    %c0_19 = arith.constant 0 : index
    %c0_20 = arith.constant 0 : index
    %46 = vector.load %arg5[%c0_19, %c0_20] : memref<1x32xf32, #tpu.memory_space<vmem>>, vector<1x32xf32>
    %47 = vector.broadcast %46 : vector<1x32xf32> to vector<32x32xf32>
    %48 = arith.addf %45, %47 : vector<32x32xf32>
    %c0_21 = arith.constant 0 : index
    %c0_22 = arith.constant 0 : index
    %49 = vector.load %arg6[%c0_21, %c0_22] : memref<32x32xf32, #tpu.memory_space<vmem>>, vector<32x32xf32>
    tpu.vector_store %arg6[%c0_21, %c0_22], %48 {strides = array<i32>} : memref<32x32xf32, #tpu.memory_space<vmem>>, vector<32x32xf32>,
    return
  }
}

module attributes {stable_mosaic.version = 11 : i64} {
  func.func @_posconv_kernel(%arg0: memref<2x19x32xf32, #tpu.memory_space<vmem>>, %arg1: memref<4x32x32xf32, #tpu.memory_space<vmem>>, %arg2: memref<1x32xf32, #tpu.memory_space<vmem>>, %arg3: memref<1x32xf32, #tpu.memory_space<vmem>>, %arg4: memref<1x32xf32, #tpu.memory_space<vmem>>, %arg5: memref<2x16x32xf32, #tpu.memory_space<vmem>>) attributes {dimension_semantics = [], scalar_prefetch = 0 : i64, scratch_operands = 0 : i64, tpu.core_type = #tpu.core_type<tc>} {
    %c0 = arith.constant 0 : index
    %c0_0 = arith.constant 0 : index
    %c0_1 = arith.constant 0 : index
    %0 = vector.load %arg0[%c0, %c0_0, %c0_1] : memref<2x19x32xf32, #tpu.memory_space<vmem>>, vector<1x19x32xf32>
    %1 = vector.shape_cast %0 : vector<1x19x32xf32> to vector<19x32xf32>
    %cst = arith.constant 0.000000e+00 : f32
    %2 = vector.broadcast %cst : f32 to vector<16x32xf32>
    %c0_2 = arith.constant 0 : index
    %c0_3 = arith.constant 0 : index
    %3 = vector.load %arg2[%c0_2, %c0_3] : memref<1x32xf32, #tpu.memory_space<vmem>>, vector<1x32xf32>
    %4 = vector.broadcast %3 : vector<1x32xf32> to vector<16x32xf32>
    %5 = arith.addf %2, %4 : vector<16x32xf32>
    %6 = vector.extract_strided_slice %1 {offsets = [0, 0], sizes = [16, 32], strides = [1, 1]} : vector<19x32xf32> to vector<16x32xf32>
    %c0_4 = arith.constant 0 : index
    %c0_5 = arith.constant 0 : index
    %c0_6 = arith.constant 0 : index
    %7 = vector.load %arg1[%c0_4, %c0_5, %c0_6] : memref<4x32x32xf32, #tpu.memory_space<vmem>>, vector<1x32x32xf32>
    %8 = vector.shape_cast %7 : vector<1x32x32xf32> to vector<32x32xf32>
    %9 = arith.truncf %6 : vector<16x32xf32> to vector<16x32xbf16>
    %10 = arith.truncf %8 : vector<32x32xf32> to vector<32x32xbf16>
    %cst_7 = arith.constant dense<0.000000e+00> : vector<16x32xf32>
    %11 = tpu.matmul %9, %10, %cst_7 {dimension_numbers = #tpu.dot_dimension_numbers<[1], [0], [0], [1], [0, 0, 1, 1], [], []>} : vector<16x32xbf16>, vector<32x32xbf16>, vector<16x32xf32> -> vector<16x32xf32>
    %12 = arith.addf %5, %11 : vector<16x32xf32>
    %13 = vector.extract_strided_slice %1 {offsets = [1, 0], sizes = [16, 32], strides = [1, 1]} : vector<19x32xf32> to vector<16x32xf32>
    %c1 = arith.constant 1 : index
    %c0_8 = arith.constant 0 : index
    %c0_9 = arith.constant 0 : index
    %14 = vector.load %arg1[%c1, %c0_8, %c0_9] : memref<4x32x32xf32, #tpu.memory_space<vmem>>, vector<1x32x32xf32>
    %15 = vector.shape_cast %14 : vector<1x32x32xf32> to vector<32x32xf32>
    %16 = arith.truncf %13 : vector<16x32xf32> to vector<16x32xbf16>
    %17 = arith.truncf %15 : vector<32x32xf32> to vector<32x32xbf16>
    %cst_10 = arith.constant dense<0.000000e+00> : vector<16x32xf32>
    %18 = tpu.matmul %16, %17, %cst_10 {dimension_numbers = #tpu.dot_dimension_numbers<[1], [0], [0], [1], [0, 0, 1, 1], [], []>} : vector<16x32xbf16>, vector<32x32xbf16>, vector<16x32xf32> -> vector<16x32xf32>
    %19 = arith.addf %12, %18 : vector<16x32xf32>
    %20 = vector.extract_strided_slice %1 {offsets = [2, 0], sizes = [16, 32], strides = [1, 1]} : vector<19x32xf32> to vector<16x32xf32>
    %c2 = arith.constant 2 : index
    %c0_11 = arith.constant 0 : index
    %c0_12 = arith.constant 0 : index
    %21 = vector.load %arg1[%c2, %c0_11, %c0_12] : memref<4x32x32xf32, #tpu.memory_space<vmem>>, vector<1x32x32xf32>
    %22 = vector.shape_cast %21 : vector<1x32x32xf32> to vector<32x32xf32>
    %23 = arith.truncf %20 : vector<16x32xf32> to vector<16x32xbf16>
    %24 = arith.truncf %22 : vector<32x32xf32> to vector<32x32xbf16>
    %cst_13 = arith.constant dense<0.000000e+00> : vector<16x32xf32>
    %25 = tpu.matmul %23, %24, %cst_13 {dimension_numbers = #tpu.dot_dimension_numbers<[1], [0], [0], [1], [0, 0, 1, 1], [], []>} : vector<16x32xbf16>, vector<32x32xbf16>, vector<16x32xf32> -> vector<16x32xf32>
    %26 = arith.addf %19, %25 : vector<16x32xf32>
    %27 = vector.extract_strided_slice %1 {offsets = [3, 0], sizes = [16, 32], strides = [1, 1]} : vector<19x32xf32> to vector<16x32xf32>
    %c3 = arith.constant 3 : index
    %c0_14 = arith.constant 0 : index
    %c0_15 = arith.constant 0 : index
    %28 = vector.load %arg1[%c3, %c0_14, %c0_15] : memref<4x32x32xf32, #tpu.memory_space<vmem>>, vector<1x32x32xf32>
    %29 = vector.shape_cast %28 : vector<1x32x32xf32> to vector<32x32xf32>
    %30 = arith.truncf %27 : vector<16x32xf32> to vector<16x32xbf16>
    %31 = arith.truncf %29 : vector<32x32xf32> to vector<32x32xbf16>
    %cst_16 = arith.constant dense<0.000000e+00> : vector<16x32xf32>
    %32 = tpu.matmul %30, %31, %cst_16 {dimension_numbers = #tpu.dot_dimension_numbers<[1], [0], [0], [1], [0, 0, 1, 1], [], []>} : vector<16x32xbf16>, vector<32x32xbf16>, vector<16x32xf32> -> vector<16x32xf32>
    %33 = arith.addf %26, %32 : vector<16x32xf32>
    %34 = arith.mulf %33, %33 : vector<16x32xf32>
    %35 = arith.mulf %33, %34 : vector<16x32xf32>
    %cst_17 = arith.constant 4.471500e-02 : f32
    %36 = vector.broadcast %cst_17 : f32 to vector<16x32xf32>
    %37 = arith.mulf %36, %35 : vector<16x32xf32>
    %38 = arith.addf %33, %37 : vector<16x32xf32>
    %cst_18 = arith.constant 0.797884583 : f32
    %39 = vector.broadcast %cst_18 : f32 to vector<16x32xf32>
    %40 = arith.mulf %39, %38 : vector<16x32xf32>
    %41 = math.tanh %40 : vector<16x32xf32>
    %cst_19 = arith.constant 1.000000e+00 : f32
    %42 = vector.broadcast %cst_19 : f32 to vector<16x32xf32>
    %43 = arith.addf %42, %41 : vector<16x32xf32>
    %cst_20 = arith.constant 5.000000e-01 : f32
    %44 = vector.broadcast %cst_20 : f32 to vector<16x32xf32>
    %45 = arith.mulf %44, %43 : vector<16x32xf32>
    %46 = arith.mulf %33, %45 : vector<16x32xf32>
    %47 = vector.extract_strided_slice %1 {offsets = [2, 0], sizes = [16, 32], strides = [1, 1]} : vector<19x32xf32> to vector<16x32xf32>
    %48 = arith.addf %47, %46 : vector<16x32xf32>
    %c0_21 = arith.constant 0 : index
    %c0_22 = arith.constant 0 : index
    %49 = vector.load %arg3[%c0_21, %c0_22] : memref<1x32xf32, #tpu.memory_space<vmem>>, vector<1x32xf32>
    %c0_23 = arith.constant 0 : index
    %c0_24 = arith.constant 0 : index
    %50 = vector.load %arg4[%c0_23, %c0_24] : memref<1x32xf32, #tpu.memory_space<vmem>>, vector<1x32xf32>
    %cst_25 = arith.constant dense<0.000000e+00> : vector<16xf32>
    %51 = vector.multi_reduction <add>, %48, %cst_25 [1] : vector<16x32xf32> to vector<16xf32>
    %52 = vector.shape_cast %51 : vector<16xf32> to vector<16x1xf32>
    %cst_26 = arith.constant 3.200000e+01 : f32
    %53 = vector.broadcast %cst_26 : f32 to vector<16x1xf32>
    %54 = arith.divf %52, %53 : vector<16x1xf32>
    %55 = vector.broadcast %54 : vector<16x1xf32> to vector<16x32xf32>
    %56 = arith.subf %48, %55 : vector<16x32xf32>
    %57 = arith.mulf %56, %56 : vector<16x32xf32>
    %cst_27 = arith.constant dense<0.000000e+00> : vector<16xf32>
    %58 = vector.multi_reduction <add>, %57, %cst_27 [1] : vector<16x32xf32> to vector<16xf32>
    %59 = vector.shape_cast %58 : vector<16xf32> to vector<16x1xf32>
    %cst_28 = arith.constant 3.200000e+01 : f32
    %60 = vector.broadcast %cst_28 : f32 to vector<16x1xf32>
    %61 = arith.divf %59, %60 : vector<16x1xf32>
    %62 = vector.broadcast %54 : vector<16x1xf32> to vector<16x32xf32>
    %63 = arith.subf %48, %62 : vector<16x32xf32>
    %cst_29 = arith.constant 9.99999974E-6 : f32
    %64 = vector.broadcast %cst_29 : f32 to vector<16x1xf32>
    %65 = arith.addf %61, %64 : vector<16x1xf32>
    %66 = math.rsqrt %65 : vector<16x1xf32>
    %67 = vector.broadcast %66 : vector<16x1xf32> to vector<16x32xf32>
    %68 = arith.mulf %63, %67 : vector<16x32xf32>
    %69 = vector.broadcast %49 : vector<1x32xf32> to vector<16x32xf32>
    %70 = arith.mulf %68, %69 : vector<16x32xf32>
    %71 = vector.broadcast %50 : vector<1x32xf32> to vector<16x32xf32>
    %72 = arith.addf %70, %71 : vector<16x32xf32>
    %c0_30 = arith.constant 0 : index
    %c0_31 = arith.constant 0 : index
    %c0_32 = arith.constant 0 : index
    %73 = vector.load %arg5[%c0_30, %c0_31, %c0_32] : memref<2x16x32xf32, #tpu.memory_space<vmem>>, vector<1x16x32xf32>
    %74 = vector.shape_cast %73 : vector<1x16x32xf32> to vector<16x32xf32>
    %75 = vector.shape_cast %72 : vector<16x32xf32> to vector<1x16x32xf32>
    tpu.vector_store %arg5[%c0_30, %c0_31, %c0_32], %75 {strides = array<i32>} : memref<2x16x32xf32, #tpu.memory_space<vmem>>, vector<1x16x32xf32>,
    %c1_33 = arith.constant 1 : index
    %c0_34 = arith.constant 0 : index
    %c0_35 = arith.constant 0 : index
    %76 = vector.load %arg0[%c1_33, %c0_34, %c0_35] : memref<2x19x32xf32, #tpu.memory_space<vmem>>, vector<1x19x32xf32>
    %77 = vector.shape_cast %76 : vector<1x19x32xf32> to vector<19x32xf32>
    %cst_36 = arith.constant 0.000000e+00 : f32
    %78 = vector.broadcast %cst_36 : f32 to vector<16x32xf32>
    %c0_37 = arith.constant 0 : index
    %c0_38 = arith.constant 0 : index
    %79 = vector.load %arg2[%c0_37, %c0_38] : memref<1x32xf32, #tpu.memory_space<vmem>>, vector<1x32xf32>
    %80 = vector.broadcast %79 : vector<1x32xf32> to vector<16x32xf32>
    %81 = arith.addf %78, %80 : vector<16x32xf32>
    %82 = vector.extract_strided_slice %77 {offsets = [0, 0], sizes = [16, 32], strides = [1, 1]} : vector<19x32xf32> to vector<16x32xf32>
    %c0_39 = arith.constant 0 : index
    %c0_40 = arith.constant 0 : index
    %c0_41 = arith.constant 0 : index
    %83 = vector.load %arg1[%c0_39, %c0_40, %c0_41] : memref<4x32x32xf32, #tpu.memory_space<vmem>>, vector<1x32x32xf32>
    %84 = vector.shape_cast %83 : vector<1x32x32xf32> to vector<32x32xf32>
    %85 = arith.truncf %82 : vector<16x32xf32> to vector<16x32xbf16>
    %86 = arith.truncf %84 : vector<32x32xf32> to vector<32x32xbf16>
    %cst_42 = arith.constant dense<0.000000e+00> : vector<16x32xf32>
    %87 = tpu.matmul %85, %86, %cst_42 {dimension_numbers = #tpu.dot_dimension_numbers<[1], [0], [0], [1], [0, 0, 1, 1], [], []>} : vector<16x32xbf16>, vector<32x32xbf16>, vector<16x32xf32> -> vector<16x32xf32>
    %88 = arith.addf %81, %87 : vector<16x32xf32>
    %89 = vector.extract_strided_slice %77 {offsets = [1, 0], sizes = [16, 32], strides = [1, 1]} : vector<19x32xf32> to vector<16x32xf32>
    %c1_43 = arith.constant 1 : index
    %c0_44 = arith.constant 0 : index
    %c0_45 = arith.constant 0 : index
    %90 = vector.load %arg1[%c1_43, %c0_44, %c0_45] : memref<4x32x32xf32, #tpu.memory_space<vmem>>, vector<1x32x32xf32>
    %91 = vector.shape_cast %90 : vector<1x32x32xf32> to vector<32x32xf32>
    %92 = arith.truncf %89 : vector<16x32xf32> to vector<16x32xbf16>
    %93 = arith.truncf %91 : vector<32x32xf32> to vector<32x32xbf16>
    %cst_46 = arith.constant dense<0.000000e+00> : vector<16x32xf32>
    %94 = tpu.matmul %92, %93, %cst_46 {dimension_numbers = #tpu.dot_dimension_numbers<[1], [0], [0], [1], [0, 0, 1, 1], [], []>} : vector<16x32xbf16>, vector<32x32xbf16>, vector<16x32xf32> -> vector<16x32xf32>
    %95 = arith.addf %88, %94 : vector<16x32xf32>
    %96 = vector.extract_strided_slice %77 {offsets = [2, 0], sizes = [16, 32], strides = [1, 1]} : vector<19x32xf32> to vector<16x32xf32>
    %c2_47 = arith.constant 2 : index
    %c0_48 = arith.constant 0 : index
    %c0_49 = arith.constant 0 : index
    %97 = vector.load %arg1[%c2_47, %c0_48, %c0_49] : memref<4x32x32xf32, #tpu.memory_space<vmem>>, vector<1x32x32xf32>
    %98 = vector.shape_cast %97 : vector<1x32x32xf32> to vector<32x32xf32>
    %99 = arith.truncf %96 : vector<16x32xf32> to vector<16x32xbf16>
    %100 = arith.truncf %98 : vector<32x32xf32> to vector<32x32xbf16>
    %cst_50 = arith.constant dense<0.000000e+00> : vector<16x32xf32>
    %101 = tpu.matmul %99, %100, %cst_50 {dimension_numbers = #tpu.dot_dimension_numbers<[1], [0], [0], [1], [0, 0, 1, 1], [], []>} : vector<16x32xbf16>, vector<32x32xbf16>, vector<16x32xf32> -> vector<16x32xf32>
    %102 = arith.addf %95, %101 : vector<16x32xf32>
    %103 = vector.extract_strided_slice %77 {offsets = [3, 0], sizes = [16, 32], strides = [1, 1]} : vector<19x32xf32> to vector<16x32xf32>
    %c3_51 = arith.constant 3 : index
    %c0_52 = arith.constant 0 : index
    %c0_53 = arith.constant 0 : index
    %104 = vector.load %arg1[%c3_51, %c0_52, %c0_53] : memref<4x32x32xf32, #tpu.memory_space<vmem>>, vector<1x32x32xf32>
    %105 = vector.shape_cast %104 : vector<1x32x32xf32> to vector<32x32xf32>
    %106 = arith.truncf %103 : vector<16x32xf32> to vector<16x32xbf16>
    %107 = arith.truncf %105 : vector<32x32xf32> to vector<32x32xbf16>
    %cst_54 = arith.constant dense<0.000000e+00> : vector<16x32xf32>
    %108 = tpu.matmul %106, %107, %cst_54 {dimension_numbers = #tpu.dot_dimension_numbers<[1], [0], [0], [1], [0, 0, 1, 1], [], []>} : vector<16x32xbf16>, vector<32x32xbf16>, vector<16x32xf32> -> vector<16x32xf32>
    %109 = arith.addf %102, %108 : vector<16x32xf32>
    %110 = arith.mulf %109, %109 : vector<16x32xf32>
    %111 = arith.mulf %109, %110 : vector<16x32xf32>
    %cst_55 = arith.constant 4.471500e-02 : f32
    %112 = vector.broadcast %cst_55 : f32 to vector<16x32xf32>
    %113 = arith.mulf %112, %111 : vector<16x32xf32>
    %114 = arith.addf %109, %113 : vector<16x32xf32>
    %cst_56 = arith.constant 0.797884583 : f32
    %115 = vector.broadcast %cst_56 : f32 to vector<16x32xf32>
    %116 = arith.mulf %115, %114 : vector<16x32xf32>
    %117 = math.tanh %116 : vector<16x32xf32>
    %cst_57 = arith.constant 1.000000e+00 : f32
    %118 = vector.broadcast %cst_57 : f32 to vector<16x32xf32>
    %119 = arith.addf %118, %117 : vector<16x32xf32>
    %cst_58 = arith.constant 5.000000e-01 : f32
    %120 = vector.broadcast %cst_58 : f32 to vector<16x32xf32>
    %121 = arith.mulf %120, %119 : vector<16x32xf32>
    %122 = arith.mulf %109, %121 : vector<16x32xf32>
    %123 = vector.extract_strided_slice %77 {offsets = [2, 0], sizes = [16, 32], strides = [1, 1]} : vector<19x32xf32> to vector<16x32xf32>
    %124 = arith.addf %123, %122 : vector<16x32xf32>
    %c0_59 = arith.constant 0 : index
    %c0_60 = arith.constant 0 : index
    %125 = vector.load %arg3[%c0_59, %c0_60] : memref<1x32xf32, #tpu.memory_space<vmem>>, vector<1x32xf32>
    %c0_61 = arith.constant 0 : index
    %c0_62 = arith.constant 0 : index
    %126 = vector.load %arg4[%c0_61, %c0_62] : memref<1x32xf32, #tpu.memory_space<vmem>>, vector<1x32xf32>
    %cst_63 = arith.constant dense<0.000000e+00> : vector<16xf32>
    %127 = vector.multi_reduction <add>, %124, %cst_63 [1] : vector<16x32xf32> to vector<16xf32>
    %128 = vector.shape_cast %127 : vector<16xf32> to vector<16x1xf32>
    %cst_64 = arith.constant 3.200000e+01 : f32
    %129 = vector.broadcast %cst_64 : f32 to vector<16x1xf32>
    %130 = arith.divf %128, %129 : vector<16x1xf32>
    %131 = vector.broadcast %130 : vector<16x1xf32> to vector<16x32xf32>
    %132 = arith.subf %124, %131 : vector<16x32xf32>
    %133 = arith.mulf %132, %132 : vector<16x32xf32>
    %cst_65 = arith.constant dense<0.000000e+00> : vector<16xf32>
    %134 = vector.multi_reduction <add>, %133, %cst_65 [1] : vector<16x32xf32> to vector<16xf32>
    %135 = vector.shape_cast %134 : vector<16xf32> to vector<16x1xf32>
    %cst_66 = arith.constant 3.200000e+01 : f32
    %136 = vector.broadcast %cst_66 : f32 to vector<16x1xf32>
    %137 = arith.divf %135, %136 : vector<16x1xf32>
    %138 = vector.broadcast %130 : vector<16x1xf32> to vector<16x32xf32>
    %139 = arith.subf %124, %138 : vector<16x32xf32>
    %cst_67 = arith.constant 9.99999974E-6 : f32
    %140 = vector.broadcast %cst_67 : f32 to vector<16x1xf32>
    %141 = arith.addf %137, %140 : vector<16x1xf32>
    %142 = math.rsqrt %141 : vector<16x1xf32>
    %143 = vector.broadcast %142 : vector<16x1xf32> to vector<16x32xf32>
    %144 = arith.mulf %139, %143 : vector<16x32xf32>
    %145 = vector.broadcast %125 : vector<1x32xf32> to vector<16x32xf32>
    %146 = arith.mulf %144, %145 : vector<16x32xf32>
    %147 = vector.broadcast %126 : vector<1x32xf32> to vector<16x32xf32>
    %148 = arith.addf %146, %147 : vector<16x32xf32>
    %c1_68 = arith.constant 1 : index
    %c0_69 = arith.constant 0 : index
    %c0_70 = arith.constant 0 : index
    %149 = vector.load %arg5[%c1_68, %c0_69, %c0_70] : memref<2x16x32xf32, #tpu.memory_space<vmem>>, vector<1x16x32xf32>
    %150 = vector.shape_cast %149 : vector<1x16x32xf32> to vector<16x32xf32>
    %151 = vector.shape_cast %148 : vector<16x32xf32> to vector<1x16x32xf32>
    tpu.vector_store %arg5[%c1_68, %c0_69, %c0_70], %151 {strides = array<i32>} : memref<2x16x32xf32, #tpu.memory_space<vmem>>, vector<1x16x32xf32>,
    return
  }
}

module attributes {stable_mosaic.version = 11 : i64} {
  func.func @_layer_kernel(%arg0: memref<32x32xf32, #tpu.memory_space<vmem>>, %arg1: memref<32x32xf32, #tpu.memory_space<vmem>>, %arg2: memref<32x96xf32, #tpu.memory_space<vmem>>, %arg3: memref<1x96xf32, #tpu.memory_space<vmem>>, %arg4: memref<32x32xf32, #tpu.memory_space<vmem>>, %arg5: memref<1x32xf32, #tpu.memory_space<vmem>>, %arg6: memref<1x32xf32, #tpu.memory_space<vmem>>, %arg7: memref<1x32xf32, #tpu.memory_space<vmem>>, %arg8: memref<32x64xf32, #tpu.memory_space<vmem>>, %arg9: memref<1x64xf32, #tpu.memory_space<vmem>>, %arg10: memref<64x32xf32, #tpu.memory_space<vmem>>, %arg11: memref<1x32xf32, #tpu.memory_space<vmem>>, %arg12: memref<1x32xf32, #tpu.memory_space<vmem>>, %arg13: memref<1x32xf32, #tpu.memory_space<vmem>>, %arg14: memref<32x32xf32, #tpu.memory_space<vmem>>) attributes {dimension_semantics = [], scalar_prefetch = 0 : i64, scratch_operands = 0 : i64, tpu.core_type = #tpu.core_type<tc>} {
    %c0 = arith.constant 0 : index
    %c0_0 = arith.constant 0 : index
    %0 = vector.load %arg0[%c0, %c0_0] : memref<32x32xf32, #tpu.memory_space<vmem>>, vector<32x32xf32>
    %c0_1 = arith.constant 0 : index
    %c0_2 = arith.constant 0 : index
    %1 = vector.load %arg2[%c0_1, %c0_2] : memref<32x96xf32, #tpu.memory_space<vmem>>, vector<32x96xf32>
    %2 = arith.truncf %0 : vector<32x32xf32> to vector<32x32xbf16>
    %3 = arith.truncf %1 : vector<32x96xf32> to vector<32x96xbf16>
    %cst = arith.constant dense<0.000000e+00> : vector<32x96xf32>
    %4 = tpu.matmul %2, %3, %cst {dimension_numbers = #tpu.dot_dimension_numbers<[1], [0], [0], [1], [0, 0, 1, 1], [], []>} : vector<32x32xbf16>, vector<32x96xbf16>, vector<32x96xf32> -> vector<32x96xf32>
    %c0_3 = arith.constant 0 : index
    %c0_4 = arith.constant 0 : index
    %5 = vector.load %arg3[%c0_3, %c0_4] : memref<1x96xf32, #tpu.memory_space<vmem>>, vector<1x96xf32>
    %6 = vector.broadcast %5 : vector<1x96xf32> to vector<32x96xf32>
    %7 = arith.addf %4, %6 : vector<32x96xf32>
    %c0_5 = arith.constant 0 : index
    %c0_6 = arith.constant 0 : index
    %8 = vector.load %arg4[%c0_5, %c0_6] : memref<32x32xf32, #tpu.memory_space<vmem>>, vector<32x32xf32>
    %c0_7 = arith.constant 0 : index
    %c0_8 = arith.constant 0 : index
    %9 = vector.load %arg1[%c0_7, %c0_8] : memref<32x32xf32, #tpu.memory_space<vmem>>, vector<32x32xf32>
    %cst_9 = arith.constant 0.000000e+00 : f32
    %10 = vector.broadcast %cst_9 : f32 to vector<32x32xf32>
    %c0_10 = arith.constant 0 : index
    %c0_11 = arith.constant 0 : index
    %11 = vector.load %arg5[%c0_10, %c0_11] : memref<1x32xf32, #tpu.memory_space<vmem>>, vector<1x32xf32>
    %12 = vector.broadcast %11 : vector<1x32xf32> to vector<32x32xf32>
    %13 = arith.addf %10, %12 : vector<32x32xf32>
    %14 = vector.extract_strided_slice %7 {offsets = [0, 0], sizes = [32, 8], strides = [1, 1]} : vector<32x96xf32> to vector<32x8xf32>
    %15 = vector.extract_strided_slice %7 {offsets = [0, 32], sizes = [32, 8], strides = [1, 1]} : vector<32x96xf32> to vector<32x8xf32>
    %16 = vector.extract_strided_slice %7 {offsets = [0, 64], sizes = [32, 8], strides = [1, 1]} : vector<32x96xf32> to vector<32x8xf32>
    %17 = arith.truncf %14 : vector<32x8xf32> to vector<32x8xbf16>
    %18 = arith.truncf %15 : vector<32x8xf32> to vector<32x8xbf16>
    "tpu.trace_start"() <{level = 10 : i32, message = "qd,kd->qk"}> : () -> ()
    %cst_12 = arith.constant dense<0.000000e+00> : vector<32x32xf32>
    %19 = tpu.matmul %17, %18, %cst_12 {dimension_numbers = #tpu.dot_dimension_numbers<[1], [1], [0], [0], [0, 0, 1, 0], [], []>} : vector<32x8xbf16>, vector<32x8xbf16>, vector<32x32xf32> -> vector<32x32xf32>
    "tpu.trace_stop"() : () -> ()
    %cst_13 = arith.constant 0.353553385 : f32
    %20 = vector.broadcast %cst_13 : f32 to vector<32x32xf32>
    %21 = arith.mulf %19, %20 : vector<32x32xf32>
    %22 = arith.addf %21, %9 : vector<32x32xf32>
    %cst_14 = arith.constant dense<0xFF800000> : vector<32xf32>
    %23 = vector.multi_reduction <maximumf>, %22, %cst_14 [1] : vector<32x32xf32> to vector<32xf32>
    %24 = vector.shape_cast %23 : vector<32xf32> to vector<32x1xf32>
    %25 = vector.broadcast %24 : vector<32x1xf32> to vector<32x32xf32>
    %26 = arith.subf %22, %25 : vector<32x32xf32>
    %27 = math.exp %26 : vector<32x32xf32>
    %cst_15 = arith.constant dense<0.000000e+00> : vector<32xf32>
    %28 = vector.multi_reduction <add>, %27, %cst_15 [1] : vector<32x32xf32> to vector<32xf32>
    %29 = vector.shape_cast %28 : vector<32xf32> to vector<32x1xf32>
    %30 = tpu.reciprocal %29 {approx = true} : vector<32x1xf32> -> vector<32x1xf32>
    %31 = vector.broadcast %30 : vector<32x1xf32> to vector<32x32xf32>
    %32 = arith.mulf %27, %31 : vector<32x32xf32>
    %33 = arith.truncf %32 : vector<32x32xf32> to vector<32x32xbf16>
    %34 = arith.truncf %16 : vector<32x8xf32> to vector<32x8xbf16>
    %cst_16 = arith.constant dense<0.000000e+00> : vector<32x8xf32>
    %35 = tpu.matmul %33, %34, %cst_16 {dimension_numbers = #tpu.dot_dimension_numbers<[1], [0], [0], [1], [0, 0, 1, 1], [], []>} : vector<32x32xbf16>, vector<32x8xbf16>, vector<32x8xf32> -> vector<32x8xf32>
    %36 = vector.extract_strided_slice %8 {offsets = [0, 0], sizes = [8, 32], strides = [1, 1]} : vector<32x32xf32> to vector<8x32xf32>
    %37 = arith.truncf %35 : vector<32x8xf32> to vector<32x8xbf16>
    %38 = arith.truncf %36 : vector<8x32xf32> to vector<8x32xbf16>
    %cst_17 = arith.constant dense<0.000000e+00> : vector<32x32xf32>
    %39 = tpu.matmul %37, %38, %cst_17 {dimension_numbers = #tpu.dot_dimension_numbers<[1], [0], [0], [1], [0, 0, 1, 1], [], []>} : vector<32x8xbf16>, vector<8x32xbf16>, vector<32x32xf32> -> vector<32x32xf32>
    %40 = arith.addf %13, %39 : vector<32x32xf32>
    %41 = vector.extract_strided_slice %7 {offsets = [0, 8], sizes = [32, 8], strides = [1, 1]} : vector<32x96xf32> to vector<32x8xf32>
    %42 = vector.extract_strided_slice %7 {offsets = [0, 40], sizes = [32, 8], strides = [1, 1]} : vector<32x96xf32> to vector<32x8xf32>
    %43 = vector.extract_strided_slice %7 {offsets = [0, 72], sizes = [32, 8], strides = [1, 1]} : vector<32x96xf32> to vector<32x8xf32>
    %44 = arith.truncf %41 : vector<32x8xf32> to vector<32x8xbf16>
    %45 = arith.truncf %42 : vector<32x8xf32> to vector<32x8xbf16>
    "tpu.trace_start"() <{level = 10 : i32, message = "qd,kd->qk"}> : () -> ()
    %cst_18 = arith.constant dense<0.000000e+00> : vector<32x32xf32>
    %46 = tpu.matmul %44, %45, %cst_18 {dimension_numbers = #tpu.dot_dimension_numbers<[1], [1], [0], [0], [0, 0, 1, 0], [], []>} : vector<32x8xbf16>, vector<32x8xbf16>, vector<32x32xf32> -> vector<32x32xf32>
    "tpu.trace_stop"() : () -> ()
    %cst_19 = arith.constant 0.353553385 : f32
    %47 = vector.broadcast %cst_19 : f32 to vector<32x32xf32>
    %48 = arith.mulf %46, %47 : vector<32x32xf32>
    %49 = arith.addf %48, %9 : vector<32x32xf32>
    %cst_20 = arith.constant dense<0xFF800000> : vector<32xf32>
    %50 = vector.multi_reduction <maximumf>, %49, %cst_20 [1] : vector<32x32xf32> to vector<32xf32>
    %51 = vector.shape_cast %50 : vector<32xf32> to vector<32x1xf32>
    %52 = vector.broadcast %51 : vector<32x1xf32> to vector<32x32xf32>
    %53 = arith.subf %49, %52 : vector<32x32xf32>
    %54 = math.exp %53 : vector<32x32xf32>
    %cst_21 = arith.constant dense<0.000000e+00> : vector<32xf32>
    %55 = vector.multi_reduction <add>, %54, %cst_21 [1] : vector<32x32xf32> to vector<32xf32>
    %56 = vector.shape_cast %55 : vector<32xf32> to vector<32x1xf32>
    %57 = tpu.reciprocal %56 {approx = true} : vector<32x1xf32> -> vector<32x1xf32>
    %58 = vector.broadcast %57 : vector<32x1xf32> to vector<32x32xf32>
    %59 = arith.mulf %54, %58 : vector<32x32xf32>
    %60 = arith.truncf %59 : vector<32x32xf32> to vector<32x32xbf16>
    %61 = arith.truncf %43 : vector<32x8xf32> to vector<32x8xbf16>
    %cst_22 = arith.constant dense<0.000000e+00> : vector<32x8xf32>
    %62 = tpu.matmul %60, %61, %cst_22 {dimension_numbers = #tpu.dot_dimension_numbers<[1], [0], [0], [1], [0, 0, 1, 1], [], []>} : vector<32x32xbf16>, vector<32x8xbf16>, vector<32x8xf32> -> vector<32x8xf32>
    %63 = vector.extract_strided_slice %8 {offsets = [8, 0], sizes = [8, 32], strides = [1, 1]} : vector<32x32xf32> to vector<8x32xf32>
    %64 = arith.truncf %62 : vector<32x8xf32> to vector<32x8xbf16>
    %65 = arith.truncf %63 : vector<8x32xf32> to vector<8x32xbf16>
    %cst_23 = arith.constant dense<0.000000e+00> : vector<32x32xf32>
    %66 = tpu.matmul %64, %65, %cst_23 {dimension_numbers = #tpu.dot_dimension_numbers<[1], [0], [0], [1], [0, 0, 1, 1], [], []>} : vector<32x8xbf16>, vector<8x32xbf16>, vector<32x32xf32> -> vector<32x32xf32>
    %67 = arith.addf %40, %66 : vector<32x32xf32>
    %68 = vector.extract_strided_slice %7 {offsets = [0, 16], sizes = [32, 8], strides = [1, 1]} : vector<32x96xf32> to vector<32x8xf32>
    %69 = vector.extract_strided_slice %7 {offsets = [0, 48], sizes = [32, 8], strides = [1, 1]} : vector<32x96xf32> to vector<32x8xf32>
    %70 = vector.extract_strided_slice %7 {offsets = [0, 80], sizes = [32, 8], strides = [1, 1]} : vector<32x96xf32> to vector<32x8xf32>
    %71 = arith.truncf %68 : vector<32x8xf32> to vector<32x8xbf16>
    %72 = arith.truncf %69 : vector<32x8xf32> to vector<32x8xbf16>
    "tpu.trace_start"() <{level = 10 : i32, message = "qd,kd->qk"}> : () -> ()
    %cst_24 = arith.constant dense<0.000000e+00> : vector<32x32xf32>
    %73 = tpu.matmul %71, %72, %cst_24 {dimension_numbers = #tpu.dot_dimension_numbers<[1], [1], [0], [0], [0, 0, 1, 0], [], []>} : vector<32x8xbf16>, vector<32x8xbf16>, vector<32x32xf32> -> vector<32x32xf32>
    "tpu.trace_stop"() : () -> ()
    %cst_25 = arith.constant 0.353553385 : f32
    %74 = vector.broadcast %cst_25 : f32 to vector<32x32xf32>
    %75 = arith.mulf %73, %74 : vector<32x32xf32>
    %76 = arith.addf %75, %9 : vector<32x32xf32>
    %cst_26 = arith.constant dense<0xFF800000> : vector<32xf32>
    %77 = vector.multi_reduction <maximumf>, %76, %cst_26 [1] : vector<32x32xf32> to vector<32xf32>
    %78 = vector.shape_cast %77 : vector<32xf32> to vector<32x1xf32>
    %79 = vector.broadcast %78 : vector<32x1xf32> to vector<32x32xf32>
    %80 = arith.subf %76, %79 : vector<32x32xf32>
    %81 = math.exp %80 : vector<32x32xf32>
    %cst_27 = arith.constant dense<0.000000e+00> : vector<32xf32>
    %82 = vector.multi_reduction <add>, %81, %cst_27 [1] : vector<32x32xf32> to vector<32xf32>
    %83 = vector.shape_cast %82 : vector<32xf32> to vector<32x1xf32>
    %84 = tpu.reciprocal %83 {approx = true} : vector<32x1xf32> -> vector<32x1xf32>
    %85 = vector.broadcast %84 : vector<32x1xf32> to vector<32x32xf32>
    %86 = arith.mulf %81, %85 : vector<32x32xf32>
    %87 = arith.truncf %86 : vector<32x32xf32> to vector<32x32xbf16>
    %88 = arith.truncf %70 : vector<32x8xf32> to vector<32x8xbf16>
    %cst_28 = arith.constant dense<0.000000e+00> : vector<32x8xf32>
    %89 = tpu.matmul %87, %88, %cst_28 {dimension_numbers = #tpu.dot_dimension_numbers<[1], [0], [0], [1], [0, 0, 1, 1], [], []>} : vector<32x32xbf16>, vector<32x8xbf16>, vector<32x8xf32> -> vector<32x8xf32>
    %90 = vector.extract_strided_slice %8 {offsets = [16, 0], sizes = [8, 32], strides = [1, 1]} : vector<32x32xf32> to vector<8x32xf32>
    %91 = arith.truncf %89 : vector<32x8xf32> to vector<32x8xbf16>
    %92 = arith.truncf %90 : vector<8x32xf32> to vector<8x32xbf16>
    %cst_29 = arith.constant dense<0.000000e+00> : vector<32x32xf32>
    %93 = tpu.matmul %91, %92, %cst_29 {dimension_numbers = #tpu.dot_dimension_numbers<[1], [0], [0], [1], [0, 0, 1, 1], [], []>} : vector<32x8xbf16>, vector<8x32xbf16>, vector<32x32xf32> -> vector<32x32xf32>
    %94 = arith.addf %67, %93 : vector<32x32xf32>
    %95 = vector.extract_strided_slice %7 {offsets = [0, 24], sizes = [32, 8], strides = [1, 1]} : vector<32x96xf32> to vector<32x8xf32>
    %96 = vector.extract_strided_slice %7 {offsets = [0, 56], sizes = [32, 8], strides = [1, 1]} : vector<32x96xf32> to vector<32x8xf32>
    %97 = vector.extract_strided_slice %7 {offsets = [0, 88], sizes = [32, 8], strides = [1, 1]} : vector<32x96xf32> to vector<32x8xf32>
    %98 = arith.truncf %95 : vector<32x8xf32> to vector<32x8xbf16>
    %99 = arith.truncf %96 : vector<32x8xf32> to vector<32x8xbf16>
    "tpu.trace_start"() <{level = 10 : i32, message = "qd,kd->qk"}> : () -> ()
    %cst_30 = arith.constant dense<0.000000e+00> : vector<32x32xf32>
    %100 = tpu.matmul %98, %99, %cst_30 {dimension_numbers = #tpu.dot_dimension_numbers<[1], [1], [0], [0], [0, 0, 1, 0], [], []>} : vector<32x8xbf16>, vector<32x8xbf16>, vector<32x32xf32> -> vector<32x32xf32>
    "tpu.trace_stop"() : () -> ()
    %cst_31 = arith.constant 0.353553385 : f32
    %101 = vector.broadcast %cst_31 : f32 to vector<32x32xf32>
    %102 = arith.mulf %100, %101 : vector<32x32xf32>
    %103 = arith.addf %102, %9 : vector<32x32xf32>
    %cst_32 = arith.constant dense<0xFF800000> : vector<32xf32>
    %104 = vector.multi_reduction <maximumf>, %103, %cst_32 [1] : vector<32x32xf32> to vector<32xf32>
    %105 = vector.shape_cast %104 : vector<32xf32> to vector<32x1xf32>
    %106 = vector.broadcast %105 : vector<32x1xf32> to vector<32x32xf32>
    %107 = arith.subf %103, %106 : vector<32x32xf32>
    %108 = math.exp %107 : vector<32x32xf32>
    %cst_33 = arith.constant dense<0.000000e+00> : vector<32xf32>
    %109 = vector.multi_reduction <add>, %108, %cst_33 [1] : vector<32x32xf32> to vector<32xf32>
    %110 = vector.shape_cast %109 : vector<32xf32> to vector<32x1xf32>
    %111 = tpu.reciprocal %110 {approx = true} : vector<32x1xf32> -> vector<32x1xf32>
    %112 = vector.broadcast %111 : vector<32x1xf32> to vector<32x32xf32>
    %113 = arith.mulf %108, %112 : vector<32x32xf32>
    %114 = arith.truncf %113 : vector<32x32xf32> to vector<32x32xbf16>
    %115 = arith.truncf %97 : vector<32x8xf32> to vector<32x8xbf16>
    %cst_34 = arith.constant dense<0.000000e+00> : vector<32x8xf32>
    %116 = tpu.matmul %114, %115, %cst_34 {dimension_numbers = #tpu.dot_dimension_numbers<[1], [0], [0], [1], [0, 0, 1, 1], [], []>} : vector<32x32xbf16>, vector<32x8xbf16>, vector<32x8xf32> -> vector<32x8xf32>
    %117 = vector.extract_strided_slice %8 {offsets = [24, 0], sizes = [8, 32], strides = [1, 1]} : vector<32x32xf32> to vector<8x32xf32>
    %118 = arith.truncf %116 : vector<32x8xf32> to vector<32x8xbf16>
    %119 = arith.truncf %117 : vector<8x32xf32> to vector<8x32xbf16>
    %cst_35 = arith.constant dense<0.000000e+00> : vector<32x32xf32>
    %120 = tpu.matmul %118, %119, %cst_35 {dimension_numbers = #tpu.dot_dimension_numbers<[1], [0], [0], [1], [0, 0, 1, 1], [], []>} : vector<32x8xbf16>, vector<8x32xbf16>, vector<32x32xf32> -> vector<32x32xf32>
    %121 = arith.addf %94, %120 : vector<32x32xf32>
    %122 = arith.addf %0, %121 : vector<32x32xf32>
    %c0_36 = arith.constant 0 : index
    %c0_37 = arith.constant 0 : index
    %123 = vector.load %arg6[%c0_36, %c0_37] : memref<1x32xf32, #tpu.memory_space<vmem>>, vector<1x32xf32>
    %c0_38 = arith.constant 0 : index
    %c0_39 = arith.constant 0 : index
    %124 = vector.load %arg7[%c0_38, %c0_39] : memref<1x32xf32, #tpu.memory_space<vmem>>, vector<1x32xf32>
    %cst_40 = arith.constant dense<0.000000e+00> : vector<32xf32>
    %125 = vector.multi_reduction <add>, %122, %cst_40 [1] : vector<32x32xf32> to vector<32xf32>
    %126 = vector.shape_cast %125 : vector<32xf32> to vector<32x1xf32>
    %cst_41 = arith.constant 3.200000e+01 : f32
    %127 = vector.broadcast %cst_41 : f32 to vector<32x1xf32>
    %128 = arith.divf %126, %127 : vector<32x1xf32>
    %129 = vector.broadcast %128 : vector<32x1xf32> to vector<32x32xf32>
    %130 = arith.subf %122, %129 : vector<32x32xf32>
    %131 = arith.mulf %130, %130 : vector<32x32xf32>
    %cst_42 = arith.constant dense<0.000000e+00> : vector<32xf32>
    %132 = vector.multi_reduction <add>, %131, %cst_42 [1] : vector<32x32xf32> to vector<32xf32>
    %133 = vector.shape_cast %132 : vector<32xf32> to vector<32x1xf32>
    %cst_43 = arith.constant 3.200000e+01 : f32
    %134 = vector.broadcast %cst_43 : f32 to vector<32x1xf32>
    %135 = arith.divf %133, %134 : vector<32x1xf32>
    %136 = vector.broadcast %128 : vector<32x1xf32> to vector<32x32xf32>
    %137 = arith.subf %122, %136 : vector<32x32xf32>
    %cst_44 = arith.constant 9.99999974E-6 : f32
    %138 = vector.broadcast %cst_44 : f32 to vector<32x1xf32>
    %139 = arith.addf %135, %138 : vector<32x1xf32>
    %140 = math.rsqrt %139 : vector<32x1xf32>
    %141 = vector.broadcast %140 : vector<32x1xf32> to vector<32x32xf32>
    %142 = arith.mulf %137, %141 : vector<32x32xf32>
    %143 = vector.broadcast %123 : vector<1x32xf32> to vector<32x32xf32>
    %144 = arith.mulf %142, %143 : vector<32x32xf32>
    %145 = vector.broadcast %124 : vector<1x32xf32> to vector<32x32xf32>
    %146 = arith.addf %144, %145 : vector<32x32xf32>
    %c0_45 = arith.constant 0 : index
    %c0_46 = arith.constant 0 : index
    %147 = vector.load %arg8[%c0_45, %c0_46] : memref<32x64xf32, #tpu.memory_space<vmem>>, vector<32x64xf32>
    %148 = arith.truncf %146 : vector<32x32xf32> to vector<32x32xbf16>
    %149 = arith.truncf %147 : vector<32x64xf32> to vector<32x64xbf16>
    %cst_47 = arith.constant dense<0.000000e+00> : vector<32x64xf32>
    %150 = tpu.matmul %148, %149, %cst_47 {dimension_numbers = #tpu.dot_dimension_numbers<[1], [0], [0], [1], [0, 0, 1, 1], [], []>} : vector<32x32xbf16>, vector<32x64xbf16>, vector<32x64xf32> -> vector<32x64xf32>
    %c0_48 = arith.constant 0 : index
    %c0_49 = arith.constant 0 : index
    %151 = vector.load %arg9[%c0_48, %c0_49] : memref<1x64xf32, #tpu.memory_space<vmem>>, vector<1x64xf32>
    %152 = vector.broadcast %151 : vector<1x64xf32> to vector<32x64xf32>
    %153 = arith.addf %150, %152 : vector<32x64xf32>
    %154 = arith.mulf %153, %153 : vector<32x64xf32>
    %155 = arith.mulf %153, %154 : vector<32x64xf32>
    %cst_50 = arith.constant 4.471500e-02 : f32
    %156 = vector.broadcast %cst_50 : f32 to vector<32x64xf32>
    %157 = arith.mulf %156, %155 : vector<32x64xf32>
    %158 = arith.addf %153, %157 : vector<32x64xf32>
    %cst_51 = arith.constant 0.797884583 : f32
    %159 = vector.broadcast %cst_51 : f32 to vector<32x64xf32>
    %160 = arith.mulf %159, %158 : vector<32x64xf32>
    %161 = math.tanh %160 : vector<32x64xf32>
    %cst_52 = arith.constant 1.000000e+00 : f32
    %162 = vector.broadcast %cst_52 : f32 to vector<32x64xf32>
    %163 = arith.addf %162, %161 : vector<32x64xf32>
    %cst_53 = arith.constant 5.000000e-01 : f32
    %164 = vector.broadcast %cst_53 : f32 to vector<32x64xf32>
    %165 = arith.mulf %164, %163 : vector<32x64xf32>
    %166 = arith.mulf %153, %165 : vector<32x64xf32>
    %c0_54 = arith.constant 0 : index
    %c0_55 = arith.constant 0 : index
    %167 = vector.load %arg10[%c0_54, %c0_55] : memref<64x32xf32, #tpu.memory_space<vmem>>, vector<64x32xf32>
    %168 = arith.truncf %166 : vector<32x64xf32> to vector<32x64xbf16>
    %169 = arith.truncf %167 : vector<64x32xf32> to vector<64x32xbf16>
    %cst_56 = arith.constant dense<0.000000e+00> : vector<32x32xf32>
    %170 = tpu.matmul %168, %169, %cst_56 {dimension_numbers = #tpu.dot_dimension_numbers<[1], [0], [0], [1], [0, 0, 1, 1], [], []>} : vector<32x64xbf16>, vector<64x32xbf16>, vector<32x32xf32> -> vector<32x32xf32>
    %c0_57 = arith.constant 0 : index
    %c0_58 = arith.constant 0 : index
    %171 = vector.load %arg11[%c0_57, %c0_58] : memref<1x32xf32, #tpu.memory_space<vmem>>, vector<1x32xf32>
    %172 = vector.broadcast %171 : vector<1x32xf32> to vector<32x32xf32>
    %173 = arith.addf %170, %172 : vector<32x32xf32>
    %174 = arith.addf %146, %173 : vector<32x32xf32>
    %c0_59 = arith.constant 0 : index
    %c0_60 = arith.constant 0 : index
    %175 = vector.load %arg12[%c0_59, %c0_60] : memref<1x32xf32, #tpu.memory_space<vmem>>, vector<1x32xf32>
    %c0_61 = arith.constant 0 : index
    %c0_62 = arith.constant 0 : index
    %176 = vector.load %arg13[%c0_61, %c0_62] : memref<1x32xf32, #tpu.memory_space<vmem>>, vector<1x32xf32>
    %cst_63 = arith.constant dense<0.000000e+00> : vector<32xf32>
    %177 = vector.multi_reduction <add>, %174, %cst_63 [1] : vector<32x32xf32> to vector<32xf32>
    %178 = vector.shape_cast %177 : vector<32xf32> to vector<32x1xf32>
    %cst_64 = arith.constant 3.200000e+01 : f32
    %179 = vector.broadcast %cst_64 : f32 to vector<32x1xf32>
    %180 = arith.divf %178, %179 : vector<32x1xf32>
    %181 = vector.broadcast %180 : vector<32x1xf32> to vector<32x32xf32>
    %182 = arith.subf %174, %181 : vector<32x32xf32>
    %183 = arith.mulf %182, %182 : vector<32x32xf32>
    %cst_65 = arith.constant dense<0.000000e+00> : vector<32xf32>
    %184 = vector.multi_reduction <add>, %183, %cst_65 [1] : vector<32x32xf32> to vector<32xf32>
    %185 = vector.shape_cast %184 : vector<32xf32> to vector<32x1xf32>
    %cst_66 = arith.constant 3.200000e+01 : f32
    %186 = vector.broadcast %cst_66 : f32 to vector<32x1xf32>
    %187 = arith.divf %185, %186 : vector<32x1xf32>
    %188 = vector.broadcast %180 : vector<32x1xf32> to vector<32x32xf32>
    %189 = arith.subf %174, %188 : vector<32x32xf32>
    %cst_67 = arith.constant 9.99999974E-6 : f32
    %190 = vector.broadcast %cst_67 : f32 to vector<32x1xf32>
    %191 = arith.addf %187, %190 : vector<32x1xf32>
    %192 = math.rsqrt %191 : vector<32x1xf32>
    %193 = vector.broadcast %192 : vector<32x1xf32> to vector<32x32xf32>
    %194 = arith.mulf %189, %193 : vector<32x32xf32>
    %195 = vector.broadcast %175 : vector<1x32xf32> to vector<32x32xf32>
    %196 = arith.mulf %194, %195 : vector<32x32xf32>
    %197 = vector.broadcast %176 : vector<1x32xf32> to vector<32x32xf32>
    %198 = arith.addf %196, %197 : vector<32x32xf32>
    %c0_68 = arith.constant 0 : index
    %c0_69 = arith.constant 0 : index
    %199 = vector.load %arg14[%c0_68, %c0_69] : memref<32x32xf32, #tpu.memory_space<vmem>>, vector<32x32xf32>
    tpu.vector_store %arg14[%c0_68, %c0_69], %198 {strides = array<i32>} : memref<32x32xf32, #tpu.memory_space<vmem>>, vector<32x32xf32>,
    return
  }
}

module attributes {stable_mosaic.version = 11 : i64} {
  func.func @_layer_head_kernel(%arg0: memref<32x32xf32, #tpu.memory_space<vmem>>, %arg1: memref<32x32xf32, #tpu.memory_space<vmem>>, %arg2: memref<32x96xf32, #tpu.memory_space<vmem>>, %arg3: memref<1x96xf32, #tpu.memory_space<vmem>>, %arg4: memref<32x32xf32, #tpu.memory_space<vmem>>, %arg5: memref<1x32xf32, #tpu.memory_space<vmem>>, %arg6: memref<1x32xf32, #tpu.memory_space<vmem>>, %arg7: memref<1x32xf32, #tpu.memory_space<vmem>>, %arg8: memref<32x64xf32, #tpu.memory_space<vmem>>, %arg9: memref<1x64xf32, #tpu.memory_space<vmem>>, %arg10: memref<64x32xf32, #tpu.memory_space<vmem>>, %arg11: memref<1x32xf32, #tpu.memory_space<vmem>>, %arg12: memref<1x32xf32, #tpu.memory_space<vmem>>, %arg13: memref<1x32xf32, #tpu.memory_space<vmem>>, %arg14: memref<2x32xf32, #tpu.memory_space<vmem>>, %arg15: memref<32x128xf32, #tpu.memory_space<vmem>>, %arg16: memref<1x128xf32, #tpu.memory_space<vmem>>, %arg17: memref<2x128xf32, #tpu.memory_space<vmem>>) attributes {dimension_semantics = [], scalar_prefetch = 0 : i64, scratch_operands = 0 : i64, tpu.core_type = #tpu.core_type<tc>} {
    %c0 = arith.constant 0 : index
    %c0_0 = arith.constant 0 : index
    %0 = vector.load %arg0[%c0, %c0_0] : memref<32x32xf32, #tpu.memory_space<vmem>>, vector<32x32xf32>
    %c0_1 = arith.constant 0 : index
    %c0_2 = arith.constant 0 : index
    %1 = vector.load %arg2[%c0_1, %c0_2] : memref<32x96xf32, #tpu.memory_space<vmem>>, vector<32x96xf32>
    %2 = arith.truncf %0 : vector<32x32xf32> to vector<32x32xbf16>
    %3 = arith.truncf %1 : vector<32x96xf32> to vector<32x96xbf16>
    %cst = arith.constant dense<0.000000e+00> : vector<32x96xf32>
    %4 = tpu.matmul %2, %3, %cst {dimension_numbers = #tpu.dot_dimension_numbers<[1], [0], [0], [1], [0, 0, 1, 1], [], []>} : vector<32x32xbf16>, vector<32x96xbf16>, vector<32x96xf32> -> vector<32x96xf32>
    %c0_3 = arith.constant 0 : index
    %c0_4 = arith.constant 0 : index
    %5 = vector.load %arg3[%c0_3, %c0_4] : memref<1x96xf32, #tpu.memory_space<vmem>>, vector<1x96xf32>
    %6 = vector.broadcast %5 : vector<1x96xf32> to vector<32x96xf32>
    %7 = arith.addf %4, %6 : vector<32x96xf32>
    %c0_5 = arith.constant 0 : index
    %c0_6 = arith.constant 0 : index
    %8 = vector.load %arg4[%c0_5, %c0_6] : memref<32x32xf32, #tpu.memory_space<vmem>>, vector<32x32xf32>
    %c0_7 = arith.constant 0 : index
    %c0_8 = arith.constant 0 : index
    %9 = vector.load %arg1[%c0_7, %c0_8] : memref<32x32xf32, #tpu.memory_space<vmem>>, vector<32x32xf32>
    %cst_9 = arith.constant 0.000000e+00 : f32
    %10 = vector.broadcast %cst_9 : f32 to vector<32x32xf32>
    %c0_10 = arith.constant 0 : index
    %c0_11 = arith.constant 0 : index
    %11 = vector.load %arg5[%c0_10, %c0_11] : memref<1x32xf32, #tpu.memory_space<vmem>>, vector<1x32xf32>
    %12 = vector.broadcast %11 : vector<1x32xf32> to vector<32x32xf32>
    %13 = arith.addf %10, %12 : vector<32x32xf32>
    %14 = vector.extract_strided_slice %7 {offsets = [0, 0], sizes = [32, 8], strides = [1, 1]} : vector<32x96xf32> to vector<32x8xf32>
    %15 = vector.extract_strided_slice %7 {offsets = [0, 32], sizes = [32, 8], strides = [1, 1]} : vector<32x96xf32> to vector<32x8xf32>
    %16 = vector.extract_strided_slice %7 {offsets = [0, 64], sizes = [32, 8], strides = [1, 1]} : vector<32x96xf32> to vector<32x8xf32>
    %17 = arith.truncf %14 : vector<32x8xf32> to vector<32x8xbf16>
    %18 = arith.truncf %15 : vector<32x8xf32> to vector<32x8xbf16>
    "tpu.trace_start"() <{level = 10 : i32, message = "qd,kd->qk"}> : () -> ()
    %cst_12 = arith.constant dense<0.000000e+00> : vector<32x32xf32>
    %19 = tpu.matmul %17, %18, %cst_12 {dimension_numbers = #tpu.dot_dimension_numbers<[1], [1], [0], [0], [0, 0, 1, 0], [], []>} : vector<32x8xbf16>, vector<32x8xbf16>, vector<32x32xf32> -> vector<32x32xf32>
    "tpu.trace_stop"() : () -> ()
    %cst_13 = arith.constant 0.353553385 : f32
    %20 = vector.broadcast %cst_13 : f32 to vector<32x32xf32>
    %21 = arith.mulf %19, %20 : vector<32x32xf32>
    %22 = arith.addf %21, %9 : vector<32x32xf32>
    %cst_14 = arith.constant dense<0xFF800000> : vector<32xf32>
    %23 = vector.multi_reduction <maximumf>, %22, %cst_14 [1] : vector<32x32xf32> to vector<32xf32>
    %24 = vector.shape_cast %23 : vector<32xf32> to vector<32x1xf32>
    %25 = vector.broadcast %24 : vector<32x1xf32> to vector<32x32xf32>
    %26 = arith.subf %22, %25 : vector<32x32xf32>
    %27 = math.exp %26 : vector<32x32xf32>
    %cst_15 = arith.constant dense<0.000000e+00> : vector<32xf32>
    %28 = vector.multi_reduction <add>, %27, %cst_15 [1] : vector<32x32xf32> to vector<32xf32>
    %29 = vector.shape_cast %28 : vector<32xf32> to vector<32x1xf32>
    %30 = tpu.reciprocal %29 {approx = true} : vector<32x1xf32> -> vector<32x1xf32>
    %31 = vector.broadcast %30 : vector<32x1xf32> to vector<32x32xf32>
    %32 = arith.mulf %27, %31 : vector<32x32xf32>
    %33 = arith.truncf %32 : vector<32x32xf32> to vector<32x32xbf16>
    %34 = arith.truncf %16 : vector<32x8xf32> to vector<32x8xbf16>
    %cst_16 = arith.constant dense<0.000000e+00> : vector<32x8xf32>
    %35 = tpu.matmul %33, %34, %cst_16 {dimension_numbers = #tpu.dot_dimension_numbers<[1], [0], [0], [1], [0, 0, 1, 1], [], []>} : vector<32x32xbf16>, vector<32x8xbf16>, vector<32x8xf32> -> vector<32x8xf32>
    %36 = vector.extract_strided_slice %8 {offsets = [0, 0], sizes = [8, 32], strides = [1, 1]} : vector<32x32xf32> to vector<8x32xf32>
    %37 = arith.truncf %35 : vector<32x8xf32> to vector<32x8xbf16>
    %38 = arith.truncf %36 : vector<8x32xf32> to vector<8x32xbf16>
    %cst_17 = arith.constant dense<0.000000e+00> : vector<32x32xf32>
    %39 = tpu.matmul %37, %38, %cst_17 {dimension_numbers = #tpu.dot_dimension_numbers<[1], [0], [0], [1], [0, 0, 1, 1], [], []>} : vector<32x8xbf16>, vector<8x32xbf16>, vector<32x32xf32> -> vector<32x32xf32>
    %40 = arith.addf %13, %39 : vector<32x32xf32>
    %41 = vector.extract_strided_slice %7 {offsets = [0, 8], sizes = [32, 8], strides = [1, 1]} : vector<32x96xf32> to vector<32x8xf32>
    %42 = vector.extract_strided_slice %7 {offsets = [0, 40], sizes = [32, 8], strides = [1, 1]} : vector<32x96xf32> to vector<32x8xf32>
    %43 = vector.extract_strided_slice %7 {offsets = [0, 72], sizes = [32, 8], strides = [1, 1]} : vector<32x96xf32> to vector<32x8xf32>
    %44 = arith.truncf %41 : vector<32x8xf32> to vector<32x8xbf16>
    %45 = arith.truncf %42 : vector<32x8xf32> to vector<32x8xbf16>
    "tpu.trace_start"() <{level = 10 : i32, message = "qd,kd->qk"}> : () -> ()
    %cst_18 = arith.constant dense<0.000000e+00> : vector<32x32xf32>
    %46 = tpu.matmul %44, %45, %cst_18 {dimension_numbers = #tpu.dot_dimension_numbers<[1], [1], [0], [0], [0, 0, 1, 0], [], []>} : vector<32x8xbf16>, vector<32x8xbf16>, vector<32x32xf32> -> vector<32x32xf32>
    "tpu.trace_stop"() : () -> ()
    %cst_19 = arith.constant 0.353553385 : f32
    %47 = vector.broadcast %cst_19 : f32 to vector<32x32xf32>
    %48 = arith.mulf %46, %47 : vector<32x32xf32>
    %49 = arith.addf %48, %9 : vector<32x32xf32>
    %cst_20 = arith.constant dense<0xFF800000> : vector<32xf32>
    %50 = vector.multi_reduction <maximumf>, %49, %cst_20 [1] : vector<32x32xf32> to vector<32xf32>
    %51 = vector.shape_cast %50 : vector<32xf32> to vector<32x1xf32>
    %52 = vector.broadcast %51 : vector<32x1xf32> to vector<32x32xf32>
    %53 = arith.subf %49, %52 : vector<32x32xf32>
    %54 = math.exp %53 : vector<32x32xf32>
    %cst_21 = arith.constant dense<0.000000e+00> : vector<32xf32>
    %55 = vector.multi_reduction <add>, %54, %cst_21 [1] : vector<32x32xf32> to vector<32xf32>
    %56 = vector.shape_cast %55 : vector<32xf32> to vector<32x1xf32>
    %57 = tpu.reciprocal %56 {approx = true} : vector<32x1xf32> -> vector<32x1xf32>
    %58 = vector.broadcast %57 : vector<32x1xf32> to vector<32x32xf32>
    %59 = arith.mulf %54, %58 : vector<32x32xf32>
    %60 = arith.truncf %59 : vector<32x32xf32> to vector<32x32xbf16>
    %61 = arith.truncf %43 : vector<32x8xf32> to vector<32x8xbf16>
    %cst_22 = arith.constant dense<0.000000e+00> : vector<32x8xf32>
    %62 = tpu.matmul %60, %61, %cst_22 {dimension_numbers = #tpu.dot_dimension_numbers<[1], [0], [0], [1], [0, 0, 1, 1], [], []>} : vector<32x32xbf16>, vector<32x8xbf16>, vector<32x8xf32> -> vector<32x8xf32>
    %63 = vector.extract_strided_slice %8 {offsets = [8, 0], sizes = [8, 32], strides = [1, 1]} : vector<32x32xf32> to vector<8x32xf32>
    %64 = arith.truncf %62 : vector<32x8xf32> to vector<32x8xbf16>
    %65 = arith.truncf %63 : vector<8x32xf32> to vector<8x32xbf16>
    %cst_23 = arith.constant dense<0.000000e+00> : vector<32x32xf32>
    %66 = tpu.matmul %64, %65, %cst_23 {dimension_numbers = #tpu.dot_dimension_numbers<[1], [0], [0], [1], [0, 0, 1, 1], [], []>} : vector<32x8xbf16>, vector<8x32xbf16>, vector<32x32xf32> -> vector<32x32xf32>
    %67 = arith.addf %40, %66 : vector<32x32xf32>
    %68 = vector.extract_strided_slice %7 {offsets = [0, 16], sizes = [32, 8], strides = [1, 1]} : vector<32x96xf32> to vector<32x8xf32>
    %69 = vector.extract_strided_slice %7 {offsets = [0, 48], sizes = [32, 8], strides = [1, 1]} : vector<32x96xf32> to vector<32x8xf32>
    %70 = vector.extract_strided_slice %7 {offsets = [0, 80], sizes = [32, 8], strides = [1, 1]} : vector<32x96xf32> to vector<32x8xf32>
    %71 = arith.truncf %68 : vector<32x8xf32> to vector<32x8xbf16>
    %72 = arith.truncf %69 : vector<32x8xf32> to vector<32x8xbf16>
    "tpu.trace_start"() <{level = 10 : i32, message = "qd,kd->qk"}> : () -> ()
    %cst_24 = arith.constant dense<0.000000e+00> : vector<32x32xf32>
    %73 = tpu.matmul %71, %72, %cst_24 {dimension_numbers = #tpu.dot_dimension_numbers<[1], [1], [0], [0], [0, 0, 1, 0], [], []>} : vector<32x8xbf16>, vector<32x8xbf16>, vector<32x32xf32> -> vector<32x32xf32>
    "tpu.trace_stop"() : () -> ()
    %cst_25 = arith.constant 0.353553385 : f32
    %74 = vector.broadcast %cst_25 : f32 to vector<32x32xf32>
    %75 = arith.mulf %73, %74 : vector<32x32xf32>
    %76 = arith.addf %75, %9 : vector<32x32xf32>
    %cst_26 = arith.constant dense<0xFF800000> : vector<32xf32>
    %77 = vector.multi_reduction <maximumf>, %76, %cst_26 [1] : vector<32x32xf32> to vector<32xf32>
    %78 = vector.shape_cast %77 : vector<32xf32> to vector<32x1xf32>
    %79 = vector.broadcast %78 : vector<32x1xf32> to vector<32x32xf32>
    %80 = arith.subf %76, %79 : vector<32x32xf32>
    %81 = math.exp %80 : vector<32x32xf32>
    %cst_27 = arith.constant dense<0.000000e+00> : vector<32xf32>
    %82 = vector.multi_reduction <add>, %81, %cst_27 [1] : vector<32x32xf32> to vector<32xf32>
    %83 = vector.shape_cast %82 : vector<32xf32> to vector<32x1xf32>
    %84 = tpu.reciprocal %83 {approx = true} : vector<32x1xf32> -> vector<32x1xf32>
    %85 = vector.broadcast %84 : vector<32x1xf32> to vector<32x32xf32>
    %86 = arith.mulf %81, %85 : vector<32x32xf32>
    %87 = arith.truncf %86 : vector<32x32xf32> to vector<32x32xbf16>
    %88 = arith.truncf %70 : vector<32x8xf32> to vector<32x8xbf16>
    %cst_28 = arith.constant dense<0.000000e+00> : vector<32x8xf32>
    %89 = tpu.matmul %87, %88, %cst_28 {dimension_numbers = #tpu.dot_dimension_numbers<[1], [0], [0], [1], [0, 0, 1, 1], [], []>} : vector<32x32xbf16>, vector<32x8xbf16>, vector<32x8xf32> -> vector<32x8xf32>
    %90 = vector.extract_strided_slice %8 {offsets = [16, 0], sizes = [8, 32], strides = [1, 1]} : vector<32x32xf32> to vector<8x32xf32>
    %91 = arith.truncf %89 : vector<32x8xf32> to vector<32x8xbf16>
    %92 = arith.truncf %90 : vector<8x32xf32> to vector<8x32xbf16>
    %cst_29 = arith.constant dense<0.000000e+00> : vector<32x32xf32>
    %93 = tpu.matmul %91, %92, %cst_29 {dimension_numbers = #tpu.dot_dimension_numbers<[1], [0], [0], [1], [0, 0, 1, 1], [], []>} : vector<32x8xbf16>, vector<8x32xbf16>, vector<32x32xf32> -> vector<32x32xf32>
    %94 = arith.addf %67, %93 : vector<32x32xf32>
    %95 = vector.extract_strided_slice %7 {offsets = [0, 24], sizes = [32, 8], strides = [1, 1]} : vector<32x96xf32> to vector<32x8xf32>
    %96 = vector.extract_strided_slice %7 {offsets = [0, 56], sizes = [32, 8], strides = [1, 1]} : vector<32x96xf32> to vector<32x8xf32>
    %97 = vector.extract_strided_slice %7 {offsets = [0, 88], sizes = [32, 8], strides = [1, 1]} : vector<32x96xf32> to vector<32x8xf32>
    %98 = arith.truncf %95 : vector<32x8xf32> to vector<32x8xbf16>
    %99 = arith.truncf %96 : vector<32x8xf32> to vector<32x8xbf16>
    "tpu.trace_start"() <{level = 10 : i32, message = "qd,kd->qk"}> : () -> ()
    %cst_30 = arith.constant dense<0.000000e+00> : vector<32x32xf32>
    %100 = tpu.matmul %98, %99, %cst_30 {dimension_numbers = #tpu.dot_dimension_numbers<[1], [1], [0], [0], [0, 0, 1, 0], [], []>} : vector<32x8xbf16>, vector<32x8xbf16>, vector<32x32xf32> -> vector<32x32xf32>
    "tpu.trace_stop"() : () -> ()
    %cst_31 = arith.constant 0.353553385 : f32
    %101 = vector.broadcast %cst_31 : f32 to vector<32x32xf32>
    %102 = arith.mulf %100, %101 : vector<32x32xf32>
    %103 = arith.addf %102, %9 : vector<32x32xf32>
    %cst_32 = arith.constant dense<0xFF800000> : vector<32xf32>
    %104 = vector.multi_reduction <maximumf>, %103, %cst_32 [1] : vector<32x32xf32> to vector<32xf32>
    %105 = vector.shape_cast %104 : vector<32xf32> to vector<32x1xf32>
    %106 = vector.broadcast %105 : vector<32x1xf32> to vector<32x32xf32>
    %107 = arith.subf %103, %106 : vector<32x32xf32>
    %108 = math.exp %107 : vector<32x32xf32>
    %cst_33 = arith.constant dense<0.000000e+00> : vector<32xf32>
    %109 = vector.multi_reduction <add>, %108, %cst_33 [1] : vector<32x32xf32> to vector<32xf32>
    %110 = vector.shape_cast %109 : vector<32xf32> to vector<32x1xf32>
    %111 = tpu.reciprocal %110 {approx = true} : vector<32x1xf32> -> vector<32x1xf32>
    %112 = vector.broadcast %111 : vector<32x1xf32> to vector<32x32xf32>
    %113 = arith.mulf %108, %112 : vector<32x32xf32>
    %114 = arith.truncf %113 : vector<32x32xf32> to vector<32x32xbf16>
    %115 = arith.truncf %97 : vector<32x8xf32> to vector<32x8xbf16>
    %cst_34 = arith.constant dense<0.000000e+00> : vector<32x8xf32>
    %116 = tpu.matmul %114, %115, %cst_34 {dimension_numbers = #tpu.dot_dimension_numbers<[1], [0], [0], [1], [0, 0, 1, 1], [], []>} : vector<32x32xbf16>, vector<32x8xbf16>, vector<32x8xf32> -> vector<32x8xf32>
    %117 = vector.extract_strided_slice %8 {offsets = [24, 0], sizes = [8, 32], strides = [1, 1]} : vector<32x32xf32> to vector<8x32xf32>
    %118 = arith.truncf %116 : vector<32x8xf32> to vector<32x8xbf16>
    %119 = arith.truncf %117 : vector<8x32xf32> to vector<8x32xbf16>
    %cst_35 = arith.constant dense<0.000000e+00> : vector<32x32xf32>
    %120 = tpu.matmul %118, %119, %cst_35 {dimension_numbers = #tpu.dot_dimension_numbers<[1], [0], [0], [1], [0, 0, 1, 1], [], []>} : vector<32x8xbf16>, vector<8x32xbf16>, vector<32x32xf32> -> vector<32x32xf32>
    %121 = arith.addf %94, %120 : vector<32x32xf32>
    %122 = arith.addf %0, %121 : vector<32x32xf32>
    %c0_36 = arith.constant 0 : index
    %c0_37 = arith.constant 0 : index
    %123 = vector.load %arg6[%c0_36, %c0_37] : memref<1x32xf32, #tpu.memory_space<vmem>>, vector<1x32xf32>
    %c0_38 = arith.constant 0 : index
    %c0_39 = arith.constant 0 : index
    %124 = vector.load %arg7[%c0_38, %c0_39] : memref<1x32xf32, #tpu.memory_space<vmem>>, vector<1x32xf32>
    %cst_40 = arith.constant dense<0.000000e+00> : vector<32xf32>
    %125 = vector.multi_reduction <add>, %122, %cst_40 [1] : vector<32x32xf32> to vector<32xf32>
    %126 = vector.shape_cast %125 : vector<32xf32> to vector<32x1xf32>
    %cst_41 = arith.constant 3.200000e+01 : f32
    %127 = vector.broadcast %cst_41 : f32 to vector<32x1xf32>
    %128 = arith.divf %126, %127 : vector<32x1xf32>
    %129 = vector.broadcast %128 : vector<32x1xf32> to vector<32x32xf32>
    %130 = arith.subf %122, %129 : vector<32x32xf32>
    %131 = arith.mulf %130, %130 : vector<32x32xf32>
    %cst_42 = arith.constant dense<0.000000e+00> : vector<32xf32>
    %132 = vector.multi_reduction <add>, %131, %cst_42 [1] : vector<32x32xf32> to vector<32xf32>
    %133 = vector.shape_cast %132 : vector<32xf32> to vector<32x1xf32>
    %cst_43 = arith.constant 3.200000e+01 : f32
    %134 = vector.broadcast %cst_43 : f32 to vector<32x1xf32>
    %135 = arith.divf %133, %134 : vector<32x1xf32>
    %136 = vector.broadcast %128 : vector<32x1xf32> to vector<32x32xf32>
    %137 = arith.subf %122, %136 : vector<32x32xf32>
    %cst_44 = arith.constant 9.99999974E-6 : f32
    %138 = vector.broadcast %cst_44 : f32 to vector<32x1xf32>
    %139 = arith.addf %135, %138 : vector<32x1xf32>
    %140 = math.rsqrt %139 : vector<32x1xf32>
    %141 = vector.broadcast %140 : vector<32x1xf32> to vector<32x32xf32>
    %142 = arith.mulf %137, %141 : vector<32x32xf32>
    %143 = vector.broadcast %123 : vector<1x32xf32> to vector<32x32xf32>
    %144 = arith.mulf %142, %143 : vector<32x32xf32>
    %145 = vector.broadcast %124 : vector<1x32xf32> to vector<32x32xf32>
    %146 = arith.addf %144, %145 : vector<32x32xf32>
    %c0_45 = arith.constant 0 : index
    %c0_46 = arith.constant 0 : index
    %147 = vector.load %arg8[%c0_45, %c0_46] : memref<32x64xf32, #tpu.memory_space<vmem>>, vector<32x64xf32>
    %148 = arith.truncf %146 : vector<32x32xf32> to vector<32x32xbf16>
    %149 = arith.truncf %147 : vector<32x64xf32> to vector<32x64xbf16>
    %cst_47 = arith.constant dense<0.000000e+00> : vector<32x64xf32>
    %150 = tpu.matmul %148, %149, %cst_47 {dimension_numbers = #tpu.dot_dimension_numbers<[1], [0], [0], [1], [0, 0, 1, 1], [], []>} : vector<32x32xbf16>, vector<32x64xbf16>, vector<32x64xf32> -> vector<32x64xf32>
    %c0_48 = arith.constant 0 : index
    %c0_49 = arith.constant 0 : index
    %151 = vector.load %arg9[%c0_48, %c0_49] : memref<1x64xf32, #tpu.memory_space<vmem>>, vector<1x64xf32>
    %152 = vector.broadcast %151 : vector<1x64xf32> to vector<32x64xf32>
    %153 = arith.addf %150, %152 : vector<32x64xf32>
    %154 = arith.mulf %153, %153 : vector<32x64xf32>
    %155 = arith.mulf %153, %154 : vector<32x64xf32>
    %cst_50 = arith.constant 4.471500e-02 : f32
    %156 = vector.broadcast %cst_50 : f32 to vector<32x64xf32>
    %157 = arith.mulf %156, %155 : vector<32x64xf32>
    %158 = arith.addf %153, %157 : vector<32x64xf32>
    %cst_51 = arith.constant 0.797884583 : f32
    %159 = vector.broadcast %cst_51 : f32 to vector<32x64xf32>
    %160 = arith.mulf %159, %158 : vector<32x64xf32>
    %161 = math.tanh %160 : vector<32x64xf32>
    %cst_52 = arith.constant 1.000000e+00 : f32
    %162 = vector.broadcast %cst_52 : f32 to vector<32x64xf32>
    %163 = arith.addf %162, %161 : vector<32x64xf32>
    %cst_53 = arith.constant 5.000000e-01 : f32
    %164 = vector.broadcast %cst_53 : f32 to vector<32x64xf32>
    %165 = arith.mulf %164, %163 : vector<32x64xf32>
    %166 = arith.mulf %153, %165 : vector<32x64xf32>
    %c0_54 = arith.constant 0 : index
    %c0_55 = arith.constant 0 : index
    %167 = vector.load %arg10[%c0_54, %c0_55] : memref<64x32xf32, #tpu.memory_space<vmem>>, vector<64x32xf32>
    %168 = arith.truncf %166 : vector<32x64xf32> to vector<32x64xbf16>
    %169 = arith.truncf %167 : vector<64x32xf32> to vector<64x32xbf16>
    %cst_56 = arith.constant dense<0.000000e+00> : vector<32x32xf32>
    %170 = tpu.matmul %168, %169, %cst_56 {dimension_numbers = #tpu.dot_dimension_numbers<[1], [0], [0], [1], [0, 0, 1, 1], [], []>} : vector<32x64xbf16>, vector<64x32xbf16>, vector<32x32xf32> -> vector<32x32xf32>
    %c0_57 = arith.constant 0 : index
    %c0_58 = arith.constant 0 : index
    %171 = vector.load %arg11[%c0_57, %c0_58] : memref<1x32xf32, #tpu.memory_space<vmem>>, vector<1x32xf32>
    %172 = vector.broadcast %171 : vector<1x32xf32> to vector<32x32xf32>
    %173 = arith.addf %170, %172 : vector<32x32xf32>
    %174 = arith.addf %146, %173 : vector<32x32xf32>
    %c0_59 = arith.constant 0 : index
    %c0_60 = arith.constant 0 : index
    %175 = vector.load %arg12[%c0_59, %c0_60] : memref<1x32xf32, #tpu.memory_space<vmem>>, vector<1x32xf32>
    %c0_61 = arith.constant 0 : index
    %c0_62 = arith.constant 0 : index
    %176 = vector.load %arg13[%c0_61, %c0_62] : memref<1x32xf32, #tpu.memory_space<vmem>>, vector<1x32xf32>
    %cst_63 = arith.constant dense<0.000000e+00> : vector<32xf32>
    %177 = vector.multi_reduction <add>, %174, %cst_63 [1] : vector<32x32xf32> to vector<32xf32>
    %178 = vector.shape_cast %177 : vector<32xf32> to vector<32x1xf32>
    %cst_64 = arith.constant 3.200000e+01 : f32
    %179 = vector.broadcast %cst_64 : f32 to vector<32x1xf32>
    %180 = arith.divf %178, %179 : vector<32x1xf32>
    %181 = vector.broadcast %180 : vector<32x1xf32> to vector<32x32xf32>
    %182 = arith.subf %174, %181 : vector<32x32xf32>
    %183 = arith.mulf %182, %182 : vector<32x32xf32>
    %cst_65 = arith.constant dense<0.000000e+00> : vector<32xf32>
    %184 = vector.multi_reduction <add>, %183, %cst_65 [1] : vector<32x32xf32> to vector<32xf32>
    %185 = vector.shape_cast %184 : vector<32xf32> to vector<32x1xf32>
    %cst_66 = arith.constant 3.200000e+01 : f32
    %186 = vector.broadcast %cst_66 : f32 to vector<32x1xf32>
    %187 = arith.divf %185, %186 : vector<32x1xf32>
    %188 = vector.broadcast %180 : vector<32x1xf32> to vector<32x32xf32>
    %189 = arith.subf %174, %188 : vector<32x32xf32>
    %cst_67 = arith.constant 9.99999974E-6 : f32
    %190 = vector.broadcast %cst_67 : f32 to vector<32x1xf32>
    %191 = arith.addf %187, %190 : vector<32x1xf32>
    %192 = math.rsqrt %191 : vector<32x1xf32>
    %193 = vector.broadcast %192 : vector<32x1xf32> to vector<32x32xf32>
    %194 = arith.mulf %189, %193 : vector<32x32xf32>
    %195 = vector.broadcast %175 : vector<1x32xf32> to vector<32x32xf32>
    %196 = arith.mulf %194, %195 : vector<32x32xf32>
    %197 = vector.broadcast %176 : vector<1x32xf32> to vector<32x32xf32>
    %198 = arith.addf %196, %197 : vector<32x32xf32>
    %cst_68 = arith.constant dense<0.000000e+00> : vector<32xf32>
    %199 = vector.multi_reduction <add>, %198, %cst_68 [1] : vector<32x32xf32> to vector<32xf32>
    %200 = vector.shape_cast %199 : vector<32xf32> to vector<32x1xf32>
    %cst_69 = arith.constant 3.200000e+01 : f32
    %201 = vector.broadcast %cst_69 : f32 to vector<32x1xf32>
    %202 = arith.divf %200, %201 : vector<32x1xf32>
    %c0_70 = arith.constant 0 : index
    %c0_71 = arith.constant 0 : index
    %203 = vector.load %arg15[%c0_70, %c0_71] : memref<32x128xf32, #tpu.memory_space<vmem>>, vector<32x128xf32>
    %204 = vector.broadcast %202 : vector<32x1xf32> to vector<32x128xf32>
    %205 = arith.mulf %204, %203 : vector<32x128xf32>
    %c0_72 = arith.constant 0 : index
    %c0_73 = arith.constant 0 : index
    %206 = vector.load %arg14[%c0_72, %c0_73] : memref<2x32xf32, #tpu.memory_space<vmem>>, vector<2x32xf32>
    %cst_74 = arith.constant dense<0.000000e+00> : vector<2x128xf32>
    %207 = tpu.matmul %206, %205, %cst_74 {dimension_numbers = #tpu.dot_dimension_numbers<[1], [0], [0], [1], [0, 0, 1, 1], [], []>} : vector<2x32xf32>, vector<32x128xf32>, vector<2x128xf32> -> vector<2x128xf32>
    %c0_75 = arith.constant 0 : index
    %c0_76 = arith.constant 0 : index
    %208 = vector.load %arg16[%c0_75, %c0_76] : memref<1x128xf32, #tpu.memory_space<vmem>>, vector<1x128xf32>
    %209 = vector.broadcast %208 : vector<1x128xf32> to vector<2x128xf32>
    %210 = arith.addf %207, %209 : vector<2x128xf32>
    %cst_77 = arith.constant 0.000000e+00 : f32
    %211 = vector.broadcast %cst_77 : f32 to vector<2x128xf32>
    %212 = arith.maximumf %210, %211 : vector<2x128xf32>
    %c0_78 = arith.constant 0 : index
    %c0_79 = arith.constant 0 : index
    %213 = vector.load %arg17[%c0_78, %c0_79] : memref<2x128xf32, #tpu.memory_space<vmem>>, vector<2x128xf32>
    tpu.vector_store %arg17[%c0_78, %c0_79], %212 {strides = array<i32>} : memref<2x128xf32, #tpu.memory_space<vmem>>, vector<2x128xf32>,
    return
  }
}

</mosaic_0001>

<bundles_post_ra>
// kernel: forward.5
= control target key start
LH: loop header
LB: loop body
LE: loop exit
PB: predicated region body
PF: predicated region fallthrough
CT: control target
= control target key end

     0   :  { %vm39_vm0 = vcmask 1044480   ;;  %vm29_vm1 = vcmask 80896   ;;  %v422_v25 = vmov 33.0   ;;  %vm66_vm2 = vcmask 130048   ;;  %s682_s1 = inlined_call_operand.vmem [shape: f32[10,16], index: 1, kind: input, shape index: {}]   ;;  %s683_s0 = inlined_call_operand.vmem [shape: f32[2,33,10], index: 0, kind: input, shape index: {}]   ;;  %s684_s2 = inlined_call_operand.vmem [shape: f32[1,16], index: 2, kind: input, shape index: {}]   ;;  %s685_s3 = inlined_call_operand.vmem [shape: f32[1,16], index: 3, kind: input, shape index: {}]   ;;  %s686_s4 = inlined_call_operand.vmem [shape: f32[2,33,16], index: 4, kind: output, shape index: {}]  }
   0x1   :  { %v18_v0 = vld [vmem:[%s682_s1] sm:$0xff]  ;;  %v19_v1 = vld [vmem:[%s682_s1 + $0x8] sm:$0x3]  ;;  %v22_v5 = vld [vmem:[%s683_s0 + $0x10] sm:$0xff]  ;;  %396 = vrcp.f32 %v422_v25  ;;  %vm74_vm3 = vcmask 122880  }
   0x2   :  { %v20_v2 = vld [vmem:[%s683_s0] sm:$0xff]  ;;  %v28_v3 = vpack.c.bf16 %v19_v1, %v18_v0  ;;  %v21_v4 = vld [vmem:[%s683_s0 + $0x8] sm:$0xff]  ;;  %v23_v6 = vld [vmem:[%s683_s0 + $0x18] sm:$0xff] }
   0x3   :  { %v376_v7 = vld [vmem:[%s683_s0 + $0x28] sm:$0xff]  ;;  %v377_v8 = vld [vmem:[%s683_s0 + $0x30] sm:$0xff]  ;;  %v378_v9 = vld [vmem:[%s683_s0 + $0x38] sm:$0xff]  ;;  %v25_v11 = vpack.c.bf16 %v21_v4, %v20_v2  ;;  %v26_v12 = vpack.c.bf16 %v23_v6, %v22_v5 }
   0x4   :  { %v41_v10 = vsel %vm39_vm0, %v28_v3, 0  ;;  %v379_v13 = vld [vmem:[%s683_s0 + $0x40] sm:$0xff]  ;;  %v207_v14 = vpack.c.bf16 %v377_v8, %v376_v7  ;;  %v380_v17 = vld [vmem:[%s683_s0 + $0x48] sm:$0x1] }
   0x5   :  { %50 = vmatpush.bf16.msra.mxu0 %v41_v10  ;;  %389 = vmatpush.bf16.msra.mxu2 %v41_v10  ;;  %v208_v15 = vpack.c.bf16 %v379_v13, %v378_v9  ;;  %v24_v16 = vld [vmem:[%s683_s0 + $0x20] sm:$0x1]  ;;  %v209_v19 = vpack.c.bf16 %v380_v17, %v380_v17 }
   0x6   :  { %226 = vmatpush.bf16.msra.mxu1 %v41_v10  ;;  %390 = vmatpush.bf16.msra.mxu3 %v41_v10  ;;  %v27_v18 = vpack.c.bf16 %v24_v16, %v24_v16 }
   0x7   :  { %v397_v33 = vpop.eup %396 }
   0x8   :  { %373 = vmatmul.msk.bf16.vlgmr.msra.gmra.mxu0 %vm29_vm1, %v25_v11  ;;  %374 = vmatmul.msk.bf16.vlgmr.msra.gmra.mxu2 %vm29_vm1, %v26_v12  ;;  %v84_v38 = vmul.f32 33.0, %v397_v33  ;;  %vm88_vm4 = vweird.f32 %v397_v33 }
   0x9   :  { %381 = vmatmul.msk.bf16.vlgmr.msra.gmra.mxu1 %vm29_vm1, %v207_v14  ;;  %382 = vmatmul.msk.bf16.vlgmr.msra.gmra.mxu3 %vm29_vm1, %v208_v15 }
   0xa   :  { %v85_v47 = vsub.f32 1.0, %v84_v38 }
   0xc   :  { %v86_v53 = vmul.f32 %v397_v33, %v85_v47 }
   0xe   :  { %v87_v59 = vadd.f32 %v397_v33, %v86_v53 }
  0x10   :  { %v89_v1 = vsel %vm88_vm4, %v397_v33, %v87_v59 }
  0x18   :  { %375 = vmatmul.msk.bf16.gmra.mxu2 %vm29_vm1, %v27_v18 }
  0x19   :  { %383 = vmatmul.msk.bf16.gmra.mxu3 %vm29_vm1, %v209_v19 }
  0x85   :  { %v52_v20 = vpop.f32.mrf.mxu0 }
  0x86   :  { %v228_v21 = vpop.f32.mrf.mxu1  ;;  %v67_v27 = vsel %vm66_vm2, %v52_v20, 0.0 }
  0x87   :  { %v242_v29 = vsel %vm66_vm2, %v228_v21, 0.0 }
  0x8b   :  { %v57_v22 = vpop.f32.mrf.mxu2 }
  0x8c   :  { %v233_v23 = vpop.f32.mrf.mxu3  ;;  %v70_v36 = vsel %vm66_vm2, %v57_v22, 0.0 }
  0x8d   :  { %v54_v24 = vpop.f32.mrf.mxu0  ;;  %v245_v39 = vsel %vm66_vm2, %v233_v23, 0.0 }
  0x8e   :  { %v230_v26 = vpop.f32.mrf.mxu1  ;;  %v68_v28 = vsel %vm66_vm2, %v54_v24, 0.0 }
  0x8f   :  { %v243_v30 = vsel %vm66_vm2, %v230_v26, 0.0  ;;  %v69_v34 = vadd.f32 %v68_v28, %v67_v27 }
  0x90   :  { %v244_v35 = vadd.f32 %v243_v30, %v242_v29 }
  0x91   :  { %v71_v40 = vadd.f32 %v70_v36, %v69_v34 }
  0x92   :  { %v246_v42 = vadd.f32 %v245_v39, %v244_v35 }
  0x93   :  { %v59_v31 = vpop.f32.mrf.mxu2 }
  0x94   :  { %v235_v32 = vpop.f32.mrf.mxu3  ;;  %v72_v37 = vsel %vm66_vm2, %v59_v31, 0.0 }
  0x95   :  { %v247_v41 = vsel %vm66_vm2, %v235_v32, 0.0  ;;  %v73_v43 = vadd.f32 %v72_v37, %v71_v40 }
  0x96   :  { %v248_v45 = vadd.f32 %v247_v41, %v246_v42 }
  0x9b   :  { %v62_v44 = vpop.f32.mrf.mxu2 }
  0x9c   :  { %v75_v46 = vsel %vm74_vm3, %v62_v44, 0.0  ;;  %v238_v48 = vpop.f32.mrf.mxu3 }
  0x9d   :  { %v76_v49 = vadd.f32 %v75_v46, %v73_v43  ;;  %v249_v50 = vsel %vm74_vm3, %v238_v48, 0.0 }
  0x9e   :  { %v250_v51 = vadd.f32 %v249_v50, %v248_v45 }
  0x9f   :  { %v77_v52 = vrot.slane %v76_v49, 4 }
  0xa0   :  { %v251_v54 = vrot.slane %v250_v51, 4 }
  0xa1   :  { %v78_v55 = vadd.f32 %v77_v52, %v76_v49 }
  0xa2   :  { %v252_v56 = vadd.f32 %v251_v54, %v250_v51 }
  0xa3   :  { %v79_v57 = vrot.slane %v78_v55, 2  ;;  %v64_v58 = vpop.f32.mrf.mxu2 }
  0xa4   :  { %v253_v60 = vrot.slane %v252_v56, 2  ;;  %v240_v61 = vpop.f32.mrf.mxu3 }
  0xa5   :  { %v80_v62 = vadd.f32 %v79_v57, %v78_v55 }
  0xa6   :  { %v254_v63 = vadd.f32 %v253_v60, %v252_v56 }
  0xa7   :  { %v81_v0 = vrot.slane %v80_v62, 1 }
  0xa8   :  { %v255_v2 = vrot.slane %v254_v63, 1 }
  0xa9   :  { %v82_v3 = vadd.f32 %v81_v0, %v80_v62 }
  0xaa   :  { %v256_v4 = vadd.f32 %v255_v2, %v254_v63 }
  0xab   :  { %v90_v5 = vmul.f32 %v89_v1, %v82_v3 }
  0xac   :  { %v257_v6 = vmul.f32 %v256_v4, %v89_v1 }
  0xad   :  { %v500_v7 = vsub.f32 %v52_v20, %v90_v5  ;;  %v502_v8 = vsub.f32 %v54_v24, %v90_v5  ;;  %v504_v9 = vsub.f32 %v57_v22, %v90_v5  ;;  %v506_v10 = vsub.f32 %v59_v31, %v90_v5 }
  0xae   :  { %v508_v11 = vsub.f32 %v228_v21, %v257_v6  ;;  %v510_v12 = vsub.f32 %v230_v26, %v257_v6  ;;  %v512_v13 = vsub.f32 %v233_v23, %v257_v6  ;;  %v514_v14 = vsub.f32 %v62_v44, %v90_v5 }
  0xaf   :  { %v96_v15 = vmul.f32 %v500_v7, %v500_v7  ;;  %v97_v16 = vmul.f32 %v502_v8, %v502_v8  ;;  %v98_v17 = vmul.f32 %v504_v9, %v504_v9  ;;  %v522_v18 = vsub.f32 %v235_v32, %v257_v6 }
  0xb0   :  { %v263_v19 = vmul.f32 %v508_v11, %v508_v11  ;;  %v99_v20 = vmul.f32 %v506_v10, %v506_v10  ;;  %v530_v24 = vsub.f32 %v238_v48, %v257_v6  ;;  %v264_v25 = vmul.f32 %v510_v12, %v510_v12 }
  0xb1   :  { %v101_v21 = vsel %vm66_vm2, %v96_v15, 0.0  ;;  %v102_v22 = vsel %vm66_vm2, %v97_v16, 0.0  ;;  %v265_v26 = vmul.f32 %v512_v13, %v512_v13  ;;  %v100_v27 = vmul.f32 %v514_v14, %v514_v14 }
  0xb2   :  { %v103_v23 = vadd.f32 %v102_v22, %v101_v21  ;;  %v104_v28 = vsel %vm66_vm2, %v98_v17, 0.0  ;;  %v268_v29 = vsel %vm66_vm2, %v263_v19, 0.0  ;;  %v266_v31 = vmul.f32 %v522_v18, %v522_v18 }
  0xb3   :  { %v269_v32 = vsel %vm66_vm2, %v264_v25, 0.0  ;;  %v106_v33 = vsel %vm66_vm2, %v99_v20, 0.0  ;;  %v267_v36 = vmul.f32 %v530_v24, %v530_v24  ;;  %v271_v37 = vsel %vm66_vm2, %v265_v26, 0.0 }
  0xb4   :  { %v105_v30 = vadd.f32 %v104_v28, %v103_v23  ;;  %v270_v34 = vadd.f32 %v269_v32, %v268_v29  ;;  %v108_v38 = vsel %vm74_vm3, %v100_v27, 0.0  ;;  %v273_v41 = vsel %vm66_vm2, %v266_v31, 0.0  ;;  %v393_v23 = vld [vmem:[%s685_s3] ss:$0 sm:$0xff] }
  0xb5   :  { %v275_v44 = vsel %vm74_vm3, %v267_v36, 0.0 }
  0xb6   :  { %v107_v35 = vadd.f32 %v106_v33, %v105_v30  ;;  %v272_v39 = vadd.f32 %v271_v37, %v270_v34 }
  0xb8   :  { %v109_v40 = vadd.f32 %v108_v38, %v107_v35  ;;  %v274_v42 = vadd.f32 %v273_v41, %v272_v39 }
  0xba   :  { %v110_v43 = vrot.slane %v109_v40, 4  ;;  %v276_v45 = vadd.f32 %v275_v44, %v274_v42  ;;  %v395_v42 = vld [vmem:[%s685_s3] ss:$0 sm:$0xff] }
  0xbc   :  { %v111_v46 = vadd.f32 %v110_v43, %v109_v40  ;;  %v277_v47 = vrot.slane %v276_v45, 4 }
  0xbe   :  { %v112_v48 = vrot.slane %v111_v46, 2  ;;  %v278_v49 = vadd.f32 %v277_v47, %v276_v45 }
  0xc0   :  { %v113_v50 = vadd.f32 %v112_v48, %v111_v46  ;;  %v279_v51 = vrot.slane %v278_v49, 2 }
  0xc2   :  { %v114_v52 = vrot.slane %v113_v50, 1  ;;  %v280_v53 = vadd.f32 %v279_v51, %v278_v49 }
  0xc4   :  { %v115_v54 = vadd.f32 %v114_v52, %v113_v50  ;;  %v281_v55 = vrot.slane %v280_v53, 1 }
  0xc6   :  { %v116_v56 = vmul.f32 %v115_v54, %v89_v1  ;;  %v282_v57 = vadd.f32 %v281_v55, %v280_v53 }
  0xc8   :  { %v117_v58 = vadd.f32 1e-05, %v116_v56  ;;  %v283_v59 = vmul.f32 %v282_v57, %v89_v1  ;;  %v392_v1 = vld [vmem:[%s684_s2] ss:$0 sm:$0xff] }
  0xca   :  { %398 = vrsqrt.f32 %v117_v58  ;;  %v284_v60 = vadd.f32 1e-05, %v283_v59  ;;  %vm124_vm6 = vweird.f32 %v117_v58 }
  0xcc   :  { %400 = vrsqrt.f32 %v284_v60  ;;  %vm291_vm9 = vweird.f32 %v284_v60 }
  0xd0   :  { %v399_v61 = vpop.eup %398 }
  0xd1   :  { %v119_v62 = vmul.f32 %v399_v61, %v117_v58  ;;  %vm125_vm5 = vweird.f32 %v399_v61 }
  0xd2   :  { %v401_v63 = vpop.eup %400  ;;  %vm126_vm7 = vmor %vm124_vm6, %vm125_vm5 }
  0xd3   :  { %v120_v0 = vmul.f32 %v399_v61, %v119_v62  ;;  %v286_v2 = vmul.f32 %v401_v63, %v284_v60  ;;  %vm292_vm8 = vweird.f32 %v401_v63 }
  0xd4   :  { %vm293_vm10 = vmor %vm291_vm9, %vm292_vm8 }
  0xd5   :  { %v121_v3 = vmul.f32 0.5, %v120_v0  ;;  %v287_v4 = vmul.f32 %v401_v63, %v286_v2 }
  0xd7   :  { %v122_v5 = vsub.f32 1.5, %v121_v3  ;;  %v288_v6 = vmul.f32 0.5, %v287_v4 }
  0xd9   :  { %v123_v15 = vmul.f32 %v399_v61, %v122_v5  ;;  %v289_v16 = vsub.f32 1.5, %v288_v6 }
  0xdb   :  { %v127_v17 = vsel %vm126_vm7, %v399_v61, %v123_v15  ;;  %v290_v26 = vmul.f32 %v401_v63, %v289_v16 }
  0xdc   :  { %v128_v19 = vmul.f32 %v127_v17, %v500_v7  ;;  %v129_v20 = vmul.f32 %v127_v17, %v502_v8  ;;  %v130_v21 = vmul.f32 %v127_v17, %v504_v9  ;;  %v131_v22 = vmul.f32 %v127_v17, %v506_v10  ;;  %v394_v8 = vld [vmem:[%s684_s2] ss:$0 sm:$0xff] }
  0xdd   :  { %v132_v25 = vmul.f32 %v127_v17, %v514_v14  ;;  %v294_v31 = vsel %vm293_vm10, %v401_v63, %v290_v26 }
  0xde   :  { %v137_v27 = vmul.f32 %v392_v1, %v128_v19  ;;  %v138_v28 = vmul.f32 %v392_v1, %v129_v20  ;;  %v139_v29 = vmul.f32 %v392_v1, %v130_v21  ;;  %v140_v30 = vmul.f32 %v392_v1, %v131_v22 }
  0xdf   :  { %v141_v7 = vmul.f32 %v392_v1, %v132_v25  ;;  %v295_v34 = vmul.f32 %v294_v31, %v508_v11  ;;  %v296_v35 = vmul.f32 %v294_v31, %v510_v12  ;;  %v297_v36 = vmul.f32 %v294_v31, %v512_v13 }
  0xe0   :  { %v564_v9 = vadd.f32 %v393_v23, %v137_v27  ;;  %v566_v10 = vadd.f32 %v393_v23, %v138_v28  ;;  %v568_v32 = vadd.f32 %v393_v23, %v139_v29  ;;  %v570_v14 = vadd.f32 %v393_v23, %v140_v30 }
  0xe1   :  { %v572_v33 = vadd.f32 %v393_v23, %v141_v7  ;;  %v298_v11 = vmul.f32 %v294_v31, %v522_v18  ;;  %v299_v12 = vmul.f32 %v294_v31, %v530_v24  ;;  %v304_v13 = vmul.f32 %v394_v8, %v295_v34 }
  0xe2   :  { %v151_v37 = vmul.f32 %v564_v9, %v564_v9  ;;  %v152_v38 = vmul.f32 %v566_v10, %v566_v10  ;;  %v153_v39 = vmul.f32 %v568_v32, %v568_v32  ;;  %v154_v40 = vmul.f32 %v570_v14, %v570_v14 }
  0xe3   :  { %v155_v41 = vmul.f32 %v572_v33, %v572_v33  ;;  %v305_v48 = vmul.f32 %v394_v8, %v296_v35  ;;  %v306_v49 = vmul.f32 %v394_v8, %v297_v36  ;;  %v307_v18 = vmul.f32 %v394_v8, %v298_v11 }
  0xe4   :  { %v156_v43 = vmul.f32 %v151_v37, %v564_v9  ;;  %v157_v44 = vmul.f32 %v152_v38, %v566_v10  ;;  %v158_v45 = vmul.f32 %v153_v39, %v568_v32  ;;  %v159_v46 = vmul.f32 %v154_v40, %v570_v14 }
  0xe5   :  { %v160_v47 = vmul.f32 %v155_v41, %v572_v33  ;;  %v308_v52 = vmul.f32 %v394_v8, %v299_v12  ;;  %v597_v55 = vadd.f32 %v395_v42, %v304_v13  ;;  %v599_v56 = vadd.f32 %v395_v42, %v305_v48 }
  0xe6   :  { %v161_v50 = vmul.f32 0.044715, %v156_v43  ;;  %v162_v24 = vmul.f32 0.044715, %v157_v44  ;;  %v163_v51 = vmul.f32 0.044715, %v158_v45  ;;  %v604_v60 = vadd.f32 %v395_v42, %v306_v49 }
  0xe7   :  { %v164_v53 = vmul.f32 0.044715, %v159_v46  ;;  %v165_v54 = vmul.f32 0.044715, %v160_v47  ;;  %v608_v63 = vadd.f32 %v395_v42, %v307_v18  ;;  %v610_v0 = vadd.f32 %v395_v42, %v308_v52 }
  0xe8   :  { %v166_v57 = vadd.f32 %v161_v50, %v564_v9  ;;  %v167_v58 = vadd.f32 %v162_v24, %v566_v10  ;;  %v168_v59 = vadd.f32 %v163_v51, %v568_v32  ;;  %v318_v5 = vmul.f32 %v597_v55, %v597_v55 }
  0xe9   :  { %v169_v61 = vadd.f32 %v164_v53, %v570_v14  ;;  %v170_v62 = vadd.f32 %v165_v54, %v572_v33  ;;  %v319_v1 = vmul.f32 %v599_v56, %v599_v56  ;;  %v320_v16 = vmul.f32 %v604_v60, %v604_v60 }
  0xea   :  { %v171_v2 = vmul.f32 0.7978846, %v166_v57  ;;  %v172_v3 = vmul.f32 0.7978846, %v167_v58  ;;  %v173_v4 = vmul.f32 0.7978846, %v168_v59  ;;  %v321_v17 = vmul.f32 %v608_v63, %v608_v63 }
  0xeb   :  { %v174_v6 = vmul.f32 0.7978846, %v169_v61  ;;  %v175_v15 = vmul.f32 0.7978846, %v170_v62  ;;  %v322_v19 = vmul.f32 %v610_v0, %v610_v0  ;;  %v323_v20 = vmul.f32 %v318_v5, %v597_v55 }
  0xec   :  { %402 = vtanh.f32 %v171_v2  ;;  %v324_v21 = vmul.f32 %v319_v1, %v599_v56  ;;  %v325_v22 = vmul.f32 %v320_v16, %v604_v60  ;;  %v326_v23 = vmul.f32 %v321_v17, %v608_v63 }
  0xed   :  { %404 = vtanh.f32 %v172_v3  ;;  %v327_v25 = vmul.f32 %v322_v19, %v610_v0  ;;  %v328_v26 = vmul.f32 0.044715, %v323_v20 }
  0xee   :  { %406 = vtanh.f32 %v173_v4  ;;  %v329_v27 = vmul.f32 0.044715, %v324_v21  ;;  %v330_v28 = vmul.f32 0.044715, %v325_v22  ;;  %v331_v29 = vmul.f32 0.044715, %v326_v23 }
  0xef   :  { %408 = vtanh.f32 %v174_v6  ;;  %v332_v30 = vmul.f32 0.044715, %v327_v25  ;;  %v333_v7 = vadd.f32 %v328_v26, %v597_v55 }
  0xf0   :  { %410 = vtanh.f32 %v175_v15  ;;  %v334_v31 = vadd.f32 %v329_v27, %v599_v56  ;;  %v335_v8 = vadd.f32 %v330_v28, %v604_v60  ;;  %v336_v35 = vadd.f32 %v331_v29, %v608_v63 }
  0xf1   :  { %v337_v36 = vadd.f32 %v332_v30, %v610_v0  ;;  %v338_v37 = vmul.f32 0.7978846, %v333_v7 }
  0xf2   :  { %v403_v34 = vpop.eup %402  ;;  %v339_v40 = vmul.f32 0.7978846, %v334_v31  ;;  %v340_v41 = vmul.f32 0.7978846, %v335_v8  ;;  %v341_v13 = vmul.f32 0.7978846, %v336_v35 }
  0xf3   :  { %v405_v38 = vpop.eup %404  ;;  %v181_v39 = vadd.f32 1.0, %v403_v34  ;;  %v342_v42 = vmul.f32 0.7978846, %v337_v36  ;;  %412 = vtanh.f32 %v338_v37 }
  0xf4   :  { %v407_v11 = vpop.eup %406  ;;  %v182_v12 = vadd.f32 1.0, %v405_v38  ;;  %414 = vtanh.f32 %v339_v40 }
  0xf5   :  { %v409_v43 = vpop.eup %408  ;;  %v183_v44 = vadd.f32 1.0, %v407_v11  ;;  %v186_v45 = vmul.f32 0.5, %v181_v39  ;;  %416 = vtanh.f32 %v340_v41 }
  0xf6   :  { %v411_v46 = vpop.eup %410  ;;  %v184_v47 = vadd.f32 1.0, %v409_v43  ;;  %v187_v48 = vmul.f32 0.5, %v182_v12  ;;  %418 = vtanh.f32 %v341_v13 }
  0xf7   :  { %v185_v49 = vadd.f32 1.0, %v411_v46  ;;  %v188_v18 = vmul.f32 0.5, %v183_v44  ;;  %v191_v50 = vmul.f32 %v186_v45, %v564_v9  ;;  %420 = vtanh.f32 %v342_v42 }
  0xf8   :  { %v189_v24 = vmul.f32 0.5, %v184_v47  ;;  %v192_v51 = vmul.f32 %v187_v48, %v566_v10 }
  0xf9   :  { %v190_v52 = vmul.f32 0.5, %v185_v49  ;;  %v193_v53 = vmul.f32 %v188_v18, %v568_v32  ;;  %196 = vst.msk [vmem:[%s686_s4] sm:$0xff] %vm66_vm2, %v191_v50  ;;  %v413_v54 = vpop.eup %412 }
  0xfa   :  { %v194_v57 = vmul.f32 %v189_v24, %v570_v14  ;;  %197 = vst.msk [vmem:[%s686_s4 + $0x8] sm:$0xff] %vm66_vm2, %v192_v51  ;;  %v415_v9 = vpop.eup %414  ;;  %v348_v32 = vadd.f32 1.0, %v413_v54 }
  0xfb   :  { %v195_v10 = vmul.f32 %v190_v52, %v572_v33  ;;  %198 = vst.msk [vmem:[%s686_s4 + $0x10] sm:$0xff] %vm66_vm2, %v193_v53  ;;  %v417_v58 = vpop.eup %416  ;;  %v349_v14 = vadd.f32 1.0, %v415_v9 }
  0xfc   :  { %199 = vst.msk [vmem:[%s686_s4 + $0x18] sm:$0xff] %vm66_vm2, %v194_v57  ;;  %v419_v59 = vpop.eup %418  ;;  %v350_v33 = vadd.f32 1.0, %v417_v58  ;;  %v353_v61 = vmul.f32 0.5, %v348_v32 }
  0xfd   :  { %200 = vst.msk [vmem:[%s686_s4 + $0x20] sm:$0x1] %vm74_vm3, %v195_v10  ;;  %v421_v62 = vpop.eup %420  ;;  %v351_v2 = vadd.f32 1.0, %v419_v59  ;;  %v354_v3 = vmul.f32 0.5, %v349_v14 }
  0xfe   :  { %v352_v4 = vadd.f32 1.0, %v421_v62  ;;  %v355_v5 = vmul.f32 0.5, %v350_v33  ;;  %v358_v6 = vmul.f32 %v353_v61, %v597_v55 }
  0xff   :  { %v356_v15 = vmul.f32 0.5, %v351_v2  ;;  %v359_v1 = vmul.f32 %v354_v3, %v599_v56 }
 0x100   :  { %v357_v16 = vmul.f32 0.5, %v352_v4  ;;  %v360_v17 = vmul.f32 %v355_v5, %v604_v60  ;;  %384 = vst.msk [vmem:[%s686_s4 + $0x28] sm:$0xff] %vm66_vm2, %v358_v6 }
 0x101   :  { %v361_v19 = vmul.f32 %v356_v15, %v608_v63  ;;  %385 = vst.msk [vmem:[%s686_s4 + $0x30] sm:$0xff] %vm66_vm2, %v359_v1 }
 0x102   :  { %v362_v55 = vmul.f32 %v357_v16, %v610_v0  ;;  %386 = vst.msk [vmem:[%s686_s4 + $0x38] sm:$0xff] %vm66_vm2, %v360_v17 }
 0x103   :  { %387 = vst.msk [vmem:[%s686_s4 + $0x40] sm:$0xff] %vm66_vm2, %v361_v19 }
 0x104   :  { %388 = vst.msk [vmem:[%s686_s4 + $0x48] sm:$0x1] %vm74_vm3, %v362_v55 }

// kernel: forward.6
= control target key start
LH: loop header
LB: loop body
LE: loop exit
PB: predicated region body
PF: predicated region fallthrough
CT: control target
= control target key end

     0   :  { %vm39_vm0 = vcmask 392192   ;;  %vm103_vm1 = vcmask 130048   ;;  %v286_v59 = vmov 16.0   ;;  %vm247_vm15 = vcmask 261120   ;;  %s409_s1 = inlined_call_operand.vmem [shape: f32[48,16], index: 1, kind: input, shape index: {}]   ;;  %s410_s0 = inlined_call_operand.vmem [shape: f32[32,48], index: 0, kind: input, shape index: {}]   ;;  %s411_s2 = inlined_call_operand.vmem [shape: f32[1,16], index: 2, kind: input, shape index: {}]   ;;  %s412_s3 = inlined_call_operand.vmem [shape: f32[1,16], index: 3, kind: input, shape index: {}]   ;;  %s413_s5 = inlined_call_operand.vmem [shape: f32[1,32], index: 5, kind: input, shape index: {}]   ;;  %s414_s4 = inlined_call_operand.vmem [shape: f32[16,32], index: 4, kind: input, shape index: {}]   ;;  %s415_s6 = inlined_call_operand.vmem [shape: f32[32,32], index: 6, kind: output, shape index: {}]  }
   0x1   :  { %v32_v0 = vld [vmem:[%s409_s1 + $0x20] sm:$0xff]  ;;  %v33_v1 = vld [vmem:[%s409_s1 + $0x28] sm:$0xff]  ;;  %v30_v2 = vld [vmem:[%s409_s1 + $0x10] sm:$0xff] }
   0x2   :  { %v38_v3 = vpack.c.bf16 %v33_v1, %v32_v0  ;;  %v31_v4 = vld [vmem:[%s409_s1 + $0x18] sm:$0xff]  ;;  %v28_v6 = vld [vmem:[%s409_s1] sm:$0xff]  ;;  %v29_v7 = vld [vmem:[%s409_s1 + $0x8] sm:$0xff] }
   0x3   :  { %v37_v5 = vpack.c.bf16 %v31_v4, %v30_v2  ;;  %v24_v8 = vld [vmem:[%s410_s0] sm:$0xff]  ;;  %v36_v9 = vpack.c.bf16 %v29_v7, %v28_v6  ;;  %v25_v10 = vld [vmem:[%s410_s0 + $0x8] sm:$0xff]  ;;  %v26_v11 = vld [vmem:[%s410_s0 + $0x10] sm:$0xff] }
   0x4   :  { %51 = vmatpush.bf16.msra.mxu0 %v38_v3  ;;  %260 = vmatpush.bf16.msra.mxu2 %v38_v3  ;;  %v27_v12 = vld [vmem:[%s410_s0 + $0x18] sm:$0xff]  ;;  %v34_v13 = vpack.c.bf16 %v25_v10, %v24_v8 }
   0x5   :  { %v35_v14 = vpack.c.bf16 %v27_v12, %v26_v11 }
   0x8   :  { %52 = vmatpush.bf16.msra.mxu0 %v37_v5  ;;  %261 = vmatpush.bf16.msra.mxu2 %v37_v5 }
   0xc   :  { %53 = vmatpush.bf16.msra.mxu0 %v36_v9  ;;  %262 = vmatpush.bf16.msra.mxu2 %v36_v9 }
   0xf   :  { %256 = vmatmul.msk.bf16.vlgmr.msra.gmra.mxu0 %vm39_vm0, %v34_v13  ;;  %257 = vmatmul.msk.bf16.vlgmr.msra.gmra.mxu2 %vm39_vm0, %v35_v14 }
  0x8c   :  { %v55_v15 = vpop.f32.mrf.mxu0 }
  0x8d   :  { %v65_v16 = vmul.f32 %v55_v15, %v55_v15 }
  0x8f   :  { %v69_v17 = vmul.f32 %v65_v16, %v55_v15 }
  0x91   :  { %v73_v18 = vmul.f32 0.044715, %v69_v17 }
  0x92   :  { %v60_v19 = vpop.f32.mrf.mxu2 }
  0x93   :  { %v77_v20 = vadd.f32 %v73_v18, %v55_v15  ;;  %v67_v21 = vmul.f32 %v60_v19, %v60_v19 }
  0x94   :  { %v57_v22 = vpop.f32.mrf.mxu0 }
  0x95   :  { %v81_v23 = vmul.f32 0.7978846, %v77_v20  ;;  %v71_v24 = vmul.f32 %v67_v21, %v60_v19  ;;  %v66_v25 = vmul.f32 %v57_v22, %v57_v22 }
  0x97   :  { %v75_v26 = vmul.f32 0.044715, %v71_v24  ;;  %v70_v27 = vmul.f32 %v66_v25, %v57_v22  ;;  %268 = vtanh.f32 %v81_v23  ;;  %v213_v24 = vld [vmem:[%s414_s4] sm:$0xff]  ;;  %v214_v25 = vld [vmem:[%s414_s4 + $0x8] sm:$0xff] }
  0x99   :  { %v79_v28 = vadd.f32 %v75_v26, %v60_v19  ;;  %v74_v29 = vmul.f32 0.044715, %v70_v27  ;;  %v217_v26 = vpack.c.bf16 %v214_v25, %v213_v24 }
  0x9a   :  { %v62_v30 = vpop.f32.mrf.mxu2 }
  0x9b   :  { %v83_v31 = vmul.f32 0.7978846, %v79_v28  ;;  %v78_v32 = vadd.f32 %v74_v29, %v57_v22  ;;  %v68_v33 = vmul.f32 %v62_v30, %v62_v30  ;;  %235 = vmatpush.bf16.msra.mxu1 %v217_v26  ;;  %263 = vmatpush.bf16.msra.mxu3 %v217_v26 }
  0x9d   :  { %v269_v34 = vpop.eup %268  ;;  %v82_v35 = vmul.f32 0.7978846, %v78_v32  ;;  %v72_v36 = vmul.f32 %v68_v33, %v62_v30  ;;  %270 = vtanh.f32 %v83_v31 }
  0x9e   :  { %v89_v37 = vadd.f32 1.0, %v269_v34 }
  0x9f   :  { %272 = vtanh.f32 %v82_v35  ;;  %v76_v38 = vmul.f32 0.044715, %v72_v36 }
  0xa0   :  { %v93_v39 = vmul.f32 0.5, %v89_v37 }
  0xa1   :  { %v80_v40 = vadd.f32 %v76_v38, %v62_v30 }
  0xa2   :  { %v97_v41 = vmul.f32 %v93_v39, %v55_v15 }
  0xa3   :  { %v271_v42 = vpop.eup %270  ;;  %v84_v43 = vmul.f32 0.7978846, %v80_v40 }
  0xa4   :  { %v104_v44 = vsel %vm103_vm1, %v97_v41, 0.0  ;;  %v91_v45 = vadd.f32 1.0, %v271_v42 }
  0xa5   :  { %v273_v46 = vpop.eup %272  ;;  %274 = vtanh.f32 %v84_v43  ;;  %105 = vadd.xlane.f32.xlu1 %v104_v44 }
  0xa6   :  { %v95_v47 = vmul.f32 0.5, %v91_v45  ;;  %v90_v48 = vadd.f32 1.0, %v273_v46  ;;  %276 = vrcp.f32 %v286_v59 }
  0xa8   :  { %v99_v49 = vmul.f32 %v95_v47, %v60_v19  ;;  %v94_v50 = vmul.f32 0.5, %v90_v48 }
  0xaa   :  { %v110_v51 = vsel %vm103_vm1, %v99_v49, 0.0  ;;  %v98_v52 = vmul.f32 %v94_v50, %v57_v22 }
  0xab   :  { %v275_v53 = vpop.eup %274  ;;  %111 = vadd.xlane.f32.xlu0 %v110_v51 }
  0xac   :  { %v107_v54 = vsel %vm103_vm1, %v98_v52, 0.0  ;;  %v92_v55 = vadd.f32 1.0, %v275_v53  ;;  %v277_v60 = vpop.eup %276 }
  0xad   :  { %108 = vadd.xlane.f32.xlu1 %v107_v54  ;;  %v117_v61 = vmul.f32 16.0, %v277_v60  ;;  %vm121_vm2 = vweird.f32 %v277_v60 }
  0xae   :  { %v96_v56 = vmul.f32 0.5, %v92_v55 }
  0xaf   :  { %v118_v62 = vsub.f32 1.0, %v117_v61 }
  0xb0   :  { %v100_v57 = vmul.f32 %v96_v56, %v62_v30 }
  0xb1   :  { %v119_v63 = vmul.f32 %v277_v60, %v118_v62 }
  0xb2   :  { %v113_v58 = vsel %vm103_vm1, %v100_v57, 0.0 }
  0xb3   :  { %114 = vadd.xlane.f32.xlu0 %v113_v58  ;;  %v120_v0 = vadd.f32 %v277_v60, %v119_v63  ;;  %v265_v58 = vld [vmem:[%s411_s2] ss:$0 sm:$0xff] }
  0xb5   :  { %v122_v1 = vsel %vm121_vm2, %v277_v60, %v120_v0 }
 0x118   :  { %v106_v2 = vpop.xlane.xlu1 %105 }
 0x119   :  { %v123_v3 = vmul.f32 %v122_v1, %v106_v2  ;;  %v266_v2 = vld [vmem:[%s412_s3] ss:$0 sm:$0xff] }
 0x11b   :  { %v356_v4 = vsub.f32 %v97_v41, %v123_v3 }
 0x11d   :  { %v131_v5 = vmul.f32 %v356_v4, %v356_v4 }
 0x11e   :  { %v112_v6 = vpop.xlane.xlu0 %111 }
 0x11f   :  { %v125_v7 = vmul.f32 %v122_v1, %v112_v6  ;;  %v135_v8 = vsel %vm103_vm1, %v131_v5, 0.0 }
 0x120   :  { %136 = vadd.xlane.f32.xlu0 %v135_v8  ;;  %v109_v9 = vpop.xlane.xlu1 %108 }
 0x121   :  { %v361_v10 = vsub.f32 %v99_v49, %v125_v7  ;;  %v124_v11 = vmul.f32 %v122_v1, %v109_v9 }
 0x123   :  { %v363_v12 = vsub.f32 %v98_v52, %v124_v11  ;;  %v133_v13 = vmul.f32 %v361_v10, %v361_v10 }
 0x125   :  { %v141_v14 = vsel %vm103_vm1, %v133_v13, 0.0  ;;  %v132_v15 = vmul.f32 %v363_v12, %v363_v12 }
 0x126   :  { %142 = vadd.xlane.f32.xlu2 %v141_v14  ;;  %v115_v16 = vpop.xlane.xlu0 %114 }
 0x127   :  { %v126_v17 = vmul.f32 %v122_v1, %v115_v16  ;;  %v138_v18 = vsel %vm103_vm1, %v132_v15, 0.0 }
 0x128   :  { %139 = vadd.xlane.f32.xlu1 %v138_v18 }
 0x129   :  { %v371_v19 = vsub.f32 %v100_v57, %v126_v17 }
 0x12b   :  { %v134_v20 = vmul.f32 %v371_v19, %v371_v19 }
 0x12d   :  { %v144_v21 = vsel %vm103_vm1, %v134_v20, 0.0 }
 0x12e   :  { %145 = vadd.xlane.f32.xlu2 %v144_v21 }
 0x193   :  { %v137_v22 = vpop.xlane.xlu0 %136 }
 0x194   :  { %v147_v23 = vmul.f32 %v137_v22, %v122_v1 }
 0x196   :  { %v151_v27 = vadd.f32 1e-05, %v147_v23 }
 0x198   :  { %278 = vrsqrt.f32 %v151_v27  ;;  %vm161_vm4 = vweird.f32 %v151_v27 }
 0x199   :  { %v143_v28 = vpop.xlane.xlu2 %142 }
 0x19a   :  { %v149_v29 = vmul.f32 %v143_v28, %v122_v1 }
 0x19b   :  { %v140_v30 = vpop.xlane.xlu1 %139 }
 0x19c   :  { %v153_v31 = vadd.f32 1e-05, %v149_v29  ;;  %v148_v32 = vmul.f32 %v140_v30, %v122_v1 }
 0x19e   :  { %v279_v33 = vpop.eup %278  ;;  %280 = vrsqrt.f32 %v153_v31  ;;  %v152_v34 = vadd.f32 1e-05, %v148_v32  ;;  %vm181_vm8 = vweird.f32 %v153_v31 }
 0x19f   :  { %v156_v35 = vmul.f32 %v279_v33, %v151_v27  ;;  %vm162_vm3 = vweird.f32 %v279_v33 }
 0x1a0   :  { %282 = vrsqrt.f32 %v152_v34  ;;  %vm163_vm5 = vmor %vm161_vm4, %vm162_vm3  ;;  %vm171_vm10 = vweird.f32 %v152_v34 }
 0x1a1   :  { %v157_v36 = vmul.f32 %v279_v33, %v156_v35  ;;  %v146_v37 = vpop.xlane.xlu2 %145 }
 0x1a2   :  { %v150_v38 = vmul.f32 %v146_v37, %v122_v1 }
 0x1a3   :  { %v158_v39 = vmul.f32 0.5, %v157_v36 }
 0x1a4   :  { %v281_v40 = vpop.eup %280  ;;  %v154_v41 = vadd.f32 1e-05, %v150_v38 }
 0x1a5   :  { %v159_v42 = vsub.f32 1.5, %v158_v39  ;;  %v176_v43 = vmul.f32 %v281_v40, %v153_v31  ;;  %vm182_vm6 = vweird.f32 %v281_v40 }
 0x1a6   :  { %v283_v44 = vpop.eup %282  ;;  %284 = vrsqrt.f32 %v154_v41  ;;  %vm183_vm9 = vmor %vm181_vm8, %vm182_vm6  ;;  %vm191_vm13 = vweird.f32 %v154_v41 }
 0x1a7   :  { %v160_v45 = vmul.f32 %v279_v33, %v159_v42  ;;  %v177_v46 = vmul.f32 %v281_v40, %v176_v43  ;;  %v166_v47 = vmul.f32 %v283_v44, %v152_v34  ;;  %vm172_vm7 = vweird.f32 %v283_v44 }
 0x1a8   :  { %vm173_vm11 = vmor %vm171_vm10, %vm172_vm7 }
 0x1a9   :  { %v178_v48 = vmul.f32 0.5, %v177_v46  ;;  %v167_v49 = vmul.f32 %v283_v44, %v166_v47  ;;  %v164_v50 = vsel %vm163_vm5, %v279_v33, %v160_v45 }
 0x1aa   :  { %v195_v57 = vmul.f32 %v164_v50, %v356_v4 }
 0x1ab   :  { %v179_v51 = vsub.f32 1.5, %v178_v48  ;;  %v168_v52 = vmul.f32 0.5, %v167_v49 }
 0x1ac   :  { %v285_v53 = vpop.eup %284  ;;  %v202_v1 = vmul.f32 %v265_v58, %v195_v57 }
 0x1ad   :  { %v180_v54 = vmul.f32 %v281_v40, %v179_v51  ;;  %v169_v55 = vsub.f32 1.5, %v168_v52  ;;  %v186_v56 = vmul.f32 %v285_v53, %v154_v41  ;;  %vm192_vm12 = vweird.f32 %v285_v53 }
 0x1ae   :  { %vm193_vm14 = vmor %vm191_vm13, %vm192_vm12  ;;  %v209_v7 = vadd.f32 %v266_v2, %v202_v1 }
 0x1af   :  { %v170_v59 = vmul.f32 %v283_v44, %v169_v55  ;;  %v187_v60 = vmul.f32 %v285_v53, %v186_v56  ;;  %v184_v61 = vsel %vm183_vm9, %v281_v40, %v180_v54 }
 0x1b0   :  { %v197_v4 = vmul.f32 %v184_v61, %v361_v10  ;;  %v267_v10 = vld [vmem:[%s413_s5] ss:$0 sm:$0xff] }
 0x1b1   :  { %v174_v62 = vsel %vm173_vm11, %v283_v44, %v170_v59  ;;  %v188_v63 = vmul.f32 0.5, %v187_v60 }
 0x1b2   :  { %v196_v0 = vmul.f32 %v174_v62, %v363_v12  ;;  %v204_v12 = vmul.f32 %v265_v58, %v197_v4 }
 0x1b3   :  { %v189_v3 = vsub.f32 1.5, %v188_v63 }
 0x1b4   :  { %v203_v5 = vmul.f32 %v265_v58, %v196_v0  ;;  %v211_v15 = vadd.f32 %v266_v2, %v204_v12 }
 0x1b5   :  { %v190_v6 = vmul.f32 %v285_v53, %v189_v3 }
 0x1b6   :  { %v210_v8 = vadd.f32 %v266_v2, %v203_v5 }
 0x1b7   :  { %v194_v9 = vsel %vm193_vm14, %v285_v53, %v190_v6 }
 0x1b8   :  { %v198_v11 = vmul.f32 %v194_v9, %v371_v19  ;;  %v215_v13 = vpack.c.bf16 %v210_v8, %v209_v7 }
 0x1ba   :  { %258 = vmatmul.msk.bf16.vlgmr.msra.gmra.mxu1 %vm103_vm1, %v215_v13  ;;  %v205_v14 = vmul.f32 %v265_v58, %v198_v11 }
 0x1bc   :  { %v212_v16 = vadd.f32 %v266_v2, %v205_v14 }
 0x1be   :  { %v216_v17 = vpack.c.bf16 %v212_v16, %v211_v15 }
 0x1c0   :  { %259 = vmatmul.msk.bf16.vlgmr.msra.gmra.mxu3 %vm103_vm1, %v216_v17 }
 0x237   :  { %v237_v18 = vpop.f32.mrf.mxu1 }
 0x238   :  { %v238_v20 = vadd.f32 %v267_v10, %v237_v18 }
 0x23a   :  { %248 = vst.msk [vmem:[%s415_s6] sm:$0xff] %vm247_vm15, %v238_v20 }
 0x23f   :  { %v239_v19 = vpop.f32.mrf.mxu1 }
 0x240   :  { %v240_v21 = vadd.f32 %v267_v10, %v239_v19 }
 0x242   :  { %249 = vst.msk [vmem:[%s415_s6 + $0x8] sm:$0xff] %vm247_vm15, %v240_v21 }
 0x243   :  { %v242_v22 = vpop.f32.mrf.mxu3 }
 0x244   :  { %v243_v23 = vadd.f32 %v267_v10, %v242_v22 }
 0x246   :  { %250 = vst.msk [vmem:[%s415_s6 + $0x10] sm:$0xff] %vm247_vm15, %v243_v23 }
 0x24b   :  { %v244_v24 = vpop.f32.mrf.mxu3 }
 0x24c   :  { %v245_v25 = vadd.f32 %v267_v10, %v244_v24 }
 0x24e   :  { %251 = vst.msk [vmem:[%s415_s6 + $0x18] sm:$0xff] %vm247_vm15, %v245_v25 }

// kernel: forward.7
= control target key start
LH: loop header
LB: loop body
LE: loop exit
PB: predicated region body
PF: predicated region fallthrough
CT: control target
= control target key end

     0   :  { %vm36_vm0 = vcmask 261120   ;;  %vm64_vm1 = vsmask.f32 7424  ;;  %vm104_vm2 = vcmask 1046528   ;;  %vm134_vm3 = vsmask.f32 6400  ;;  %s842_s1 = inlined_call_operand.vmem [shape: f32[4,32,32], index: 1, kind: input, shape index: {}]   ;;  %s843_s0 = inlined_call_operand.vmem [shape: f32[2,19,32], index: 0, kind: input, shape index: {}]   ;;  %s844_s2 = inlined_call_operand.vmem [shape: f32[1,32], index: 2, kind: input, shape index: {}]   ;;  %s845_s3 = inlined_call_operand.vmem [shape: f32[1,32], index: 3, kind: input, shape index: {}]   ;;  %s846_s4 = inlined_call_operand.vmem [shape: f32[1,32], index: 4, kind: input, shape index: {}]   ;;  %s847_s5 = inlined_call_operand.vmem [shape: f32[2,16,32], index: 5, kind: output, shape index: {}]  }
   0x1   :  { %v31_v0 = vld [vmem:[%s842_s1 + $0x10] sm:$0xff]  ;;  %v32_v1 = vld [vmem:[%s842_s1 + $0x18] sm:$0xff]  ;;  %v29_v11 = vld [vmem:[%s842_s1] sm:$0xff]  ;;  %vm195_vm4 = vcmask 261122   ;;  %vm183_vm5 = vcmask 1041408   ;;  %vm202_vm6 = vcmask 254976  }
   0x2   :  { %v541_v2 = vld [vmem:[%s842_s1 + $0x30] sm:$0xff]  ;;  %v35_v3 = vpack.c.bf16 %v32_v1, %v31_v0  ;;  %v542_v4 = vld [vmem:[%s842_s1 + $0x38] sm:$0xff]  ;;  %v30_v13 = vld [vmem:[%s842_s1 + $0x8] sm:$0xff] }
   0x3   :  { %v546_v5 = vld [vmem:[%s842_s1 + $0x50] sm:$0xff]  ;;  %v547_v6 = vld [vmem:[%s842_s1 + $0x58] sm:$0xff]  ;;  %v63_v7 = vpack.c.bf16 %v542_v4, %v541_v2  ;;  %v539_v14 = vld [vmem:[%s842_s1 + $0x20] sm:$0xff]  ;;  %v34_v16 = vpack.c.bf16 %v30_v13, %v29_v11 }
   0x4   :  { %v101_v8 = vpack.c.bf16 %v547_v6, %v546_v5  ;;  %v551_v9 = vld [vmem:[%s842_s1 + $0x70] sm:$0xff]  ;;  %v552_v10 = vld [vmem:[%s842_s1 + $0x78] sm:$0xff]  ;;  %46 = vmatpush.bf16.msra.mxu0 %v35_v3  ;;  %v540_v15 = vld [vmem:[%s842_s1 + $0x28] sm:$0xff] }
   0x5   :  { %v133_v12 = vpack.c.bf16 %v552_v10, %v551_v9  ;;  %85 = vmatpush.bf16.msra.mxu1 %v63_v7  ;;  %v62_v17 = vpack.c.bf16 %v540_v15, %v539_v14  ;;  %v544_v18 = vld [vmem:[%s842_s1 + $0x40] sm:$0xff]  ;;  %v545_v19 = vld [vmem:[%s842_s1 + $0x48] sm:$0xff]  ;;  %v699_v27 = vld [vmem:[%s843_s0 + $0x10] sm:$0x7] }
   0x6   :  { %117 = vmatpush.bf16.msra.mxu2 %v101_v8  ;;  %v549_v20 = vld [vmem:[%s842_s1 + $0x60] sm:$0xff]  ;;  %v100_v21 = vpack.c.bf16 %v545_v19, %v544_v18  ;;  %v550_v22 = vld [vmem:[%s842_s1 + $0x68] sm:$0xff]  ;;  %v61_v28 = vpack.c.bf16 %v699_v27, %v699_v27  ;;  %v706_v35 = vld [vmem:[%s843_s0 + $0x18] sm:$0xff] }
   0x7   :  { %153 = vmatpush.bf16.msra.mxu3 %v133_v12  ;;  %v687_v23 = vld [vmem:[%s843_s0] sm:$0xff]  ;;  %v692_v24 = vld [vmem:[%s843_s0 + $0x8] sm:$0xff]  ;;  %v132_v25 = vpack.c.bf16 %v550_v22, %v549_v20 }
   0x8   :  { %v33_v26 = vpack.c.bf16 %v692_v24, %v687_v23  ;;  %47 = vmatpush.bf16.msra.mxu0 %v34_v16  ;;  %v72_v32 = vshll.u32 %v61_v28, 16  ;;  %v106_v33 = vrot.slane %v61_v28, 1  ;;  %v138_v34 = vshrl.u32 %v61_v28, 16  ;;  %v711_v36 = vld [vmem:[%s843_s0 + $0x20] sm:$0xff]  ;;  %v717_v40 = vld [vmem:[%s843_s0 + $0x28] sm:$0x7] }
   0x9   :  { %86 = vmatpush.bf16.msra.mxu1 %v62_v17  ;;  %v298_v47 = vpack.c.bf16 %v711_v36, %v706_v35  ;;  %v324_v49 = vpack.c.bf16 %v717_v40, %v717_v40  ;;  %v577_v6 = vld [vmem:[%s844_s2] ss:$0 sm:$0xff] }
   0xa   :  { %118 = vmatpush.bf16.msra.mxu2 %v100_v21  ;;  %v65_v29 = vshrl.u32 %v33_v26, 16  ;;  %v67_v30 = vshll.u32 %v33_v26, 16  ;;  %v105_v31 = vrot.slane %v33_v26, 1  ;;  %v74_v41 = vrot.slane %v72_v32, 1  ;;  %v578_v18 = vld [vmem:[%s844_s2] ss:$0 sm:$0xff] }
   0xb   :  { %154 = vmatpush.bf16.msra.mxu3 %v132_v25  ;;  %538 = vmatmul.msk.bf16.vlgmr.msra.gmra.mxu0 %vm36_vm0, %v33_v26  ;;  %v140_v43 = vrot.slane %v138_v34, 1  ;;  %v141_v44 = vrot.slane %v72_v32, 2  ;;  %v329_v52 = vshll.u32 %v298_v47, 16  ;;  %v327_v53 = vshrl.u32 %v298_v47, 16 }
   0xc   :  { %v69_v37 = vrot.slane %v67_v30, 1  ;;  %v135_v38 = vrot.slane %v65_v29, 1  ;;  %v136_v39 = vrot.slane %v67_v30, 2  ;;  %v107_v42 = vsel %vm104_vm2, %v105_v31, %v106_v33  ;;  %310 = vmatpush.bf16.msrb.mxu0 %v35_v3 }
   0xd   :  { %347 = vmatpush.bf16.msrb.mxu1 %v63_v7  ;;  %548 = vmatmul.msk.bf16.vlgmr.msra.gmra.mxu2 %vm36_vm0, %v107_v42  ;;  %v142_v48 = vor.u32 %v141_v44, %v140_v43  ;;  %v334_v54 = vshll.u32 %v324_v49, 16  ;;  %v396_v55 = vshrl.u32 %v324_v49, 16  ;;  %v331_v56 = vrot.slane %v329_v52, 1 }
   0xe   :  { %377 = vmatpush.bf16.msrb.mxu2 %v101_v8  ;;  %v70_v45 = vor.u32 %v69_v37, %v65_v29  ;;  %v137_v46 = vor.u32 %v136_v39, %v135_v38  ;;  %v365_v57 = vrot.slane %v298_v47, 1  ;;  %v366_v58 = vrot.slane %v324_v49, 1 }
   0xf   :  { %411 = vmatpush.bf16.msrb.mxu3 %v133_v12  ;;  %v393_v59 = vrot.slane %v327_v53, 1  ;;  %v394_v60 = vrot.slane %v329_v52, 2  ;;  %v398_v61 = vrot.slane %v396_v55, 1  ;;  %v399_v62 = vrot.slane %v334_v54, 2 }
  0x10   :  { %v75_v50 = vsel %vm64_vm1, %v70_v45, %v74_v41  ;;  %v143_v51 = vsel %vm134_vm3, %v137_v46, %v142_v48  ;;  %311 = vmatpush.bf16.msrb.mxu0 %v34_v16  ;;  %v332_v63 = vor.u32 %v331_v56, %v327_v53  ;;  %v336_v0 = vrot.slane %v334_v54, 1 }
  0x11   :  { %543 = vmatmul.msk.bf16.vlgmr.msra.gmra.mxu1 %vm36_vm0, %v75_v50  ;;  %553 = vmatmul.msk.bf16.vlgmr.msra.gmra.mxu3 %vm36_vm0, %v143_v51  ;;  %v367_v1 = vsel %vm104_vm2, %v365_v57, %v366_v58  ;;  %v395_v2 = vor.u32 %v394_v60, %v393_v59  ;;  %v400_v3 = vor.u32 %v399_v62, %v398_v61 }
  0x12   :  { %378 = vmatpush.bf16.msrb.mxu2 %v100_v21  ;;  %348 = vmatpush.bf16.msrb.mxu1 %v62_v17  ;;  %v337_v4 = vsel %vm64_vm1, %v332_v63, %v336_v0 }
  0x13   :  { %412 = vmatpush.bf16.msrb.mxu3 %v132_v25  ;;  %v401_v5 = vsel %vm134_vm3, %v395_v2, %v400_v3 }
  0x1b   :  { %557 = vmatmul.msk.bf16.vlgmr.msrb.gmra.mxu0 %vm36_vm0, %v298_v47 }
  0x1d   :  { %567 = vmatmul.msk.bf16.vlgmr.msrb.gmra.mxu2 %vm36_vm0, %v367_v1 }
  0x21   :  { %562 = vmatmul.msk.bf16.vlgmr.msrb.gmra.mxu1 %vm36_vm0, %v337_v4  ;;  %572 = vmatmul.msk.bf16.vlgmr.msrb.gmra.mxu3 %vm36_vm0, %v401_v5 }
  0x88   :  { %v49_v7 = vpop.f32.mrf.mxu0 }
  0x89   :  { %v54_v8 = vadd.f32 %v577_v6, %v49_v7 }
  0x8e   :  { %v88_v9 = vpop.f32.mrf.mxu1 }
  0x8f   :  { %v93_v10 = vadd.f32 %v88_v9, %v54_v8 }
  0x90   :  { %v120_v11 = vpop.f32.mrf.mxu2  ;;  %v51_v12 = vpop.f32.mrf.mxu0 }
  0x91   :  { %v125_v13 = vadd.f32 %v120_v11, %v93_v10  ;;  %v55_v14 = vadd.f32 %v577_v6, %v51_v12 }
  0x94   :  { %v156_v15 = vpop.f32.mrf.mxu3 }
  0x95   :  { %v161_v16 = vadd.f32 %v156_v15, %v125_v13 }
  0x96   :  { %v90_v17 = vpop.f32.mrf.mxu1 }
  0x97   :  { %v163_v19 = vmul.f32 %v161_v16, %v161_v16  ;;  %v94_v20 = vadd.f32 %v90_v17, %v55_v14 }
  0x98   :  { %v122_v21 = vpop.f32.mrf.mxu2  ;;  %v313_v22 = vpop.f32.mrf.mxu0 }
  0x99   :  { %v165_v25 = vmul.f32 %v163_v19, %v161_v16  ;;  %v126_v26 = vadd.f32 %v122_v21, %v94_v20  ;;  %v318_v28 = vadd.f32 %v578_v18, %v313_v22 }
  0x9b   :  { %v167_v29 = vmul.f32 0.044715, %v165_v25 }
  0x9c   :  { %v158_v30 = vpop.f32.mrf.mxu3 }
  0x9d   :  { %v169_v31 = vadd.f32 %v167_v29, %v161_v16  ;;  %v162_v32 = vadd.f32 %v158_v30, %v126_v26 }
  0x9e   :  { %v350_v33 = vpop.f32.mrf.mxu1 }
  0x9f   :  { %v355_v34 = vadd.f32 %v350_v33, %v318_v28  ;;  %v164_v37 = vmul.f32 %v162_v32, %v162_v32  ;;  %v171_v38 = vmul.f32 0.7978846, %v169_v31 }
  0xa0   :  { %v380_v39 = vpop.f32.mrf.mxu2  ;;  %v315_v41 = vpop.f32.mrf.mxu0 }
  0xa1   :  { %v166_v42 = vmul.f32 %v164_v37, %v162_v32  ;;  %v385_v43 = vadd.f32 %v380_v39, %v355_v34  ;;  %583 = vtanh.f32 %v171_v38  ;;  %v319_v45 = vadd.f32 %v578_v18, %v315_v41 }
  0xa3   :  { %v168_v44 = vmul.f32 0.044715, %v166_v42 }
  0xa4   :  { %v414_v46 = vpop.f32.mrf.mxu3 }
  0xa5   :  { %v170_v47 = vadd.f32 %v168_v44, %v162_v32  ;;  %v419_v48 = vadd.f32 %v414_v46, %v385_v43 }
  0xa6   :  { %v352_v49 = vpop.f32.mrf.mxu1 }
  0xa7   :  { %v584_v50 = vpop.eup %583  ;;  %v421_v51 = vmul.f32 %v419_v48, %v419_v48  ;;  %v356_v52 = vadd.f32 %v352_v49, %v319_v45  ;;  %v172_v53 = vmul.f32 0.7978846, %v170_v47 }
  0xa8   :  { %v382_v54 = vpop.f32.mrf.mxu2  ;;  %v175_v55 = vadd.f32 1.0, %v584_v50 }
  0xa9   :  { %v423_v56 = vmul.f32 %v421_v51, %v419_v48  ;;  %v386_v57 = vadd.f32 %v382_v54, %v356_v52  ;;  %585 = vtanh.f32 %v172_v53 }
  0xaa   :  { %v177_v58 = vmul.f32 0.5, %v175_v55 }
  0xab   :  { %v425_v59 = vmul.f32 0.044715, %v423_v56 }
  0xac   :  { %v416_v60 = vpop.f32.mrf.mxu3  ;;  %v179_v61 = vmul.f32 %v177_v58, %v161_v16 }
  0xad   :  { %v427_v62 = vadd.f32 %v425_v59, %v419_v48  ;;  %v420_v63 = vadd.f32 %v416_v60, %v386_v57 }
  0xae   :  { %v184_v0 = vrot.slane %v179_v61, 6 }
  0xaf   :  { %v586_v1 = vpop.eup %585  ;;  %v429_v2 = vmul.f32 0.7978846, %v427_v62  ;;  %v422_v3 = vmul.f32 %v420_v63, %v420_v63 }
  0xb0   :  { %v190_v4 = vadd.f32 %v184_v0, %v687_v23  ;;  %v176_v5 = vadd.f32 1.0, %v586_v1 }
  0xb1   :  { %v424_v6 = vmul.f32 %v422_v3, %v420_v63  ;;  %587 = vtanh.f32 %v429_v2 }
  0xb2   :  { %v196_v7 = vsel %vm195_vm4, %v190_v4, 0.0  ;;  %v178_v8 = vmul.f32 0.5, %v176_v5 }
  0xb3   :  { %v426_v9 = vmul.f32 0.044715, %v424_v6  ;;  %197 = vadd.xlane.f32.xlu0 %v196_v7 }
  0xb4   :  { %v180_v10 = vmul.f32 %v178_v8, %v162_v32 }
  0xb5   :  { %v428_v11 = vadd.f32 %v426_v9, %v420_v63 }
  0xb6   :  { %v185_v12 = vrot.slane %v180_v10, 6 }
  0xb7   :  { %v588_v13 = vpop.eup %587  ;;  %v430_v14 = vmul.f32 0.7978846, %v428_v11 }
  0xb8   :  { %v192_v15 = vadd.f32 %v185_v12, %v699_v27  ;;  %v186_v16 = vsel %vm183_vm5, %v184_v0, %v185_v12  ;;  %v433_v23 = vadd.f32 1.0, %v588_v13 }
  0xb9   :  { %589 = vtanh.f32 %v430_v14  ;;  %v191_v17 = vadd.f32 %v186_v16, %v692_v24 }
  0xba   :  { %v203_v18 = vsel %vm202_vm6, %v192_v15, 0.0  ;;  %v435_v19 = vmul.f32 0.5, %v433_v23 }
  0xbb   :  { %204 = vadd.xlane.f32.xlu1 %v203_v18  ;;  %v199_v20 = vsel %vm36_vm0, %v191_v17, 0.0 }
  0xbc   :  { %200 = vadd.xlane.f32.xlu0 %v199_v20  ;;  %v437_v21 = vmul.f32 %v435_v19, %v419_v48 }
  0xbe   :  { %v441_v22 = vrot.slane %v437_v21, 6 }
  0xbf   :  { %v590_v25 = vpop.eup %589 }
  0xc0   :  { %v447_v26 = vadd.f32 %v706_v35, %v441_v22  ;;  %v434_v28 = vadd.f32 1.0, %v590_v25  ;;  %v605_v35 = vmov 32.0  }
  0xc1   :  { %591 = vrcp.f32 %v605_v35 }
  0xc2   :  { %v452_v27 = vsel %vm195_vm4, %v447_v26, 0.0  ;;  %v436_v29 = vmul.f32 0.5, %v434_v28 }
  0xc3   :  { %453 = vadd.xlane.f32.xlu1 %v452_v27 }
  0xc4   :  { %v438_v30 = vmul.f32 %v436_v29, %v420_v63 }
  0xc6   :  { %v442_v31 = vrot.slane %v438_v30, 6 }
  0xc7   :  { %v592_v38 = vpop.eup %591 }
  0xc8   :  { %v443_v24 = vsel %vm183_vm5, %v441_v22, %v442_v31  ;;  %v449_v34 = vadd.f32 %v717_v40, %v442_v31  ;;  %v207_v39 = vmul.f32 32.0, %v592_v38  ;;  %vm211_vm7 = vweird.f32 %v592_v38  ;;  %v579_v31 = vld [vmem:[%s845_s3] ss:$0 sm:$0xff] }
  0xc9   :  { %v448_v32 = vadd.f32 %v711_v36, %v443_v24 }
  0xca   :  { %v458_v37 = vsel %vm202_vm6, %v449_v34, 0.0  ;;  %v208_v41 = vsub.f32 1.0, %v207_v39 }
  0xcb   :  { %v455_v33 = vsel %vm36_vm0, %v448_v32, 0.0 }
  0xcc   :  { %456 = vadd.xlane.f32.xlu2 %v455_v33  ;;  %v209_v42 = vmul.f32 %v592_v38, %v208_v41 }
  0xce   :  { %v210_v43 = vadd.f32 %v592_v38, %v209_v42 }
  0xd0   :  { %v756_v44 = vsel %vm211_vm7, %v592_v38, %v210_v43 }
  0xd4   :  { %459 = vadd.xlane.f32.xlu2 %v458_v37 }
 0x126   :  { %v198_v45 = vpop.xlane.xlu0 %197 }
 0x127   :  { %v213_v36 = vmul.f32 %v756_v44, %v198_v45 }
 0x129   :  { %v759_v46 = vsub.f32 %v190_v4, %v213_v36 }
 0x12b   :  { %v219_v40 = vmul.f32 %v759_v46, %v759_v46 }
 0x12d   :  { %v222_v47 = vsel %vm195_vm4, %v219_v40, 0.0 }
 0x12e   :  { %v205_v48 = vpop.xlane.xlu1 %204  ;;  %223 = vadd.xlane.f32.xlu0 %v222_v47 }
 0x12f   :  { %v215_v49 = vmul.f32 %v756_v44, %v205_v48  ;;  %v201_v50 = vpop.xlane.xlu0 %200 }
 0x130   :  { %v214_v51 = vmul.f32 %v756_v44, %v201_v50 }
 0x131   :  { %v766_v52 = vsub.f32 %v192_v15, %v215_v49 }
 0x132   :  { %v768_v53 = vsub.f32 %v191_v17, %v214_v51 }
 0x133   :  { %v221_v54 = vmul.f32 %v766_v52, %v766_v52 }
 0x134   :  { %v220_v55 = vmul.f32 %v768_v53, %v768_v53 }
 0x135   :  { %v228_v56 = vsel %vm202_vm6, %v221_v54, 0.0 }
 0x136   :  { %229 = vadd.xlane.f32.xlu2 %v228_v56  ;;  %v454_v57 = vpop.xlane.xlu1 %453  ;;  %v225_v58 = vsel %vm36_vm0, %v220_v55, 0.0 }
 0x137   :  { %v461_v59 = vmul.f32 %v454_v57, %v756_v44  ;;  %226 = vadd.xlane.f32.xlu1 %v225_v58 }
 0x139   :  { %v777_v60 = vsub.f32 %v447_v26, %v461_v59 }
 0x13b   :  { %v467_v61 = vmul.f32 %v777_v60, %v777_v60 }
 0x13d   :  { %v470_v62 = vsel %vm195_vm4, %v467_v61, 0.0 }
 0x13e   :  { %471 = vadd.xlane.f32.xlu0 %v470_v62 }
 0x13f   :  { %v457_v63 = vpop.xlane.xlu2 %456 }
 0x140   :  { %v462_v0 = vmul.f32 %v457_v63, %v756_v44 }
 0x142   :  { %v783_v1 = vsub.f32 %v448_v32, %v462_v0 }
 0x144   :  { %v468_v2 = vmul.f32 %v783_v1, %v783_v1 }
 0x146   :  { %v473_v3 = vsel %vm36_vm0, %v468_v2, 0.0 }
 0x147   :  { %v460_v4 = vpop.xlane.xlu2 %459  ;;  %474 = vadd.xlane.f32.xlu1 %v473_v3 }
 0x148   :  { %v463_v5 = vmul.f32 %v460_v4, %v756_v44 }
 0x14a   :  { %v789_v6 = vsub.f32 %v449_v34, %v463_v5  ;;  %v580_v34 = vld [vmem:[%s846_s4] ss:$0 sm:$0xff] }
 0x14c   :  { %v469_v7 = vmul.f32 %v789_v6, %v789_v6 }
 0x14e   :  { %v476_v8 = vsel %vm202_vm6, %v469_v7, 0.0 }
 0x14f   :  { %477 = vadd.xlane.f32.xlu2 %v476_v8  ;;  %v582_v8 = vld [vmem:[%s846_s4] ss:$0 sm:$0xff] }
 0x1a1   :  { %v224_v9 = vpop.xlane.xlu0 %223 }
 0x1a2   :  { %v231_v10 = vmul.f32 %v224_v9, %v756_v44 }
 0x1a4   :  { %v234_v11 = vadd.f32 1e-05, %v231_v10 }
 0x1a6   :  { %593 = vrsqrt.f32 %v234_v11  ;;  %vm243_vm9 = vweird.f32 %v234_v11 }
 0x1a9   :  { %v230_v12 = vpop.xlane.xlu2 %229 }
 0x1aa   :  { %v233_v13 = vmul.f32 %v230_v12, %v756_v44  ;;  %v227_v14 = vpop.xlane.xlu1 %226 }
 0x1ab   :  { %v232_v15 = vmul.f32 %v227_v14, %v756_v44 }
 0x1ac   :  { %v594_v16 = vpop.eup %593  ;;  %v236_v23 = vadd.f32 1e-05, %v233_v13 }
 0x1ad   :  { %v238_v17 = vmul.f32 %v594_v16, %v234_v11  ;;  %v235_v18 = vadd.f32 1e-05, %v232_v15  ;;  %vm244_vm8 = vweird.f32 %v594_v16 }
 0x1ae   :  { %595 = vrsqrt.f32 %v236_v23  ;;  %vm245_vm10 = vmor %vm243_vm9, %vm244_vm8  ;;  %vm263_vm13 = vweird.f32 %v236_v23 }
 0x1af   :  { %v239_v19 = vmul.f32 %v594_v16, %v238_v17  ;;  %597 = vrsqrt.f32 %v235_v18  ;;  %vm253_vm15 = vweird.f32 %v235_v18 }
 0x1b1   :  { %v240_v20 = vmul.f32 0.5, %v239_v19  ;;  %v472_v21 = vpop.xlane.xlu0 %471 }
 0x1b2   :  { %v479_v22 = vmul.f32 %v472_v21, %v756_v44 }
 0x1b3   :  { %v241_v25 = vsub.f32 1.5, %v240_v20 }
 0x1b4   :  { %v596_v26 = vpop.eup %595  ;;  %v482_v28 = vadd.f32 1e-05, %v479_v22 }
 0x1b5   :  { %v598_v27 = vpop.eup %597  ;;  %v242_v29 = vmul.f32 %v594_v16, %v241_v25  ;;  %v258_v30 = vmul.f32 %v596_v26, %v236_v23  ;;  %vm264_vm11 = vweird.f32 %v596_v26 }
 0x1b6   :  { %v248_v24 = vmul.f32 %v598_v27, %v235_v18  ;;  %599 = vrsqrt.f32 %v482_v28  ;;  %vm254_vm12 = vweird.f32 %v598_v27  ;;  %vm265_vm14 = vmor %vm263_vm13, %vm264_vm11  ;;  %vm491_vm3 = vweird.f32 %v482_v28 }
 0x1b7   :  { %v246_v32 = vsel %vm245_vm10, %v594_v16, %v242_v29  ;;  %v259_v33 = vmul.f32 %v596_v26, %v258_v30  ;;  %vm255_vm1 = vmor %vm253_vm15, %vm254_vm12 }
 0x1b8   :  { %v267_v37 = vmul.f32 %v246_v32, %v759_v46  ;;  %v249_v35 = vmul.f32 %v598_v27, %v248_v24 }
 0x1b9   :  { %v260_v38 = vmul.f32 0.5, %v259_v33 }
 0x1ba   :  { %v273_v39 = vmul.f32 %v579_v31, %v267_v37  ;;  %v250_v41 = vmul.f32 0.5, %v249_v35  ;;  %v475_v42 = vpop.xlane.xlu1 %474 }
 0x1bb   :  { %v261_v43 = vsub.f32 1.5, %v260_v38  ;;  %v480_v45 = vmul.f32 %v475_v42, %v756_v44 }
 0x1bc   :  { %v600_v36 = vpop.eup %599  ;;  %v279_v40 = vadd.f32 %v580_v34, %v273_v39  ;;  %v251_v47 = vsub.f32 1.5, %v250_v41 }
 0x1bd   :  { %v262_v48 = vmul.f32 %v596_v26, %v261_v43  ;;  %v486_v49 = vmul.f32 %v600_v36, %v482_v28  ;;  %v483_v50 = vadd.f32 1e-05, %v480_v45  ;;  %vm492_vm2 = vweird.f32 %v600_v36 }
 0x1be   :  { %282 = vst.msk [vmem:[%s847_s5 - $0x2] sm:$0xfc] %vm195_vm4, %v279_v40  ;;  %v252_v46 = vmul.f32 %v598_v27, %v251_v47  ;;  %vm493_vm5 = vmor %vm491_vm3, %vm492_vm2 }
 0x1bf   :  { %v266_v51 = vsel %vm265_vm14, %v596_v26, %v262_v48  ;;  %v487_v54 = vmul.f32 %v600_v36, %v486_v49  ;;  %601 = vrsqrt.f32 %v483_v50  ;;  %vm501_vm8 = vweird.f32 %v483_v50 }
 0x1c0   :  { %v269_v55 = vmul.f32 %v266_v51, %v766_v52  ;;  %v256_v56 = vsel %vm255_vm1, %v598_v27, %v252_v46  ;;  %v581_v52 = vld [vmem:[%s845_s3] ss:$0 sm:$0xff] }
 0x1c1   :  { %v268_v57 = vmul.f32 %v256_v56, %v768_v53  ;;  %v488_v58 = vmul.f32 0.5, %v487_v54 }
 0x1c2   :  { %v275_v59 = vmul.f32 %v579_v31, %v269_v55  ;;  %v478_v61 = vpop.xlane.xlu2 %477 }
 0x1c3   :  { %v274_v62 = vmul.f32 %v579_v31, %v268_v57  ;;  %v489_v63 = vsub.f32 1.5, %v488_v58  ;;  %v481_v0 = vmul.f32 %v478_v61, %v756_v44 }
 0x1c4   :  { %v281_v2 = vadd.f32 %v580_v34, %v275_v59 }
 0x1c5   :  { %v602_v3 = vpop.eup %601  ;;  %v280_v4 = vadd.f32 %v580_v34, %v274_v62  ;;  %v490_v5 = vmul.f32 %v600_v36, %v489_v63  ;;  %v484_v7 = vadd.f32 1e-05, %v481_v0 }
 0x1c6   :  { %284 = vst.msk [vmem:[%s847_s5 + $0xe] sm:$0x3] %vm202_vm6, %v281_v2  ;;  %v496_v53 = vmul.f32 %v602_v3, %v483_v50  ;;  %vm502_vm7 = vweird.f32 %v602_v3 }
 0x1c7   :  { %283 = vst.msk [vmem:[%s847_s5 + $0x6] sm:$0xff] %vm36_vm0, %v280_v4  ;;  %v494_v44 = vsel %vm493_vm5, %v600_v36, %v490_v5  ;;  %603 = vrsqrt.f32 %v484_v7  ;;  %vm503_vm9 = vmor %vm501_vm8, %vm502_vm7  ;;  %vm511_vm11 = vweird.f32 %v484_v7 }
 0x1c8   :  { %v515_v9 = vmul.f32 %v494_v44, %v777_v60  ;;  %v497_v10 = vmul.f32 %v602_v3, %v496_v53 }
 0x1ca   :  { %v521_v11 = vmul.f32 %v581_v52, %v515_v9  ;;  %v498_v12 = vmul.f32 0.5, %v497_v10 }
 0x1cc   :  { %v527_v13 = vadd.f32 %v582_v8, %v521_v11  ;;  %v499_v14 = vsub.f32 1.5, %v498_v12 }
 0x1cd   :  { %v604_v15 = vpop.eup %603 }
 0x1ce   :  { %573 = vst.msk [vmem:[%s847_s5 + $0xe] sm:$0xfc] %vm195_vm4, %v527_v13  ;;  %v500_v16 = vmul.f32 %v602_v3, %v499_v14  ;;  %v506_v23 = vmul.f32 %v604_v15, %v484_v7  ;;  %vm512_vm10 = vweird.f32 %v604_v15 }
 0x1cf   :  { %vm513_vm4 = vmor %vm511_vm11, %vm512_vm10 }
 0x1d0   :  { %v504_v17 = vsel %vm503_vm9, %v602_v3, %v500_v16  ;;  %v507_v18 = vmul.f32 %v604_v15, %v506_v23 }
 0x1d1   :  { %v516_v60 = vmul.f32 %v504_v17, %v783_v1 }
 0x1d2   :  { %v508_v19 = vmul.f32 0.5, %v507_v18 }
 0x1d3   :  { %v522_v20 = vmul.f32 %v581_v52, %v516_v60 }
 0x1d4   :  { %v509_v21 = vsub.f32 1.5, %v508_v19 }
 0x1d5   :  { %v528_v22 = vadd.f32 %v582_v8, %v522_v20 }
 0x1d6   :  { %v510_v25 = vmul.f32 %v604_v15, %v509_v21 }
 0x1d7   :  { %574 = vst.msk [vmem:[%s847_s5 + $0x16] sm:$0xff] %vm36_vm0, %v528_v22 }
 0x1d8   :  { %v514_v26 = vsel %vm513_vm4, %v604_v15, %v510_v25 }
 0x1d9   :  { %v517_v28 = vmul.f32 %v514_v26, %v789_v6 }
 0x1db   :  { %v523_v27 = vmul.f32 %v581_v52, %v517_v28 }
 0x1dd   :  { %v529_v29 = vadd.f32 %v582_v8, %v523_v27 }
 0x1df   :  { %575 = vst.msk [vmem:[%s847_s5 + $0x1e] sm:$0x3] %vm202_vm6, %v529_v29 }

// kernel: forward.8
= control target key start
LH: loop header
LB: loop body
LE: loop exit
PB: predicated region body
PF: predicated region fallthrough
CT: control target
= control target key end

     0   :  { %vm64_vm0 = vcmask 261120   ;;  %vm111_vm1 = vcmask 64512   ;;  %s1232_s21 = smov 64   ;;  %s1234_s22 = smov 120   ;;  %vm237_vm2 = vcmask 1043456   ;;  %s1714_s2 = inlined_call_operand.vmem [shape: f32[32,96], index: 2, kind: input, shape index: {}]   ;;  %s1715_s0 = inlined_call_operand.vmem [shape: f32[32,32], index: 0, kind: input, shape index: {}]   ;;  %s1716_s3 = inlined_call_operand.vmem [shape: f32[1,96], index: 3, kind: input, shape index: {}]   ;;  %s1717_s1 = inlined_call_operand.vmem [shape: f32[32,32], index: 1, kind: input, shape index: {}]   ;;  %s1718_s4 = inlined_call_operand.vmem [shape: f32[32,32], index: 4, kind: input, shape index: {}]   ;;  %s1719_s5 = inlined_call_operand.vmem [shape: f32[1,32], index: 5, kind: input, shape index: {}]   ;;  %s1720_s6 = inlined_call_operand.vmem [shape: f32[1,32], index: 6, kind: input, shape index: {}]   ;;  %s1721_s7 = inlined_call_operand.vmem [shape: f32[1,32], index: 7, kind: input, shape index: {}]   ;;  %s1722_s9 = inlined_call_operand.vmem [shape: f32[1,64], index: 9, kind: input, shape index: {}]   ;;  %s1723_s8 = inlined_call_operand.vmem [shape: f32[32,64], index: 8, kind: input, shape index: {}]   ;;  %s1724_s11 = inlined_call_operand.vmem [shape: f32[1,32], index: 11, kind: input, shape index: {}]   ;;  %s1725_s10 = inlined_call_operand.vmem [shape: f32[64,32], index: 10, kind: input, shape index: {}]   ;;  %s1726_s12 = inlined_call_operand.vmem [shape: f32[1,32], index: 12, kind: input, shape index: {}]   ;;  %s1727_s13 = inlined_call_operand.vmem [shape: f32[1,32], index: 13, kind: input, shape index: {}]   ;;  %s1728_s14 = inlined_call_operand.vmem [shape: f32[32,32], index: 14, kind: output, shape index: {}]  }
   0x1   :  { %v54_v0 = vld [vmem:[%s1714_s2 + $0x10] sm:$0xff]  ;;  %v55_v1 = vld [vmem:[%s1714_s2 + $0x18] sm:$0xff]  ;;  %v52_v2 = vld [vmem:[%s1714_s2] sm:$0xff]  ;;  %s1236_s27 = smov 80   ;;  %s1238_s28 = smov 112  }
   0x2   :  { %v59_v3 = vpack.c.bf16 %v55_v1, %v54_v0  ;;  %v53_v4 = vld [vmem:[%s1714_s2 + $0x8] sm:$0xff]  ;;  %v1333_v5 = vld [vmem:[%s1715_s0] sm:$0xff]  ;;  %v1343_v8 = vld [vmem:[%s1715_s0 + $0x10] sm:$0xff]  ;;  %s1237_s2 = smov 72   ;;  %s1239_s29 = smov 104  }
   0x3   :  { %v58_v6 = vpack.c.bf16 %v53_v4, %v52_v2  ;;  %v1338_v7 = vld [vmem:[%s1715_s0 + $0x8] sm:$0xff]  ;;  %v1348_v9 = vld [vmem:[%s1715_s0 + $0x18] sm:$0xff]  ;;  %v1133_v14 = vld [vmem:[%s1716_s3] ss:$0 sm:$0xff]  ;;  %s1231_s0 = smov 96   ;;  %s1240_s30 = smov 48  }
   0x4   :  { %77 = vmatpush.bf16.msra.mxu0 %v59_v3  ;;  %1119 = vmatpush.bf16.msra.mxu1 %v59_v3  ;;  %v56_v10 = vpack.c.bf16 %v1338_v7, %v1333_v5  ;;  %v57_v11 = vpack.c.bf16 %v1348_v9, %v1343_v8  ;;  %v1374_v28 = vld [vmem:[%s1717_s1] sm:$0xff]  ;;  %v1381_v33 = vld [vmem:[%s1717_s1 + $0x8] sm:$0xff]  ;;  %v1388_v38 = vld [vmem:[%s1717_s1 + $0x10] sm:$0xff]  ;;  %s1241_s15 = smov 40  }
   0x5   :  { %v1395_v43 = vld [vmem:[%s1717_s1 + $0x18] sm:$0xff]  ;;  %s1233_s1 = smov 88   ;;  %v90_v4 = vld [vmem:[%s1718_s4] sm:$0xff] }
   0x8   :  { %78 = vmatpush.bf16.msra.mxu0 %v58_v6  ;;  %1120 = vmatpush.bf16.msra.mxu1 %v58_v6  ;;  %v230_v6 = vpack.c.bf16 %v90_v4, %v90_v4 }
   0xb   :  { %1089 = vmatmul.msk.bf16.vlgmr.msra.gmra.mxu0 %vm64_vm0, %v56_v10  ;;  %1090 = vmatmul.msk.bf16.vlgmr.msra.gmra.mxu1 %vm64_vm0, %v57_v11  ;;  %v239_v10 = vsel %vm237_vm2, %v230_v6, 0 }
   0xc   :  { %248 = vmatpush.bf16.msra.mxu3 %v239_v10 }
  0x88   :  { %v85_v12 = vpop.f32.mrf.mxu1  ;;  %v80_v13 = vpop.f32.mrf.mxu0 }
  0x89   :  { %v86_v16 = vadd.f32 %v1133_v14, %v85_v12  ;;  %v81_v20 = vadd.f32 %v1133_v14, %v80_v13 }
  0x90   :  { %v87_v15 = vpop.f32.mrf.mxu1  ;;  %v82_v19 = vpop.f32.mrf.mxu0 }
  0x91   :  { %v88_v17 = vadd.f32 %v1133_v14, %v87_v15  ;;  %v83_v21 = vadd.f32 %v1133_v14, %v82_v19 }
  0x93   :  { %v1359_v18 = vpack.c.bf16 %v88_v17, %v86_v16  ;;  %v1362_v22 = vpack.c.bf16 %v83_v21, %v81_v20 }
  0x95   :  { %109 = vrot.lane.b32.xlu0 %v1359_v18, %s1231_s0 }
  0x9d   :  { %107 = vrot.lane.b32.xlu0 %v1362_v22, %s1231_s0 }
 0x107   :  { %v110_v23 = vpop.permute.xlu0 %109 }
 0x108   :  { %v122_v24 = vsel %vm111_vm1, %v110_v23, 0 }
 0x109   :  { %130 = vmatpush.bf16.xpose.msrb.mxu1 %v122_v24 }
 0x10f   :  { %v108_v25 = vpop.permute.xlu0 %107 }
 0x110   :  { %v119_v26 = vsel %vm111_vm1, %v108_v25, 0 }
 0x111   :  { %131 = vmatpush.bf16.xpose.msrb.mxu1 %v119_v26 }
 0x118   :  { %1091 = vmatmul.msk.bf16.vlgmr.msrb.gmra.mxu1 %vm111_vm1, %v1362_v22 }
 0x128   :  { %1092 = vmatmul.msk.bf16.gmra.mxu1 %vm111_vm1, %v1359_v18 }
 0x195   :  { %v133_v27 = vpop.f32.mrf.mxu1 }
 0x196   :  { %v143_v29 = vmul.f32 0.35355338, %v133_v27 }
 0x198   :  { %v147_v30 = vadd.f32 %v143_v29, %v1374_v28 }
 0x19a   :  { %v151_v31 = vsel %vm64_vm0, %v147_v30, -inf }
 0x19b   :  { %152 = vmax.xlane.f32.xlu1 %v151_v31 }
 0x19d   :  { %v135_v32 = vpop.f32.mrf.mxu1 }
 0x19e   :  { %v144_v34 = vmul.f32 0.35355338, %v135_v32 }
 0x1a0   :  { %v148_v35 = vadd.f32 %v144_v34, %v1381_v33 }
 0x1a2   :  { %v154_v36 = vsel %vm64_vm0, %v148_v35, -inf }
 0x1a3   :  { %155 = vmax.xlane.f32.xlu1 %v154_v36 }
 0x1a5   :  { %v138_v37 = vpop.f32.mrf.mxu1 }
 0x1a6   :  { %v145_v39 = vmul.f32 0.35355338, %v138_v37 }
 0x1a8   :  { %v149_v40 = vadd.f32 %v145_v39, %v1388_v38 }
 0x1aa   :  { %v157_v41 = vsel %vm64_vm0, %v149_v40, -inf }
 0x1ab   :  { %158 = vmax.xlane.f32.xlu2 %v157_v41 }
 0x1ad   :  { %v140_v42 = vpop.f32.mrf.mxu1 }
 0x1ae   :  { %v146_v44 = vmul.f32 0.35355338, %v140_v42 }
 0x1b0   :  { %v150_v45 = vadd.f32 %v146_v44, %v1395_v43 }
 0x1b2   :  { %v160_v46 = vsel %vm64_vm0, %v150_v45, -inf }
 0x1b3   :  { %161 = vmax.xlane.f32.xlu2 %v160_v46  ;;  %v1428_v46 = vld [vmem:[%s1719_s5] ss:$0 sm:$0xff]  ;;  %s1235_s5 = smov 56  }
 0x1cb   :  { %199 = vrot.lane.b32.xlu2 %v1359_v18, %s1232_s21 }
 0x20e   :  { %v153_v47 = vpop.xlane.xlu1 %152 }
 0x20f   :  { %v163_v48 = vsub.f32 %v147_v30, %v153_v47 }
 0x211   :  { %v167_v49 = vmul.f32 1.442695, %v163_v48 }
 0x213   :  { %1141 = vpow2.f32 %v167_v49 }
 0x216   :  { %v156_v50 = vpop.xlane.xlu1 %155 }
 0x217   :  { %v164_v51 = vsub.f32 %v148_v35, %v156_v50 }
 0x219   :  { %v1142_v52 = vpop.eup %1141  ;;  %v169_v53 = vmul.f32 1.442695, %v164_v51 }
 0x21a   :  { %v175_v54 = vsel %vm64_vm0, %v1142_v52, 0.0 }
 0x21b   :  { %1143 = vpow2.f32 %v169_v53  ;;  %176 = vadd.xlane.f32.xlu0 %v175_v54 }
 0x21e   :  { %v159_v55 = vpop.xlane.xlu2 %158 }
 0x21f   :  { %v165_v56 = vsub.f32 %v149_v40, %v159_v55 }
 0x221   :  { %v1144_v57 = vpop.eup %1143  ;;  %v171_v58 = vmul.f32 1.442695, %v165_v56 }
 0x222   :  { %v178_v59 = vsel %vm64_vm0, %v1144_v57, 0.0 }
 0x223   :  { %1145 = vpow2.f32 %v171_v58  ;;  %179 = vadd.xlane.f32.xlu1 %v178_v59 }
 0x226   :  { %v162_v60 = vpop.xlane.xlu2 %161 }
 0x227   :  { %v166_v0 = vsub.f32 %v150_v45, %v162_v60 }
 0x229   :  { %v1146_v61 = vpop.eup %1145  ;;  %v173_v1 = vmul.f32 1.442695, %v166_v0 }
 0x22a   :  { %v181_v62 = vsel %vm64_vm0, %v1146_v61, 0.0 }
 0x22b   :  { %182 = vadd.xlane.f32.xlu2 %v181_v62  ;;  %1147 = vpow2.f32 %v173_v1 }
 0x22e   :  { %v200_v63 = vpop.permute.xlu2 %199 }
 0x22f   :  { %270 = vrot.lane.b32.xlu0 %v1359_v18, %s1233_s1  ;;  %215 = vmatpush.bf16.msra.mxu2 %v200_v63 }
 0x231   :  { %v1148_v2 = vpop.eup %1147 }
 0x232   :  { %v184_v3 = vsel %vm64_vm0, %v1148_v2, 0.0 }
 0x237   :  { %268 = vrot.lane.b32.xlu0 %v1362_v22, %s1233_s1 }
 0x23c   :  { %197 = vrot.lane.b32.xlu1 %v1362_v22, %s1232_s21 }
 0x23f   :  { %266 = vrot.lane.b32.xlu0 %v1359_v18, %s1234_s22 }
 0x243   :  { %264 = vrot.lane.b32.xlu2 %v1362_v22, %s1234_s22 }
 0x266   :  { %185 = vadd.xlane.f32.xlu1 %v184_v3 }
 0x28e   :  { %v177_v11 = vpop.xlane.xlu0 %176 }
 0x296   :  { %v180_v12 = vpop.xlane.xlu1 %179 }
 0x297   :  { %1149 = vrcp.f32 %v180_v12 }
 0x298   :  { %1151 = vrcp.f32 %v177_v11 }
 0x29d   :  { %v1150_v15 = vpop.eup %1149 }
 0x29e   :  { %v1152_v19 = vpop.eup %1151  ;;  %v192_v20 = vmul.f32 %v1150_v15, %v1144_v57  ;;  %v183_v25 = vpop.xlane.xlu2 %182 }
 0x29f   :  { %v191_v23 = vmul.f32 %v1152_v19, %v1142_v52  ;;  %1153 = vrcp.f32 %v183_v25 }
 0x2a1   :  { %v271_v13 = vpop.permute.xlu0 %270  ;;  %v195_v24 = vpack.c.bf16 %v192_v20, %v191_v23 }
 0x2a2   :  { %v282_v14 = vsel %vm111_vm1, %v271_v13, 0 }
 0x2a3   :  { %290 = vmatpush.bf16.xpose.msrb.mxu3 %v282_v14 }
 0x2a5   :  { %v1154_v27 = vpop.eup %1153 }
 0x2a6   :  { %v193_v30 = vmul.f32 %v1154_v27, %v1146_v61  ;;  %v265_v41 = vpop.permute.xlu2 %264 }
 0x2a9   :  { %v269_v16 = vpop.permute.xlu0 %268 }
 0x2aa   :  { %v279_v17 = vsel %vm111_vm1, %v269_v16, 0 }
 0x2ab   :  { %291 = vmatpush.bf16.xpose.msrb.mxu3 %v279_v17 }
 0x2ae   :  { %v198_v21 = vpop.permute.xlu1 %197 }
 0x2af   :  { %216 = vmatpush.bf16.msra.mxu2 %v198_v21 }
 0x2b1   :  { %v267_v42 = vpop.permute.xlu0 %266 }
 0x2b2   :  { %1093 = vmatmul.msk.bf16.vlgmr.msra.gmra.mxu2 %vm64_vm0, %v195_v24 }
 0x2d9   :  { %v186_v26 = vpop.xlane.xlu1 %185 }
 0x2da   :  { %1155 = vrcp.f32 %v186_v26 }
 0x2e0   :  { %v1156_v29 = vpop.eup %1155 }
 0x2e1   :  { %v194_v31 = vmul.f32 %v1156_v29, %v1148_v2 }
 0x2e3   :  { %v196_v32 = vpack.c.bf16 %v194_v31, %v193_v30 }
 0x2e5   :  { %1094 = vmatmul.msk.bf16.gmra.mxu2 %vm64_vm0, %v196_v32 }
 0x335   :  { %v218_v34 = vpop.f32.mrf.mxu2 }
 0x33d   :  { %v220_v35 = vpop.f32.mrf.mxu2 }
 0x33e   :  { %v228_v36 = vpack.c.bf16 %v220_v35, %v218_v34 }
 0x340   :  { %1095 = vmatmul.msk.bf16.vlgmr.msra.gmra.mxu3 %vm111_vm1, %v228_v36 }
 0x368   :  { %v223_v37 = vpop.f32.mrf.mxu2 }
 0x370   :  { %v225_v39 = vpop.f32.mrf.mxu2 }
 0x371   :  { %v229_v40 = vpack.c.bf16 %v225_v39, %v223_v37 }
 0x373   :  { %1096 = vmatmul.msk.bf16.gmra.mxu3 %vm111_vm1, %v229_v40  ;;  %v91_v40 = vld [vmem:[%s1718_s4 + $0x8] sm:$0xff] }
 0x383   :  { %1097 = vmatmul.msk.bf16.vlgmr.msrb.gmra.mxu3 %vm111_vm1, %v265_v41  ;;  %v390_v41 = vpack.c.bf16 %v91_v40, %v91_v40 }
 0x393   :  { %1098 = vmatmul.msk.bf16.gmra.mxu3 %vm111_vm1, %v267_v42  ;;  %v398_v42 = vsel %vm237_vm2, %v390_v41, 0 }
 0x394   :  { %407 = vmatpush.bf16.msrb.mxu2 %v398_v42 }
 0x3c3   :  { %v1421_v44 = vpop.f32.mrf.mxu3 }
 0x3cb   :  { %v1423_v45 = vpop.f32.mrf.mxu3 }
 0x3f6   :  { %v255_v47 = vpop.f32.mrf.mxu3 }
 0x3f7   :  { %v1431_v48 = vadd.f32 %v1428_v46, %v255_v47 }
 0x3fe   :  { %v257_v49 = vpop.f32.mrf.mxu3 }
 0x3ff   :  { %v1434_v50 = vadd.f32 %v1428_v46, %v257_v49 }
 0x406   :  { %v293_v51 = vpop.f32.mrf.mxu3 }
 0x407   :  { %v303_v52 = vmul.f32 0.35355338, %v293_v51 }
 0x409   :  { %v307_v53 = vadd.f32 %v303_v52, %v1374_v28 }
 0x40b   :  { %v311_v54 = vsel %vm64_vm0, %v307_v53, -inf }
 0x40c   :  { %312 = vmax.xlane.f32.xlu1 %v311_v54 }
 0x40e   :  { %v295_v55 = vpop.f32.mrf.mxu3 }
 0x40f   :  { %v304_v56 = vmul.f32 0.35355338, %v295_v55 }
 0x411   :  { %v308_v57 = vadd.f32 %v304_v56, %v1381_v33 }
 0x413   :  { %v314_v58 = vsel %vm64_vm0, %v308_v57, -inf }
 0x414   :  { %315 = vmax.xlane.f32.xlu0 %v314_v58 }
 0x416   :  { %v298_v59 = vpop.f32.mrf.mxu3 }
 0x417   :  { %v305_v60 = vmul.f32 0.35355338, %v298_v59 }
 0x419   :  { %v309_v61 = vadd.f32 %v305_v60, %v1388_v38 }
 0x41b   :  { %v317_v62 = vsel %vm64_vm0, %v309_v61, -inf }
 0x41c   :  { %318 = vmax.xlane.f32.xlu1 %v317_v62 }
 0x41e   :  { %v300_v63 = vpop.f32.mrf.mxu3 }
 0x41f   :  { %v306_v0 = vmul.f32 0.35355338, %v300_v63 }
 0x421   :  { %v310_v1 = vadd.f32 %v306_v0, %v1395_v43 }
 0x423   :  { %v320_v2 = vsel %vm64_vm0, %v310_v1, -inf }
 0x424   :  { %321 = vmax.xlane.f32.xlu2 %v320_v2 }
 0x428   :  { %357 = vrot.lane.b32.xlu0 %v1362_v22, %s1235_s5 }
 0x430   :  { %429 = vrot.lane.b32.xlu0 %v1359_v18, %s1236_s27 }
 0x438   :  { %586 = vrot.lane.b32.xlu0 %v1362_v22, %s1237_s2 }
 0x440   :  { %427 = vrot.lane.b32.xlu0 %v1362_v22, %s1236_s27 }
 0x448   :  { %423 = vrot.lane.b32.xlu0 %v1362_v22, %s1238_s28 }
 0x450   :  { %425 = vrot.lane.b32.xlu0 %v1359_v18, %s1238_s28 }
 0x47f   :  { %v313_v3 = vpop.xlane.xlu1 %312 }
 0x480   :  { %v323_v4 = vsub.f32 %v307_v53, %v313_v3 }
 0x482   :  { %v327_v6 = vmul.f32 1.442695, %v323_v4 }
 0x484   :  { %1157 = vpow2.f32 %v327_v6 }
 0x487   :  { %v316_v10 = vpop.xlane.xlu0 %315 }
 0x488   :  { %v324_v11 = vsub.f32 %v308_v57, %v316_v10 }
 0x48a   :  { %v1158_v12 = vpop.eup %1157  ;;  %v329_v13 = vmul.f32 1.442695, %v324_v11 }
 0x48b   :  { %v335_v14 = vsel %vm64_vm0, %v1158_v12, 0.0 }
 0x48c   :  { %1159 = vpow2.f32 %v329_v13  ;;  %336 = vadd.xlane.f32.xlu1 %v335_v14 }
 0x48f   :  { %v319_v15 = vpop.xlane.xlu1 %318 }
 0x490   :  { %v325_v16 = vsub.f32 %v309_v61, %v319_v15 }
 0x492   :  { %v1160_v17 = vpop.eup %1159  ;;  %v331_v19 = vmul.f32 1.442695, %v325_v16 }
 0x493   :  { %v338_v20 = vsel %vm64_vm0, %v1160_v17, 0.0 }
 0x494   :  { %1161 = vpow2.f32 %v331_v19  ;;  %339 = vadd.xlane.f32.xlu1 %v338_v20 }
 0x497   :  { %v322_v32 = vpop.xlane.xlu2 %321 }
 0x498   :  { %v326_v34 = vsub.f32 %v310_v1, %v322_v32 }
 0x49a   :  { %v1454_v21 = vpop.eup %1161  ;;  %v358_v23 = vpop.permute.xlu0 %357  ;;  %v333_v35 = vmul.f32 1.442695, %v326_v34 }
 0x49b   :  { %v341_v24 = vsel %vm64_vm0, %v1454_v21, 0.0 }
 0x49c   :  { %342 = vadd.xlane.f32.xlu2 %v341_v24  ;;  %1163 = vpow2.f32 %v333_v35 }
 0x4a2   :  { %v430_v25 = vpop.permute.xlu0 %429  ;;  %v1164_v37 = vpop.eup %1163 }
 0x4a3   :  { %v441_v26 = vsel %vm111_vm1, %v430_v25, 0  ;;  %v344_v39 = vsel %vm64_vm0, %v1164_v37, 0.0 }
 0x4a4   :  { %449 = vmatpush.bf16.xpose.msra.mxu1 %v441_v26 }
 0x4aa   :  { %v587_v27 = vpop.permute.xlu0 %586 }
 0x4ab   :  { %v597_v57 = vsel %vm111_vm1, %v587_v27, 0 }
 0x4ad   :  { %359 = vrot.lane.b32.xlu1 %v1359_v18, %s1235_s5 }
 0x4b2   :  { %v428_v29 = vpop.permute.xlu0 %427 }
 0x4b3   :  { %v438_v30 = vsel %vm111_vm1, %v428_v29, 0 }
 0x4b4   :  { %450 = vmatpush.bf16.xpose.msra.mxu1 %v438_v30  ;;  %588 = vrot.lane.b32.xlu2 %v1359_v18, %s1237_s2 }
 0x4ba   :  { %v424_v31 = vpop.permute.xlu0 %423 }
 0x4bb   :  { %1103 = vmatmul.msk.bf16.vlgmr.msra.gmra.mxu1 %vm111_vm1, %v424_v31 }
 0x4bc   :  { %582 = vrot.lane.b32.xlu2 %v1362_v22, %s1239_s29 }
 0x4c2   :  { %v426_v36 = vpop.permute.xlu0 %425 }
 0x4c4   :  { %584 = vrot.lane.b32.xlu2 %v1359_v18, %s1239_s29 }
 0x4cb   :  { %1104 = vmatmul.msk.bf16.gmra.mxu1 %vm111_vm1, %v426_v36 }
 0x4d7   :  { %345 = vadd.xlane.f32.xlu1 %v344_v39 }
 0x4ff   :  { %v337_v47 = vpop.xlane.xlu1 %336 }
 0x507   :  { %v340_v51 = vpop.xlane.xlu1 %339 }
 0x508   :  { %1165 = vrcp.f32 %v340_v51 }
 0x509   :  { %1167 = vrcp.f32 %v337_v47 }
 0x50e   :  { %v1166_v54 = vpop.eup %1165 }
 0x50f   :  { %v343_v49 = vpop.xlane.xlu2 %342  ;;  %v1168_v56 = vpop.eup %1167  ;;  %v352_v58 = vmul.f32 %v1166_v54, %v1160_v17 }
 0x510   :  { %v351_v59 = vmul.f32 %v1168_v56, %v1158_v12  ;;  %1169 = vrcp.f32 %v343_v49 }
 0x512   :  { %v355_v60 = vpack.c.bf16 %v352_v58, %v351_v59 }
 0x516   :  { %v1170_v14 = vpop.eup %1169 }
 0x517   :  { %v589_v52 = vpop.permute.xlu2 %588  ;;  %v353_v19 = vmul.f32 %v1170_v14, %v1454_v21 }
 0x518   :  { %v600_v53 = vsel %vm111_vm1, %v589_v52, 0  ;;  %v260_v52 = vadd.f32 %v1428_v46, %v1421_v44 }
 0x519   :  { %608 = vmatpush.bf16.xpose.msra.mxu2 %v600_v53 }
 0x51f   :  { %v360_v55 = vpop.permute.xlu1 %359  ;;  %v583_v27 = vpop.permute.xlu2 %582 }
 0x520   :  { %375 = vmatpush.bf16.msrb.mxu0 %v360_v55  ;;  %v261_v55 = vadd.f32 %v1428_v46, %v1423_v45 }
 0x521   :  { %609 = vmatpush.bf16.xpose.msra.mxu2 %v597_v57 }
 0x524   :  { %376 = vmatpush.bf16.msrb.mxu0 %v358_v23 }
 0x527   :  { %1099 = vmatmul.msk.bf16.vlgmr.msrb.gmra.mxu0 %vm64_vm0, %v355_v60  ;;  %v585_v31 = vpop.permute.xlu2 %584 }
 0x538   :  { %v452_v61 = vpop.f32.mrf.mxu1 }
 0x539   :  { %v462_v62 = vmul.f32 0.35355338, %v452_v61 }
 0x53b   :  { %v466_v63 = vadd.f32 %v462_v62, %v1374_v28 }
 0x53d   :  { %v470_v0 = vsel %vm64_vm0, %v466_v63, -inf }
 0x53e   :  { %471 = vmax.xlane.f32.xlu1 %v470_v0 }
 0x540   :  { %v454_v1 = vpop.f32.mrf.mxu1 }
 0x541   :  { %v463_v2 = vmul.f32 0.35355338, %v454_v1 }
 0x543   :  { %v467_v3 = vadd.f32 %v463_v2, %v1381_v33 }
 0x545   :  { %v473_v4 = vsel %vm64_vm0, %v467_v3, -inf }
 0x546   :  { %474 = vmax.xlane.f32.xlu2 %v473_v4 }
 0x548   :  { %v457_v6 = vpop.f32.mrf.mxu1 }
 0x549   :  { %v464_v10 = vmul.f32 0.35355338, %v457_v6 }
 0x54a   :  { %v346_v11 = vpop.xlane.xlu1 %345 }
 0x54b   :  { %1171 = vrcp.f32 %v346_v11  ;;  %v1481_v12 = vadd.f32 %v464_v10, %v1388_v38 }
 0x54d   :  { %v476_v13 = vsel %vm64_vm0, %v1481_v12, -inf }
 0x54e   :  { %477 = vmax.xlane.f32.xlu1 %v476_v13 }
 0x550   :  { %v459_v15 = vpop.f32.mrf.mxu1 }
 0x551   :  { %v1172_v16 = vpop.eup %1171  ;;  %v465_v17 = vmul.f32 0.35355338, %v459_v15 }
 0x552   :  { %v354_v20 = vmul.f32 %v1172_v16, %v1164_v37 }
 0x553   :  { %v1487_v23 = vadd.f32 %v465_v17, %v1395_v43 }
 0x554   :  { %v356_v24 = vpack.c.bf16 %v354_v20, %v353_v19 }
 0x555   :  { %v479_v25 = vsel %vm64_vm0, %v1487_v23, -inf }
 0x556   :  { %480 = vmax.xlane.f32.xlu1 %v479_v25  ;;  %1100 = vmatmul.msk.bf16.gmra.mxu0 %vm64_vm0, %v356_v24 }
 0x5a4   :  { %v378_v26 = vpop.f32.mrf.mxu0 }
 0x5ac   :  { %v380_v29 = vpop.f32.mrf.mxu0 }
 0x5ad   :  { %v388_v30 = vpack.c.bf16 %v380_v29, %v378_v26 }
 0x5af   :  { %1101 = vmatmul.msk.bf16.vlgmr.msrb.gmra.mxu2 %vm111_vm1, %v388_v30 }
 0x5b1   :  { %v472_v32 = vpop.xlane.xlu1 %471 }
 0x5b2   :  { %v482_v21 = vsub.f32 %v466_v63, %v472_v32 }
 0x5b4   :  { %v486_v34 = vmul.f32 1.442695, %v482_v21 }
 0x5b6   :  { %1173 = vpow2.f32 %v486_v34 }
 0x5b9   :  { %v475_v35 = vpop.xlane.xlu2 %474 }
 0x5ba   :  { %v483_v36 = vsub.f32 %v467_v3, %v475_v35 }
 0x5bc   :  { %v1493_v37 = vpop.eup %1173  ;;  %v488_v39 = vmul.f32 1.442695, %v483_v36 }
 0x5bd   :  { %v494_v40 = vsel %vm64_vm0, %v1493_v37, 0.0 }
 0x5be   :  { %1175 = vpow2.f32 %v488_v39  ;;  %495 = vadd.xlane.f32.xlu2 %v494_v40 }
 0x5c1   :  { %v478_v11 = vpop.xlane.xlu1 %477 }
 0x5c2   :  { %v484_v20 = vsub.f32 %v1481_v12, %v478_v11 }
 0x5c4   :  { %v1497_v41 = vpop.eup %1175  ;;  %v490_v25 = vmul.f32 1.442695, %v484_v20  ;;  %v92_v20 = vld [vmem:[%s1718_s4 + $0x10] sm:$0xff] }
 0x5c5   :  { %v497_v42 = vsel %vm64_vm0, %v1497_v41, 0.0 }
 0x5c6   :  { %498 = vadd.xlane.f32.xlu0 %v497_v42 }
 0x5c9   :  { %v481_v13 = vpop.xlane.xlu1 %480 }
 0x5d3   :  { %v383_v47 = vpop.f32.mrf.mxu0 }
 0x5db   :  { %v385_v49 = vpop.f32.mrf.mxu0 }
 0x5dc   :  { %v389_v51 = vpack.c.bf16 %v385_v49, %v383_v47 }
 0x5de   :  { %1102 = vmatmul.msk.bf16.gmra.mxu2 %vm111_vm1, %v389_v51 }
 0x5ee   :  { %1109 = vmatmul.msk.bf16.vlgmr.msra.gmra.mxu2 %vm111_vm1, %v583_v27 }
 0x5fe   :  { %1110 = vmatmul.msk.bf16.gmra.mxu2 %vm111_vm1, %v585_v31 }
 0x632   :  { %v409_v53 = vpop.f32.mrf.mxu2 }
 0x633   :  { %v1506_v54 = vadd.f32 %v409_v53, %v260_v52 }
 0x63a   :  { %v411_v56 = vpop.f32.mrf.mxu2 }
 0x63b   :  { %v1510_v57 = vadd.f32 %v411_v56, %v261_v55  ;;  %v496_v56 = vpop.xlane.xlu2 %495 }
 0x661   :  { %v414_v58 = vpop.f32.mrf.mxu2 }
 0x662   :  { %v1513_v59 = vadd.f32 %v414_v58, %v1431_v48 }
 0x669   :  { %v416_v60 = vpop.f32.mrf.mxu2 }
 0x66a   :  { %v1516_v61 = vadd.f32 %v416_v60, %v1434_v50 }
 0x671   :  { %v611_v62 = vpop.f32.mrf.mxu2 }
 0x672   :  { %v621_v63 = vmul.f32 0.35355338, %v611_v62 }
 0x674   :  { %v625_v44 = vadd.f32 %v621_v63, %v1374_v28 }
 0x676   :  { %v629_v0 = vsel %vm64_vm0, %v625_v44, -inf }
 0x677   :  { %630 = vmax.xlane.f32.xlu0 %v629_v0 }
 0x679   :  { %v613_v1 = vpop.f32.mrf.mxu2 }
 0x67a   :  { %v622_v45 = vmul.f32 0.35355338, %v613_v1 }
 0x67c   :  { %v626_v46 = vadd.f32 %v622_v45, %v1381_v33 }
 0x67e   :  { %v632_v2 = vsel %vm64_vm0, %v626_v46, -inf }
 0x67f   :  { %633 = vmax.xlane.f32.xlu1 %v632_v2 }
 0x681   :  { %v616_v48 = vpop.f32.mrf.mxu2 }
 0x682   :  { %v623_v3 = vmul.f32 0.35355338, %v616_v48 }
 0x684   :  { %v627_v4 = vadd.f32 %v623_v3, %v1388_v38  ;;  %v485_v38 = vsub.f32 %v1487_v23, %v481_v13 }
 0x686   :  { %v635_v50 = vsel %vm64_vm0, %v627_v4, -inf  ;;  %v492_v14 = vmul.f32 1.442695, %v485_v38 }
 0x687   :  { %636 = vmax.xlane.f32.xlu1 %v635_v50 }
 0x688   :  { %1177 = vpow2.f32 %v492_v14 }
 0x689   :  { %v618_v6 = vpop.f32.mrf.mxu2 }
 0x68a   :  { %v624_v10 = vmul.f32 0.35355338, %v618_v6 }
 0x68b   :  { %518 = vrot.lane.b32.xlu0 %v1359_v18, %s1240_s30 }
 0x68c   :  { %v628_v28 = vadd.f32 %v624_v10, %v1395_v43  ;;  %v499_v43 = vpop.xlane.xlu0 %498 }
 0x68e   :  { %v638_v33 = vsel %vm64_vm0, %v628_v28, -inf  ;;  %v1531_v15 = vpop.eup %1177 }
 0x68f   :  { %639 = vmax.xlane.f32.xlu1 %v638_v33  ;;  %v503_v16 = vsel %vm64_vm0, %v1531_v15, 0.0 }
 0x693   :  { %675 = vrot.lane.b32.xlu0 %v1362_v22, %s1241_s15 }
 0x6a8   :  { %677 = vrot.lane.b32.xlu1 %v1359_v18, %s1241_s15 }
 0x6bd   :  { %504 = vadd.xlane.f32.xlu0 %v503_v16 }
 0x6ea   :  { %v631_v17 = vpop.xlane.xlu0 %630 }
 0x6eb   :  { %v641_v19 = vsub.f32 %v625_v44, %v631_v17  ;;  %v93_v17 = vld [vmem:[%s1718_s4 + $0x18] sm:$0xff] }
 0x6ed   :  { %v645_v24 = vmul.f32 1.442695, %v641_v19  ;;  %v708_v19 = vpack.c.bf16 %v93_v17, %v93_v17 }
 0x6ef   :  { %1179 = vpow2.f32 %v645_v24  ;;  %v549_v24 = vpack.c.bf16 %v92_v20, %v92_v20 }
 0x6f0   :  { %1181 = vpow2.f32 %v490_v25 }
 0x6f1   :  { %v557_v25 = vsel %vm237_vm2, %v549_v24, 0 }
 0x6f2   :  { %v634_v26 = vpop.xlane.xlu1 %633  ;;  %566 = vmatpush.bf16.msra.mxu0 %v557_v25  ;;  %v858_v25 = vld [vmem:[%s1723_s8 + $0x10] sm:$0xff] }
 0x6f3   :  { %v642_v18 = vsub.f32 %v626_v46, %v634_v26 }
 0x6f5   :  { %v1180_v27 = vpop.eup %1179  ;;  %v647_v23 = vmul.f32 1.442695, %v642_v18 }
 0x6f6   :  { %v653_v29 = vsel %vm64_vm0, %v1180_v27, 0.0  ;;  %v1182_v31 = vpop.eup %1181 }
 0x6f7   :  { %1183 = vpow2.f32 %v647_v23  ;;  %654 = vadd.xlane.f32.xlu1 %v653_v29  ;;  %v500_v12 = vsel %vm64_vm0, %v1182_v31, 0.0 }
 0x6fa   :  { %v637_v30 = vpop.xlane.xlu1 %636 }
 0x6fb   :  { %v643_v51 = vsub.f32 %v627_v4, %v637_v30 }
 0x6fd   :  { %v1184_v32 = vpop.eup %1183  ;;  %v519_v21 = vpop.permute.xlu0 %518  ;;  %v649_v52 = vmul.f32 1.442695, %v643_v51 }
 0x6fe   :  { %534 = vmatpush.bf16.msra.mxu3 %v519_v21  ;;  %v656_v34 = vsel %vm64_vm0, %v1184_v32, 0.0 }
 0x6ff   :  { %657 = vadd.xlane.f32.xlu2 %v656_v34  ;;  %501 = vadd.xlane.f32.xlu1 %v500_v12 }
 0x702   :  { %v640_v35 = vpop.xlane.xlu1 %639 }
 0x703   :  { %v644_v36 = vsub.f32 %v628_v28, %v640_v35 }
 0x705   :  { %v651_v39 = vmul.f32 1.442695, %v644_v36  ;;  %v676_v49 = vpop.permute.xlu0 %675 }
 0x707   :  { %1185 = vpow2.f32 %v651_v39 }
 0x708   :  { %1187 = vpow2.f32 %v649_v52 }
 0x709   :  { %1189 = vrcp.f32 %v499_v43 }
 0x70a   :  { %1191 = vrcp.f32 %v496_v56 }
 0x70d   :  { %v1186_v40 = vpop.eup %1185 }
 0x70e   :  { %v662_v42 = vsel %vm64_vm0, %v1186_v40, 0.0  ;;  %v1188_v53 = vpop.eup %1187 }
 0x70f   :  { %663 = vadd.xlane.f32.xlu1 %v662_v42  ;;  %v659_v55 = vsel %vm64_vm0, %v1188_v53, 0.0  ;;  %v1190_v62 = vpop.eup %1189 }
 0x710   :  { %v511_v44 = vmul.f32 %v1190_v62, %v1497_v41 }
 0x717   :  { %516 = vrot.lane.b32.xlu2 %v1362_v22, %s1240_s30  ;;  %v1192_v22 = vpop.eup %1191 }
 0x718   :  { %v510_v1 = vmul.f32 %v1192_v22, %v1493_v37 }
 0x71a   :  { %v678_v47 = vpop.permute.xlu1 %677  ;;  %v514_v48 = vpack.c.bf16 %v511_v44, %v510_v1 }
 0x71b   :  { %693 = vmatpush.bf16.msrb.mxu1 %v678_v47 }
 0x71f   :  { %694 = vmatpush.bf16.msrb.mxu1 %v676_v49 }
 0x730   :  { %v505_v50 = vpop.xlane.xlu0 %504 }
 0x740   :  { %660 = vadd.xlane.f32.xlu2 %v659_v55 }
 0x76a   :  { %v655_v58 = vpop.xlane.xlu1 %654 }
 0x76b   :  { %1193 = vrcp.f32 %v655_v58 }
 0x771   :  { %v1194_v63 = vpop.eup %1193 }
 0x772   :  { %v658_v60 = vpop.xlane.xlu2 %657  ;;  %v669_v46 = vmul.f32 %v1194_v63, %v1180_v27  ;;  %v502_v3 = vpop.xlane.xlu1 %501 }
 0x773   :  { %1195 = vrcp.f32 %v658_v60 }
 0x774   :  { %1197 = vrcp.f32 %v502_v3 }
 0x775   :  { %1199 = vrcp.f32 %v505_v50 }
 0x779   :  { %v1196_v0 = vpop.eup %1195 }
 0x77a   :  { %v517_v45 = vpop.permute.xlu2 %516  ;;  %v670_v2 = vmul.f32 %v1196_v0, %v1184_v32  ;;  %v1198_v6 = vpop.eup %1197 }
 0x77b   :  { %535 = vmatpush.bf16.msra.mxu3 %v517_v45  ;;  %v1200_v10 = vpop.eup %1199  ;;  %v512_v41 = vmul.f32 %v1198_v6, %v1182_v31 }
 0x77c   :  { %v673_v4 = vpack.c.bf16 %v670_v2, %v669_v46  ;;  %v513_v28 = vmul.f32 %v1200_v10, %v1531_v15  ;;  %v716_v15 = vsel %vm237_vm2, %v708_v19, 0  ;;  %v1242_v46 = vmov 32.0  }
 0x77e   :  { %1105 = vmatmul.msk.bf16.vlgmr.msra.gmra.mxu3 %vm64_vm0, %v514_v48  ;;  %1111 = vmatmul.msk.bf16.vlgmr.msrb.gmra.mxu1 %vm64_vm0, %v673_v4  ;;  %v515_v37 = vpack.c.bf16 %v513_v28, %v512_v41 }
 0x77f   :  { %725 = vmatpush.bf16.msrb.mxu3 %v716_v15 }
 0x782   :  { %v664_v33 = vpop.xlane.xlu1 %663 }
 0x783   :  { %1201 = vrcp.f32 %v664_v33 }
 0x789   :  { %v1202_v13 = vpop.eup %1201 }
 0x78a   :  { %v672_v16 = vmul.f32 %v1202_v13, %v1186_v40 }
 0x78e   :  { %1106 = vmatmul.msk.bf16.gmra.mxu3 %vm64_vm0, %v515_v37 }
 0x7b3   :  { %v661_v11 = vpop.xlane.xlu2 %660 }
 0x7b4   :  { %1203 = vrcp.f32 %v661_v11 }
 0x7b5   :  { %1205 = vrcp.f32 %v1242_v46 }
 0x7ba   :  { %v1204_v38 = vpop.eup %1203 }
 0x7bb   :  { %v671_v14 = vmul.f32 %v1204_v38, %v1188_v53 }
 0x7bd   :  { %v674_v43 = vpack.c.bf16 %v672_v16, %v671_v14 }
 0x7bf   :  { %1112 = vmatmul.msk.bf16.gmra.mxu1 %vm64_vm0, %v674_v43 }
 0x7fb   :  { %v696_v26 = vpop.f32.mrf.mxu1 }
 0x801   :  { %v537_v18 = vpop.f32.mrf.mxu3 }
 0x803   :  { %v698_v27 = vpop.f32.mrf.mxu1 }
 0x804   :  { %v706_v23 = vpack.c.bf16 %v698_v27, %v696_v26  ;;  %v859_v26 = vld [vmem:[%s1723_s8 + $0x18] sm:$0xff] }
 0x806   :  { %1113 = vmatmul.msk.bf16.vlgmr.msrb.gmra.mxu3 %vm111_vm1, %v706_v23 }
 0x809   :  { %v539_v29 = vpop.f32.mrf.mxu3 }
 0x80a   :  { %v547_v30 = vpack.c.bf16 %v539_v29, %v537_v18  ;;  %v863_v18 = vpack.c.bf16 %v859_v26, %v858_v25  ;;  %v856_v29 = vld [vmem:[%s1723_s8] sm:$0xff]  ;;  %v936_v26 = vld [vmem:[%s1725_s10 + $0x38] sm:$0xff] }
 0x80c   :  { %1107 = vmatmul.msk.bf16.vlgmr.msra.gmra.mxu0 %vm111_vm1, %v547_v30  ;;  %v857_v30 = vld [vmem:[%s1723_s8 + $0x8] sm:$0xff] }
 0x80d   :  { %880 = vmatpush.bf16.msrb.mxu0 %v863_v18 }
 0x811   :  { %v542_v31 = vpop.f32.mrf.mxu3 }
 0x819   :  { %v544_v32 = vpop.f32.mrf.mxu3 }
 0x81a   :  { %v548_v21 = vpack.c.bf16 %v544_v32, %v542_v31  ;;  %v862_v32 = vpack.c.bf16 %v857_v30, %v856_v29  ;;  %v931_v29 = vld [vmem:[%s1725_s10 + $0x10] sm:$0xff]  ;;  %v932_v30 = vld [vmem:[%s1725_s10 + $0x18] sm:$0xff] }
 0x81c   :  { %1108 = vmatmul.msk.bf16.gmra.mxu0 %vm111_vm1, %v548_v21 }
 0x81d   :  { %881 = vmatpush.bf16.msrb.mxu0 %v862_v32  ;;  %v1137_v32 = vld [vmem:[%s1722_s9] ss:$0 sm:$0xff] }
 0x83c   :  { %v701_v34 = vpop.f32.mrf.mxu1 }
 0x844   :  { %v703_v12 = vpop.f32.mrf.mxu1 }
 0x845   :  { %v707_v35 = vpack.c.bf16 %v703_v12, %v701_v34 }
 0x847   :  { %1114 = vmatmul.msk.bf16.gmra.mxu3 %vm111_vm1, %v707_v35  ;;  %vm947_vm1 = vcmask 523264  }
 0x889   :  { %v568_v36 = vpop.f32.mrf.mxu0  ;;  %v727_v40 = vpop.f32.mrf.mxu3 }
 0x88a   :  { %v578_v39 = vadd.f32 %v568_v36, %v1506_v54 }
 0x88c   :  { %v737_v42 = vadd.f32 %v727_v40, %v578_v39 }
 0x88e   :  { %v741_v47 = vadd.f32 %v737_v42, %v1333_v5 }
 0x890   :  { %v747_v49 = vsel %vm64_vm0, %v741_v47, 0.0 }
 0x891   :  { %v570_v51 = vpop.f32.mrf.mxu0  ;;  %748 = vadd.xlane.f32.xlu0 %v747_v49  ;;  %v729_v53 = vpop.f32.mrf.mxu3 }
 0x892   :  { %v579_v52 = vadd.f32 %v570_v51, %v1510_v57 }
 0x894   :  { %v738_v55 = vadd.f32 %v729_v53, %v579_v52 }
 0x896   :  { %v742_v56 = vadd.f32 %v738_v55, %v1338_v7 }
 0x898   :  { %v750_v58 = vsel %vm64_vm0, %v742_v56, 0.0 }
 0x899   :  { %751 = vadd.xlane.f32.xlu2 %v750_v58  ;;  %v573_v60 = vpop.f32.mrf.mxu0  ;;  %v1135_v58 = vld [vmem:[%s1720_s6] ss:$0 sm:$0xff] }
 0x89a   :  { %v580_v54 = vadd.f32 %v573_v60, %v1513_v59  ;;  %v1206_v59 = vpop.eup %1205 }
 0x89b   :  { %v760_v2 = vmul.f32 32.0, %v1206_v59  ;;  %vm764_vm3 = vweird.f32 %v1206_v59 }
 0x89d   :  { %v761_v48 = vsub.f32 1.0, %v760_v2 }
 0x89f   :  { %v762_v3 = vmul.f32 %v1206_v59, %v761_v48 }
 0x8a1   :  { %v575_v63 = vpop.f32.mrf.mxu0 }
 0x8a2   :  { %v581_v57 = vadd.f32 %v575_v63, %v1516_v61 }
 0x8ca   :  { %v732_v62 = vpop.f32.mrf.mxu3 }
 0x8cb   :  { %v739_v22 = vadd.f32 %v732_v62, %v580_v54 }
 0x8cd   :  { %v743_v5 = vadd.f32 %v739_v22, %v1343_v8  ;;  %v763_v8 = vadd.f32 %v1206_v59, %v762_v3  ;;  %v1136_v22 = vld [vmem:[%s1721_s7] ss:$0 sm:$0xff] }
 0x8cf   :  { %v753_v44 = vsel %vm64_vm0, %v743_v5, 0.0  ;;  %v1574_v4 = vsel %vm764_vm3, %v1206_v59, %v763_v8 }
 0x8d0   :  { %754 = vadd.xlane.f32.xlu1 %v753_v44 }
 0x8d2   :  { %v734_v0 = vpop.f32.mrf.mxu3 }
 0x8d3   :  { %v740_v1 = vadd.f32 %v734_v0, %v581_v57 }
 0x8d5   :  { %v744_v7 = vadd.f32 %v740_v1, %v1348_v9 }
 0x8d7   :  { %v756_v45 = vsel %vm64_vm0, %v744_v7, 0.0 }
 0x8d8   :  { %757 = vadd.xlane.f32.xlu0 %v756_v45 }
 0x904   :  { %v749_v50 = vpop.xlane.xlu0 %748 }
 0x905   :  { %v766_v61 = vmul.f32 %v1574_v4, %v749_v50 }
 0x907   :  { %v770_v6 = vsub.f32 %v741_v47, %v766_v61 }
 0x909   :  { %v774_v10 = vmul.f32 %v770_v6, %v770_v6 }
 0x90b   :  { %v778_v9 = vsel %vm64_vm0, %v774_v10, 0.0 }
 0x90c   :  { %779 = vadd.xlane.f32.xlu2 %v778_v9  ;;  %v752_v41 = vpop.xlane.xlu2 %751 }
 0x90d   :  { %v767_v28 = vmul.f32 %v1574_v4, %v752_v41 }
 0x90f   :  { %v771_v37 = vsub.f32 %v742_v56, %v767_v28 }
 0x911   :  { %v775_v33 = vmul.f32 %v771_v37, %v771_v37 }
 0x913   :  { %v781_v11 = vsel %vm64_vm0, %v775_v33, 0.0 }
 0x914   :  { %782 = vadd.xlane.f32.xlu1 %v781_v11 }
 0x943   :  { %v755_v13 = vpop.xlane.xlu1 %754 }
 0x944   :  { %v768_v38 = vmul.f32 %v1574_v4, %v755_v13 }
 0x946   :  { %v1581_v14 = vsub.f32 %v743_v5, %v768_v38 }
 0x948   :  { %v776_v16 = vmul.f32 %v1581_v14, %v1581_v14 }
 0x94a   :  { %v784_v43 = vsel %vm64_vm0, %v776_v16, 0.0 }
 0x94b   :  { %785 = vadd.xlane.f32.xlu0 %v784_v43  ;;  %v758_v17 = vpop.xlane.xlu0 %757 }
 0x94c   :  { %v769_v19 = vmul.f32 %v1574_v4, %v758_v17 }
 0x94e   :  { %v1587_v15 = vsub.f32 %v744_v7, %v769_v19 }
 0x950   :  { %v777_v20 = vmul.f32 %v1587_v15, %v1587_v15 }
 0x952   :  { %v787_v24 = vsel %vm64_vm0, %v777_v20, 0.0 }
 0x953   :  { %788 = vadd.xlane.f32.xlu2 %v787_v24 }
 0x97f   :  { %v780_v27 = vpop.xlane.xlu2 %779 }
 0x980   :  { %v790_v23 = vmul.f32 %v780_v27, %v1574_v4  ;;  %v934_v27 = vld [vmem:[%s1725_s10 + $0x28] sm:$0xff] }
 0x982   :  { %v794_v31 = vadd.f32 1e-05, %v790_v23 }
 0x984   :  { %1207 = vrsqrt.f32 %v794_v31  ;;  %vm804_vm5 = vweird.f32 %v794_v31 }
 0x987   :  { %v783_v21 = vpop.xlane.xlu1 %782 }
 0x988   :  { %v791_v34 = vmul.f32 %v783_v21, %v1574_v4  ;;  %v929_v21 = vld [vmem:[%s1725_s10] sm:$0xff] }
 0x98a   :  { %v1208_v12 = vpop.eup %1207  ;;  %v795_v35 = vadd.f32 1e-05, %v791_v34  ;;  %v930_v34 = vld [vmem:[%s1725_s10 + $0x8] sm:$0xff] }
 0x98b   :  { %v799_v36 = vmul.f32 %v1208_v12, %v794_v31  ;;  %vm805_vm4 = vweird.f32 %v1208_v12  ;;  %v940_v31 = vpack.c.bf16 %v932_v30, %v931_v29 }
 0x98c   :  { %1209 = vrsqrt.f32 %v795_v35  ;;  %vm806_vm6 = vmor %vm804_vm5, %vm805_vm4  ;;  %vm814_vm8 = vweird.f32 %v795_v35 }
 0x98d   :  { %v800_v39 = vmul.f32 %v1208_v12, %v799_v36 }
 0x98f   :  { %v801_v40 = vmul.f32 0.5, %v800_v39 }
 0x991   :  { %v802_v42 = vsub.f32 1.5, %v801_v40 }
 0x992   :  { %v1210_v47 = vpop.eup %1209 }
 0x993   :  { %v803_v49 = vmul.f32 %v1208_v12, %v802_v42  ;;  %v809_v51 = vmul.f32 %v1210_v47, %v795_v35  ;;  %vm815_vm7 = vweird.f32 %v1210_v47  ;;  %v939_v35 = vpack.c.bf16 %v930_v34, %v929_v21 }
 0x994   :  { %vm816_vm9 = vmor %vm814_vm8, %vm815_vm7 }
 0x995   :  { %v810_v52 = vmul.f32 %v1210_v47, %v809_v51  ;;  %v807_v53 = vsel %vm806_vm6, %v1208_v12, %v803_v49 }
 0x996   :  { %v838_v60 = vmul.f32 %v807_v53, %v770_v6 }
 0x997   :  { %v811_v55 = vmul.f32 0.5, %v810_v52 }
 0x998   :  { %v845_v5 = vmul.f32 %v1135_v58, %v838_v60 }
 0x999   :  { %v812_v56 = vsub.f32 1.5, %v811_v55 }
 0x99a   :  { %v1612_v57 = vadd.f32 %v1136_v22, %v845_v5 }
 0x99b   :  { %v813_v54 = vmul.f32 %v1210_v47, %v812_v56 }
 0x99d   :  { %v817_v62 = vsel %vm816_vm9, %v1210_v47, %v813_v54 }
 0x99e   :  { %v839_v63 = vmul.f32 %v817_v62, %v771_v37 }
 0x9a0   :  { %v846_v44 = vmul.f32 %v1135_v58, %v839_v63 }
 0x9a2   :  { %v1614_v0 = vadd.f32 %v1136_v22, %v846_v44 }
 0x9a4   :  { %v860_v1 = vpack.c.bf16 %v1614_v0, %v1612_v57 }
 0x9a6   :  { %1115 = vmatmul.msk.bf16.vlgmr.msrb.gmra.mxu0 %vm64_vm0, %v860_v1 }
 0x9be   :  { %v786_v7 = vpop.xlane.xlu0 %785 }
 0x9bf   :  { %v792_v45 = vmul.f32 %v786_v7, %v1574_v4 }
 0x9c1   :  { %v796_v46 = vadd.f32 1e-05, %v792_v45 }
 0x9c3   :  { %1211 = vrsqrt.f32 %v796_v46  ;;  %vm824_vm11 = vweird.f32 %v796_v46 }
 0x9c6   :  { %v789_v59 = vpop.xlane.xlu2 %788 }
 0x9c7   :  { %v793_v2 = vmul.f32 %v789_v59, %v1574_v4 }
 0x9c9   :  { %v1212_v48 = vpop.eup %1211  ;;  %v797_v3 = vadd.f32 1e-05, %v793_v2 }
 0x9ca   :  { %v819_v8 = vmul.f32 %v1212_v48, %v796_v46  ;;  %vm825_vm10 = vweird.f32 %v1212_v48 }
 0x9cb   :  { %1213 = vrsqrt.f32 %v797_v3  ;;  %vm826_vm12 = vmor %vm824_vm11, %vm825_vm10  ;;  %vm834_vm14 = vweird.f32 %v797_v3 }
 0x9cc   :  { %v820_v50 = vmul.f32 %v1212_v48, %v819_v8 }
 0x9ce   :  { %v821_v61 = vmul.f32 0.5, %v820_v50 }
 0x9d0   :  { %v822_v6 = vsub.f32 1.5, %v821_v61 }
 0x9d1   :  { %v1214_v10 = vpop.eup %1213 }
 0x9d2   :  { %v823_v9 = vmul.f32 %v1212_v48, %v822_v6  ;;  %v829_v41 = vmul.f32 %v1214_v10, %v797_v3  ;;  %vm835_vm13 = vweird.f32 %v1214_v10 }
 0x9d3   :  { %vm836_vm15 = vmor %vm834_vm14, %vm835_vm13 }
 0x9d4   :  { %v827_v28 = vsel %vm826_vm12, %v1212_v48, %v823_v9  ;;  %v830_v37 = vmul.f32 %v1214_v10, %v829_v41 }
 0x9d5   :  { %v840_v33 = vmul.f32 %v827_v28, %v1581_v14  ;;  %v935_v14 = vld [vmem:[%s1725_s10 + $0x30] sm:$0xff] }
 0x9d6   :  { %v831_v11 = vmul.f32 0.5, %v830_v37  ;;  %v942_v18 = vpack.c.bf16 %v936_v26, %v935_v14  ;;  %v1138_v14 = vld [vmem:[%s1724_s11] ss:$0 sm:$0xff] }
 0x9d7   :  { %v847_v13 = vmul.f32 %v1135_v58, %v840_v33 }
 0x9d8   :  { %v832_v38 = vsub.f32 1.5, %v831_v11  ;;  %958 = vmatpush.bf16.msrb.mxu2 %v942_v18 }
 0x9d9   :  { %v1622_v16 = vadd.f32 %v1136_v22, %v847_v13 }
 0x9da   :  { %v833_v43 = vmul.f32 %v1214_v10, %v832_v38 }
 0x9dc   :  { %v837_v17 = vsel %vm836_vm15, %v1214_v10, %v833_v43 }
 0x9dd   :  { %v841_v19 = vmul.f32 %v837_v17, %v1587_v15  ;;  %v933_v15 = vld [vmem:[%s1725_s10 + $0x20] sm:$0xff] }
 0x9de   :  { %v941_v23 = vpack.c.bf16 %v934_v27, %v933_v15 }
 0x9df   :  { %v848_v20 = vmul.f32 %v1135_v58, %v841_v19 }
 0x9e0   :  { %959 = vmatpush.bf16.msrb.mxu2 %v941_v23 }
 0x9e1   :  { %v1625_v24 = vadd.f32 %v1136_v22, %v848_v20 }
 0x9e3   :  { %v861_v25 = vpack.c.bf16 %v1625_v24, %v1622_v16 }
 0x9e4   :  { %960 = vmatpush.bf16.msrb.mxu2 %v940_v31 }
 0x9e5   :  { %1116 = vmatmul.msk.bf16.gmra.mxu0 %vm64_vm0, %v861_v25 }
 0x9e8   :  { %961 = vmatpush.bf16.msrb.mxu2 %v939_v35 }
 0xa23   :  { %v883_v12 = vpop.f32.mrf.mxu0 }
 0xa24   :  { %v884_v36 = vadd.f32 %v1137_v32, %v883_v12 }
 0xa26   :  { %v893_v39 = vmul.f32 %v884_v36, %v884_v36 }
 0xa28   :  { %v897_v40 = vmul.f32 %v893_v39, %v884_v36 }
 0xa2a   :  { %v901_v42 = vmul.f32 0.044715, %v897_v40 }
 0xa2b   :  { %v885_v47 = vpop.f32.mrf.mxu0 }
 0xa2c   :  { %v905_v49 = vadd.f32 %v901_v42, %v884_v36  ;;  %v886_v51 = vadd.f32 %v1137_v32, %v885_v47 }
 0xa2e   :  { %v909_v52 = vmul.f32 0.7978846, %v905_v49  ;;  %v894_v53 = vmul.f32 %v886_v51, %v886_v51 }
 0xa30   :  { %v898_v55 = vmul.f32 %v894_v53, %v886_v51  ;;  %1215 = vtanh.f32 %v909_v52 }
 0xa32   :  { %v902_v56 = vmul.f32 0.044715, %v898_v55 }
 0xa34   :  { %v906_v58 = vadd.f32 %v902_v56, %v886_v51 }
 0xa36   :  { %v910_v60 = vmul.f32 0.7978846, %v906_v58  ;;  %v1216_v54 = vpop.eup %1215 }
 0xa37   :  { %v917_v62 = vadd.f32 1.0, %v1216_v54 }
 0xa38   :  { %1217 = vtanh.f32 %v910_v60 }
 0xa39   :  { %v921_v5 = vmul.f32 0.5, %v917_v62 }
 0xa3b   :  { %v925_v1 = vmul.f32 %v921_v5, %v884_v36 }
 0xa3e   :  { %v1218_v22 = vpop.eup %1217 }
 0xa3f   :  { %v918_v63 = vadd.f32 1.0, %v1218_v22 }
 0xa41   :  { %v922_v44 = vmul.f32 0.5, %v918_v63 }
 0xa43   :  { %v926_v7 = vmul.f32 %v922_v44, %v886_v51 }
 0xa45   :  { %v937_v45 = vpack.c.bf16 %v926_v7, %v925_v1 }
 0xa47   :  { %1117 = vmatmul.msk.bf16.vlgmr.msrb.gmra.mxu2 %vm947_vm1, %v937_v45 }
 0xa62   :  { %v888_v46 = vpop.f32.mrf.mxu0 }
 0xa63   :  { %v889_v59 = vadd.f32 %v1137_v32, %v888_v46 }
 0xa65   :  { %v895_v2 = vmul.f32 %v889_v59, %v889_v59 }
 0xa67   :  { %v899_v48 = vmul.f32 %v895_v2, %v889_v59 }
 0xa69   :  { %v903_v3 = vmul.f32 0.044715, %v899_v48 }
 0xa6a   :  { %v890_v8 = vpop.f32.mrf.mxu0 }
 0xa6b   :  { %v907_v50 = vadd.f32 %v903_v3, %v889_v59  ;;  %v891_v61 = vadd.f32 %v1137_v32, %v890_v8 }
 0xa6d   :  { %v911_v6 = vmul.f32 0.7978846, %v907_v50  ;;  %v896_v10 = vmul.f32 %v891_v61, %v891_v61 }
 0xa6f   :  { %v900_v9 = vmul.f32 %v896_v10, %v891_v61  ;;  %1219 = vtanh.f32 %v911_v6 }
 0xa71   :  { %v904_v41 = vmul.f32 0.044715, %v900_v9 }
 0xa73   :  { %v908_v28 = vadd.f32 %v904_v41, %v891_v61  ;;  %v1139_v41 = vld [vmem:[%s1726_s12] ss:$0 sm:$0xff] }
 0xa75   :  { %v912_v37 = vmul.f32 0.7978846, %v908_v28  ;;  %v1220_v33 = vpop.eup %1219 }
 0xa76   :  { %v919_v11 = vadd.f32 1.0, %v1220_v33  ;;  %v1140_v33 = vld [vmem:[%s1727_s13] ss:$0 sm:$0xff] }
 0xa77   :  { %1221 = vtanh.f32 %v912_v37 }
 0xa78   :  { %v923_v43 = vmul.f32 0.5, %v919_v11 }
 0xa7a   :  { %v927_v19 = vmul.f32 %v923_v43, %v889_v59 }
 0xa7d   :  { %v1222_v13 = vpop.eup %1221 }
 0xa7e   :  { %v920_v38 = vadd.f32 1.0, %v1222_v13 }
 0xa80   :  { %v924_v17 = vmul.f32 0.5, %v920_v38 }
 0xa82   :  { %v928_v20 = vmul.f32 %v924_v17, %v891_v61 }
 0xa84   :  { %v938_v25 = vpack.c.bf16 %v928_v20, %v927_v19 }
 0xa86   :  { %1118 = vmatmul.msk.bf16.gmra.mxu2 %vm947_vm1, %v938_v25 }
 0xaca   :  { %v963_v26 = vpop.f32.mrf.mxu2 }
 0xacb   :  { %v964_v18 = vadd.f32 %v1138_v14, %v963_v26 }
 0xacd   :  { %v973_v15 = vadd.f32 %v964_v18, %v1612_v57 }
 0xacf   :  { %v979_v27 = vsel %vm64_vm0, %v973_v15, 0.0 }
 0xad0   :  { %980 = vadd.xlane.f32.xlu1 %v979_v27 }
 0xad2   :  { %v965_v23 = vpop.f32.mrf.mxu2 }
 0xad3   :  { %v966_v29 = vadd.f32 %v1138_v14, %v965_v23 }
 0xad5   :  { %v974_v30 = vadd.f32 %v966_v29, %v1614_v0 }
 0xad7   :  { %v982_v31 = vsel %vm64_vm0, %v974_v30, 0.0 }
 0xad8   :  { %983 = vadd.xlane.f32.xlu0 %v982_v31 }
 0xb09   :  { %v968_v32 = vpop.f32.mrf.mxu2 }
 0xb0a   :  { %v969_v21 = vadd.f32 %v1138_v14, %v968_v32 }
 0xb0c   :  { %v975_v34 = vadd.f32 %v969_v21, %v1622_v16 }
 0xb0e   :  { %v985_v12 = vsel %vm64_vm0, %v975_v34, 0.0 }
 0xb0f   :  { %986 = vadd.xlane.f32.xlu2 %v985_v12 }
 0xb11   :  { %v970_v35 = vpop.f32.mrf.mxu2 }
 0xb12   :  { %v971_v36 = vadd.f32 %v1138_v14, %v970_v35 }
 0xb14   :  { %v976_v57 = vadd.f32 %v971_v36, %v1625_v24 }
 0xb16   :  { %v988_v39 = vsel %vm64_vm0, %v976_v57, 0.0 }
 0xb17   :  { %989 = vadd.xlane.f32.xlu1 %v988_v39 }
 0xb43   :  { %v981_v40 = vpop.xlane.xlu1 %980 }
 0xb44   :  { %v991_v0 = vmul.f32 %v981_v40, %v1574_v4 }
 0xb46   :  { %v995_v42 = vsub.f32 %v973_v15, %v991_v0 }
 0xb48   :  { %v999_v47 = vmul.f32 %v995_v42, %v995_v42 }
 0xb4a   :  { %v1003_v49 = vsel %vm64_vm0, %v999_v47, 0.0 }
 0xb4b   :  { %v984_v51 = vpop.xlane.xlu0 %983  ;;  %1004 = vadd.xlane.f32.xlu0 %v1003_v49 }
 0xb4c   :  { %v992_v16 = vmul.f32 %v984_v51, %v1574_v4 }
 0xb4e   :  { %v996_v52 = vsub.f32 %v974_v30, %v992_v16 }
 0xb50   :  { %v1000_v53 = vmul.f32 %v996_v52, %v996_v52 }
 0xb52   :  { %v1006_v55 = vsel %vm64_vm0, %v1000_v53, 0.0 }
 0xb53   :  { %1007 = vadd.xlane.f32.xlu2 %v1006_v55 }
 0xb82   :  { %v987_v24 = vpop.xlane.xlu2 %986 }
 0xb83   :  { %v993_v56 = vmul.f32 %v987_v24, %v1574_v4 }
 0xb85   :  { %v1675_v58 = vsub.f32 %v975_v34, %v993_v56 }
 0xb87   :  { %v1001_v60 = vmul.f32 %v1675_v58, %v1675_v58 }
 0xb89   :  { %v1009_v54 = vsel %vm64_vm0, %v1001_v60, 0.0 }
 0xb8a   :  { %v990_v62 = vpop.xlane.xlu1 %989  ;;  %1010 = vadd.xlane.f32.xlu1 %v1009_v54 }
 0xb8b   :  { %v994_v22 = vmul.f32 %v990_v62, %v1574_v4 }
 0xb8d   :  { %v1681_v5 = vsub.f32 %v976_v57, %v994_v22 }
 0xb8f   :  { %v1002_v63 = vmul.f32 %v1681_v5, %v1681_v5 }
 0xb91   :  { %v1012_v44 = vsel %vm64_vm0, %v1002_v63, 0.0 }
 0xb92   :  { %1013 = vadd.xlane.f32.xlu0 %v1012_v44 }
 0xbbe   :  { %v1005_v1 = vpop.xlane.xlu0 %1004 }
 0xbbf   :  { %v1015_v7 = vmul.f32 %v1005_v1, %v1574_v4 }
 0xbc1   :  { %v1019_v45 = vadd.f32 1e-05, %v1015_v7 }
 0xbc3   :  { %1223 = vrsqrt.f32 %v1019_v45  ;;  %vm1029_vm3 = vweird.f32 %v1019_v45 }
 0xbc6   :  { %v1008_v46 = vpop.xlane.xlu2 %1007 }
 0xbc7   :  { %v1016_v59 = vmul.f32 %v1008_v46, %v1574_v4 }
 0xbc9   :  { %v1224_v2 = vpop.eup %1223  ;;  %v1020_v48 = vadd.f32 1e-05, %v1016_v59 }
 0xbca   :  { %v1024_v3 = vmul.f32 %v1224_v2, %v1019_v45  ;;  %vm1030_vm2 = vweird.f32 %v1224_v2 }
 0xbcb   :  { %1225 = vrsqrt.f32 %v1020_v48  ;;  %vm1031_vm4 = vmor %vm1029_vm3, %vm1030_vm2  ;;  %vm1039_vm6 = vweird.f32 %v1020_v48 }
 0xbcc   :  { %v1025_v8 = vmul.f32 %v1224_v2, %v1024_v3 }
 0xbce   :  { %v1026_v50 = vmul.f32 0.5, %v1025_v8 }
 0xbd0   :  { %v1027_v61 = vsub.f32 1.5, %v1026_v50 }
 0xbd1   :  { %v1226_v6 = vpop.eup %1225 }
 0xbd2   :  { %v1028_v10 = vmul.f32 %v1224_v2, %v1027_v61  ;;  %v1034_v9 = vmul.f32 %v1226_v6, %v1020_v48  ;;  %vm1040_vm5 = vweird.f32 %v1226_v6 }
 0xbd3   :  { %vm1041_vm7 = vmor %vm1039_vm6, %vm1040_vm5 }
 0xbd4   :  { %v1032_v28 = vsel %vm1031_vm4, %v1224_v2, %v1028_v10  ;;  %v1035_v37 = vmul.f32 %v1226_v6, %v1034_v9 }
 0xbd5   :  { %v1063_v11 = vmul.f32 %v1032_v28, %v995_v42 }
 0xbd6   :  { %v1036_v13 = vmul.f32 0.5, %v1035_v37 }
 0xbd7   :  { %v1070_v38 = vmul.f32 %v1139_v41, %v1063_v11 }
 0xbd8   :  { %v1037_v43 = vsub.f32 1.5, %v1036_v13 }
 0xbd9   :  { %v1077_v17 = vadd.f32 %v1140_v33, %v1070_v38 }
 0xbda   :  { %v1038_v19 = vmul.f32 %v1226_v6, %v1037_v43 }
 0xbdb   :  { %1081 = vst.msk [vmem:[%s1728_s14] sm:$0xff] %vm64_vm0, %v1077_v17 }
 0xbdc   :  { %v1042_v20 = vsel %vm1041_vm7, %v1226_v6, %v1038_v19 }
 0xbdd   :  { %v1064_v25 = vmul.f32 %v1042_v20, %v996_v52 }
 0xbdf   :  { %v1071_v14 = vmul.f32 %v1139_v41, %v1064_v25 }
 0xbe1   :  { %v1078_v26 = vadd.f32 %v1140_v33, %v1071_v14 }
 0xbe3   :  { %1082 = vst.msk [vmem:[%s1728_s14 + $0x8] sm:$0xff] %vm64_vm0, %v1078_v26 }
 0xbfd   :  { %v1011_v18 = vpop.xlane.xlu1 %1010 }
 0xbfe   :  { %v1017_v15 = vmul.f32 %v1011_v18, %v1574_v4 }
 0xc00   :  { %v1021_v27 = vadd.f32 1e-05, %v1017_v15 }
 0xc02   :  { %1227 = vrsqrt.f32 %v1021_v27  ;;  %vm1049_vm9 = vweird.f32 %v1021_v27 }
 0xc05   :  { %v1014_v23 = vpop.xlane.xlu0 %1013 }
 0xc06   :  { %v1018_v29 = vmul.f32 %v1014_v23, %v1574_v4 }
 0xc08   :  { %v1228_v30 = vpop.eup %1227  ;;  %v1022_v31 = vadd.f32 1e-05, %v1018_v29 }
 0xc09   :  { %v1044_v32 = vmul.f32 %v1228_v30, %v1021_v27  ;;  %vm1050_vm8 = vweird.f32 %v1228_v30 }
 0xc0a   :  { %1229 = vrsqrt.f32 %v1022_v31  ;;  %vm1051_vm10 = vmor %vm1049_vm9, %vm1050_vm8  ;;  %vm1059_vm12 = vweird.f32 %v1022_v31 }
 0xc0b   :  { %v1045_v21 = vmul.f32 %v1228_v30, %v1044_v32 }
 0xc0d   :  { %v1046_v34 = vmul.f32 0.5, %v1045_v21 }
 0xc0f   :  { %v1047_v12 = vsub.f32 1.5, %v1046_v34 }
 0xc10   :  { %v1230_v35 = vpop.eup %1229 }
 0xc11   :  { %v1048_v36 = vmul.f32 %v1228_v30, %v1047_v12  ;;  %v1054_v57 = vmul.f32 %v1230_v35, %v1022_v31  ;;  %vm1060_vm11 = vweird.f32 %v1230_v35 }
 0xc12   :  { %vm1061_vm13 = vmor %vm1059_vm12, %vm1060_vm11 }
 0xc13   :  { %v1052_v39 = vsel %vm1051_vm10, %v1228_v30, %v1048_v36  ;;  %v1055_v40 = vmul.f32 %v1230_v35, %v1054_v57 }
 0xc14   :  { %v1065_v0 = vmul.f32 %v1052_v39, %v1675_v58 }
 0xc15   :  { %v1056_v42 = vmul.f32 0.5, %v1055_v40 }
 0xc16   :  { %v1072_v47 = vmul.f32 %v1139_v41, %v1065_v0 }
 0xc17   :  { %v1057_v4 = vsub.f32 1.5, %v1056_v42 }
 0xc18   :  { %v1079_v49 = vadd.f32 %v1140_v33, %v1072_v47 }
 0xc19   :  { %v1058_v51 = vmul.f32 %v1230_v35, %v1057_v4 }
 0xc1a   :  { %1083 = vst.msk [vmem:[%s1728_s14 + $0x10] sm:$0xff] %vm64_vm0, %v1079_v49 }
 0xc1b   :  { %v1062_v16 = vsel %vm1061_vm13, %v1230_v35, %v1058_v51 }
 0xc1c   :  { %v1066_v52 = vmul.f32 %v1062_v16, %v1681_v5 }
 0xc1e   :  { %v1073_v53 = vmul.f32 %v1139_v41, %v1066_v52 }
 0xc20   :  { %v1080_v55 = vadd.f32 %v1140_v33, %v1073_v53 }
 0xc22   :  { %1084 = vst.msk [vmem:[%s1728_s14 + $0x18] sm:$0xff] %vm64_vm0, %v1080_v55 }

// kernel: forward.9
= control target key start
LH: loop header
LB: loop body
LE: loop exit
PB: predicated region body
PF: predicated region fallthrough
CT: control target
= control target key end

     0   :  { %s1850_s0 = inlined_call_operand.vmem [shape: f32[32,32], index: 0, kind: input, shape index: {}]   ;;  %s1851_s1 = inlined_call_operand.vmem [shape: f32[32,32], index: 1, kind: input, shape index: {}]   ;;  %s1852_s2 = inlined_call_operand.vmem [shape: f32[32,96], index: 2, kind: input, shape index: {}]   ;;  %s1853_s3 = inlined_call_operand.vmem [shape: f32[1,96], index: 3, kind: input, shape index: {}]   ;;  %s1854_s4 = inlined_call_operand.vmem [shape: f32[32,32], index: 4, kind: input, shape index: {}]   ;;  %s1855_s5 = inlined_call_operand.vmem [shape: f32[1,32], index: 5, kind: input, shape index: {}]   ;;  %s1856_s6 = inlined_call_operand.vmem [shape: f32[1,32], index: 6, kind: input, shape index: {}]   ;;  %s1857_s7 = inlined_call_operand.vmem [shape: f32[1,32], index: 7, kind: input, shape index: {}]   ;;  %s1858_s8 = inlined_call_operand.vmem [shape: f32[32,64], index: 8, kind: input, shape index: {}]   ;;  %s1859_s9 = inlined_call_operand.vmem [shape: f32[1,64], index: 9, kind: input, shape index: {}]   ;;  %s1860_s10 = inlined_call_operand.vmem [shape: f32[64,32], index: 10, kind: input, shape index: {}]   ;;  %s1861_s11 = inlined_call_operand.vmem [shape: f32[1,32], index: 11, kind: input, shape index: {}]   ;;  %s1862_s12 = inlined_call_operand.vmem [shape: f32[1,32], index: 12, kind: input, shape index: {}]   ;;  %s1863_s13 = inlined_call_operand.vmem [shape: f32[1,32], index: 13, kind: input, shape index: {}]   ;;  %s1864_s14 = inlined_call_operand.vmem [shape: f32[2,32], index: 14, kind: input, shape index: {}]   ;;  %s1865_s15 = inlined_call_operand.vmem [shape: f32[32,128], index: 15, kind: input, shape index: {}]   ;;  %s1866_s16 = inlined_call_operand.vmem [shape: f32[1,128], index: 16, kind: input, shape index: {}]   ;;  %s1867_s17 = inlined_call_operand.hbm [shape: f32[2,128], index: 17, kind: output, shape index: {}]  }
   0x1   :  { %1870 = sst [smem:[#allocation5_spill]] %s1850_s0 }
   0x2   :  { %1871 = sst [smem:[#allocation6_spill]] %s1851_s1 }
   0x3   :  { %v64_v0 = vld [vmem:[%s1852_s2 + $0x10] sm:$0xff]  ;;  %v65_v1 = vld [vmem:[%s1852_s2 + $0x18] sm:$0xff]  ;;  %v62_v2 = vld [vmem:[%s1852_s2] sm:$0xff]  ;;  %s1872_s1 = sld [smem:[#allocation5_spill]] }
   0x4   :  { %v69_v3 = vpack.c.bf16 %v65_v1, %v64_v0  ;;  %v63_v4 = vld [vmem:[%s1852_s2 + $0x8] sm:$0xff] }
   0x5   :  { %v68_v8 = vpack.c.bf16 %v63_v4, %v62_v2 }
   0x6   :  { %87 = vmatpush.bf16.msra.mxu0 %v69_v3  ;;  %1192 = vmatpush.bf16.msra.mxu1 %v69_v3 }
   0x9   :  { %v1450_v5 = vld [vmem:[%s1872_s1] sm:$0xff]  ;;  %v1455_v6 = vld [vmem:[%s1872_s1 + $0x8] sm:$0xff]  ;;  %v1460_v7 = vld [vmem:[%s1872_s1 + $0x10] sm:$0xff] }
   0xa   :  { %v1465_v9 = vld [vmem:[%s1872_s1 + $0x18] sm:$0xff]  ;;  %v66_v10 = vpack.c.bf16 %v1455_v6, %v1450_v5 }
   0xb   :  { %v67_v11 = vpack.c.bf16 %v1465_v9, %v1460_v7 }
   0xc   :  { %22 = vsyncpa [#allocation3], 0  ;;  %88 = vmatpush.bf16.msra.mxu0 %v68_v8  ;;  %1193 = vmatpush.bf16.msra.mxu1 %v68_v8  ;;  %vm74_vm0 = vcmask 261120   ;;  %v1207_v14 = vld [vmem:[%s1853_s3] ss:$0 sm:$0xff]  ;;  %s1332_s27 = smov 96  }
   0xd   :  { %vm121_vm1 = vcmask 64512   ;;  %s1873_s29 = sld [smem:[#allocation6_spill]]  ;;  %s1333_s21 = smov 64   ;;  %v100_v4 = vld [vmem:[%s1854_s4] sm:$0xff]  ;;  %vm247_vm2 = vcmask 1043456  }
   0xe   :  { %s1334_s22 = smov 88   ;;  %s1335_s23 = smov 120   ;;  %v240_v8 = vpack.c.bf16 %v100_v4, %v100_v4 }
   0xf   :  { %1161 = vmatmul.msk.bf16.vlgmr.msra.gmra.mxu0 %vm74_vm0, %v66_v10  ;;  %1162 = vmatmul.msk.bf16.vlgmr.msra.gmra.mxu1 %vm74_vm0, %v67_v11  ;;  %s1338_s3 = smov 72   ;;  %s1339_s28 = smov 112  }
  0x10   :  { %v249_v10 = vsel %vm247_vm2, %v240_v8, 0  ;;  %s1341_s18 = smov 48   ;;  %s1342_s19 = smov 40  }
  0x11   :  { %258 = vmatpush.bf16.msra.mxu3 %v249_v10  ;;  %s1152_s24 = sshll.u32 %s1867_s17, 4  ;;  %s1153_s24 = int_to_ptr.hbm [resolvable:$true] %s1152_s24 }
  0x13   :  { %v1491_v28 = vld [vmem:[%s1873_s29] sm:$0xff]  ;;  %v1498_v33 = vld [vmem:[%s1873_s29 + $0x8] sm:$0xff]  ;;  %v1505_v38 = vld [vmem:[%s1873_s29 + $0x10] sm:$0xff] }
  0x14   :  { %v1512_v43 = vld [vmem:[%s1873_s29 + $0x18] sm:$0xff]  ;;  %s1340_s29 = smov 104  }
  0x8c   :  { %v95_v12 = vpop.f32.mrf.mxu1  ;;  %v90_v13 = vpop.f32.mrf.mxu0 }
  0x8d   :  { %v96_v16 = vadd.f32 %v1207_v14, %v95_v12  ;;  %v91_v20 = vadd.f32 %v1207_v14, %v90_v13 }
  0x94   :  { %v97_v15 = vpop.f32.mrf.mxu1  ;;  %v92_v19 = vpop.f32.mrf.mxu0 }
  0x95   :  { %v98_v17 = vadd.f32 %v1207_v14, %v97_v15  ;;  %v93_v21 = vadd.f32 %v1207_v14, %v92_v19 }
  0x97   :  { %v1476_v18 = vpack.c.bf16 %v98_v17, %v96_v16  ;;  %v1479_v22 = vpack.c.bf16 %v93_v21, %v91_v20 }
  0x99   :  { %119 = vrot.lane.b32.xlu0 %v1476_v18, %s1332_s27 }
  0xa1   :  { %117 = vrot.lane.b32.xlu0 %v1479_v22, %s1332_s27  ;;  %s1337_s27 = smov 80  }
 0x10b   :  { %v120_v23 = vpop.permute.xlu0 %119 }
 0x10c   :  { %v132_v24 = vsel %vm121_vm1, %v120_v23, 0 }
 0x10d   :  { %140 = vmatpush.bf16.xpose.msrb.mxu1 %v132_v24 }
 0x113   :  { %v118_v25 = vpop.permute.xlu0 %117 }
 0x114   :  { %v129_v26 = vsel %vm121_vm1, %v118_v25, 0 }
 0x115   :  { %141 = vmatpush.bf16.xpose.msrb.mxu1 %v129_v26 }
 0x11c   :  { %1163 = vmatmul.msk.bf16.vlgmr.msrb.gmra.mxu1 %vm121_vm1, %v1479_v22 }
 0x12c   :  { %1164 = vmatmul.msk.bf16.gmra.mxu1 %vm121_vm1, %v1476_v18 }
 0x199   :  { %v143_v27 = vpop.f32.mrf.mxu1 }
 0x19a   :  { %v153_v29 = vmul.f32 0.35355338, %v143_v27 }
 0x19c   :  { %v157_v30 = vadd.f32 %v153_v29, %v1491_v28 }
 0x19e   :  { %v161_v31 = vsel %vm74_vm0, %v157_v30, -inf }
 0x19f   :  { %162 = vmax.xlane.f32.xlu1 %v161_v31 }
 0x1a1   :  { %v145_v32 = vpop.f32.mrf.mxu1 }
 0x1a2   :  { %v154_v34 = vmul.f32 0.35355338, %v145_v32 }
 0x1a4   :  { %v158_v35 = vadd.f32 %v154_v34, %v1498_v33 }
 0x1a6   :  { %v164_v36 = vsel %vm74_vm0, %v158_v35, -inf }
 0x1a7   :  { %165 = vmax.xlane.f32.xlu1 %v164_v36 }
 0x1a9   :  { %v148_v37 = vpop.f32.mrf.mxu1 }
 0x1aa   :  { %v155_v39 = vmul.f32 0.35355338, %v148_v37 }
 0x1ac   :  { %v159_v40 = vadd.f32 %v155_v39, %v1505_v38 }
 0x1ae   :  { %v167_v41 = vsel %vm74_vm0, %v159_v40, -inf }
 0x1af   :  { %168 = vmax.xlane.f32.xlu2 %v167_v41 }
 0x1b1   :  { %v150_v42 = vpop.f32.mrf.mxu1 }
 0x1b2   :  { %v156_v44 = vmul.f32 0.35355338, %v150_v42 }
 0x1b4   :  { %v160_v45 = vadd.f32 %v156_v44, %v1512_v43 }
 0x1b6   :  { %v170_v46 = vsel %vm74_vm0, %v160_v45, -inf }
 0x1b7   :  { %171 = vmax.xlane.f32.xlu2 %v170_v46  ;;  %v1545_v46 = vld [vmem:[%s1855_s5] ss:$0 sm:$0xff]  ;;  %s1336_s5 = smov 56  }
 0x1cf   :  { %209 = vrot.lane.b32.xlu2 %v1476_v18, %s1333_s21 }
 0x212   :  { %v163_v47 = vpop.xlane.xlu1 %162 }
 0x213   :  { %v173_v48 = vsub.f32 %v157_v30, %v163_v47 }
 0x215   :  { %v177_v49 = vmul.f32 1.442695, %v173_v48 }
 0x217   :  { %1216 = vpow2.f32 %v177_v49 }
 0x21a   :  { %v166_v50 = vpop.xlane.xlu1 %165 }
 0x21b   :  { %v174_v51 = vsub.f32 %v158_v35, %v166_v50 }
 0x21d   :  { %v1217_v52 = vpop.eup %1216  ;;  %v179_v53 = vmul.f32 1.442695, %v174_v51 }
 0x21e   :  { %v185_v54 = vsel %vm74_vm0, %v1217_v52, 0.0 }
 0x21f   :  { %1218 = vpow2.f32 %v179_v53  ;;  %186 = vadd.xlane.f32.xlu0 %v185_v54 }
 0x222   :  { %v169_v55 = vpop.xlane.xlu2 %168 }
 0x223   :  { %v175_v56 = vsub.f32 %v159_v40, %v169_v55 }
 0x225   :  { %v1219_v57 = vpop.eup %1218  ;;  %v181_v58 = vmul.f32 1.442695, %v175_v56 }
 0x226   :  { %v188_v59 = vsel %vm74_vm0, %v1219_v57, 0.0 }
 0x227   :  { %1220 = vpow2.f32 %v181_v58  ;;  %189 = vadd.xlane.f32.xlu1 %v188_v59 }
 0x22a   :  { %v172_v60 = vpop.xlane.xlu2 %171 }
 0x22b   :  { %v176_v0 = vsub.f32 %v160_v45, %v172_v60 }
 0x22d   :  { %v1221_v61 = vpop.eup %1220  ;;  %v183_v1 = vmul.f32 1.442695, %v176_v0 }
 0x22e   :  { %v191_v62 = vsel %vm74_vm0, %v1221_v61, 0.0 }
 0x22f   :  { %192 = vadd.xlane.f32.xlu2 %v191_v62  ;;  %1222 = vpow2.f32 %v183_v1 }
 0x232   :  { %v210_v63 = vpop.permute.xlu2 %209 }
 0x233   :  { %280 = vrot.lane.b32.xlu0 %v1476_v18, %s1334_s22  ;;  %225 = vmatpush.bf16.msra.mxu2 %v210_v63 }
 0x235   :  { %v1223_v2 = vpop.eup %1222 }
 0x236   :  { %v194_v3 = vsel %vm74_vm0, %v1223_v2, 0.0 }
 0x23b   :  { %278 = vrot.lane.b32.xlu0 %v1479_v22, %s1334_s22  ;;  %s1344_s22 = smov [#allocation2]  }
 0x240   :  { %207 = vrot.lane.b32.xlu1 %v1479_v22, %s1333_s21 }
 0x243   :  { %276 = vrot.lane.b32.xlu0 %v1476_v18, %s1335_s23 }
 0x247   :  { %274 = vrot.lane.b32.xlu2 %v1479_v22, %s1335_s23 }
 0x26a   :  { %195 = vadd.xlane.f32.xlu1 %v194_v3 }
 0x292   :  { %v187_v11 = vpop.xlane.xlu0 %186 }
 0x29a   :  { %v190_v12 = vpop.xlane.xlu1 %189 }
 0x29b   :  { %1224 = vrcp.f32 %v190_v12 }
 0x29c   :  { %1226 = vrcp.f32 %v187_v11 }
 0x2a1   :  { %v1225_v15 = vpop.eup %1224 }
 0x2a2   :  { %v1227_v19 = vpop.eup %1226  ;;  %v202_v20 = vmul.f32 %v1225_v15, %v1219_v57  ;;  %v193_v25 = vpop.xlane.xlu2 %192 }
 0x2a3   :  { %v201_v23 = vmul.f32 %v1227_v19, %v1217_v52  ;;  %1228 = vrcp.f32 %v193_v25 }
 0x2a5   :  { %v281_v13 = vpop.permute.xlu0 %280  ;;  %v205_v24 = vpack.c.bf16 %v202_v20, %v201_v23 }
 0x2a6   :  { %v292_v14 = vsel %vm121_vm1, %v281_v13, 0 }
 0x2a7   :  { %300 = vmatpush.bf16.xpose.msrb.mxu3 %v292_v14 }
 0x2a9   :  { %v1229_v27 = vpop.eup %1228 }
 0x2aa   :  { %v203_v30 = vmul.f32 %v1229_v27, %v1221_v61  ;;  %v275_v41 = vpop.permute.xlu2 %274 }
 0x2ad   :  { %v279_v16 = vpop.permute.xlu0 %278 }
 0x2ae   :  { %v289_v17 = vsel %vm121_vm1, %v279_v16, 0 }
 0x2af   :  { %301 = vmatpush.bf16.xpose.msrb.mxu3 %v289_v17 }
 0x2b2   :  { %v208_v21 = vpop.permute.xlu1 %207 }
 0x2b3   :  { %226 = vmatpush.bf16.msra.mxu2 %v208_v21 }
 0x2b5   :  { %v277_v42 = vpop.permute.xlu0 %276 }
 0x2b6   :  { %1165 = vmatmul.msk.bf16.vlgmr.msra.gmra.mxu2 %vm74_vm0, %v205_v24 }
 0x2dd   :  { %v196_v26 = vpop.xlane.xlu1 %195 }
 0x2de   :  { %1230 = vrcp.f32 %v196_v26 }
 0x2e4   :  { %v1231_v29 = vpop.eup %1230 }
 0x2e5   :  { %v204_v31 = vmul.f32 %v1231_v29, %v1223_v2 }
 0x2e7   :  { %v206_v32 = vpack.c.bf16 %v204_v31, %v203_v30 }
 0x2e9   :  { %1166 = vmatmul.msk.bf16.gmra.mxu2 %vm74_vm0, %v206_v32 }
 0x339   :  { %v228_v34 = vpop.f32.mrf.mxu2 }
 0x341   :  { %v230_v35 = vpop.f32.mrf.mxu2 }
 0x342   :  { %v238_v36 = vpack.c.bf16 %v230_v35, %v228_v34 }
 0x344   :  { %1167 = vmatmul.msk.bf16.vlgmr.msra.gmra.mxu3 %vm121_vm1, %v238_v36 }
 0x36c   :  { %v233_v37 = vpop.f32.mrf.mxu2 }
 0x374   :  { %v235_v39 = vpop.f32.mrf.mxu2 }
 0x375   :  { %v239_v40 = vpack.c.bf16 %v235_v39, %v233_v37 }
 0x377   :  { %1168 = vmatmul.msk.bf16.gmra.mxu3 %vm121_vm1, %v239_v40  ;;  %v101_v40 = vld [vmem:[%s1854_s4 + $0x8] sm:$0xff] }
 0x387   :  { %1169 = vmatmul.msk.bf16.vlgmr.msrb.gmra.mxu3 %vm121_vm1, %v275_v41  ;;  %v400_v41 = vpack.c.bf16 %v101_v40, %v101_v40 }
 0x397   :  { %1170 = vmatmul.msk.bf16.gmra.mxu3 %vm121_vm1, %v277_v42  ;;  %v408_v42 = vsel %vm247_vm2, %v400_v41, 0 }
 0x398   :  { %417 = vmatpush.bf16.msrb.mxu2 %v408_v42 }
 0x3c7   :  { %v1538_v44 = vpop.f32.mrf.mxu3 }
 0x3cf   :  { %v1540_v45 = vpop.f32.mrf.mxu3 }
 0x3fa   :  { %v265_v47 = vpop.f32.mrf.mxu3 }
 0x3fb   :  { %v1548_v48 = vadd.f32 %v1545_v46, %v265_v47 }
 0x402   :  { %v267_v49 = vpop.f32.mrf.mxu3 }
 0x403   :  { %v1551_v50 = vadd.f32 %v1545_v46, %v267_v49 }
 0x40a   :  { %v303_v51 = vpop.f32.mrf.mxu3 }
 0x40b   :  { %v313_v52 = vmul.f32 0.35355338, %v303_v51 }
 0x40d   :  { %v317_v53 = vadd.f32 %v313_v52, %v1491_v28 }
 0x40f   :  { %v321_v54 = vsel %vm74_vm0, %v317_v53, -inf }
 0x410   :  { %322 = vmax.xlane.f32.xlu1 %v321_v54 }
 0x412   :  { %v305_v55 = vpop.f32.mrf.mxu3 }
 0x413   :  { %v314_v56 = vmul.f32 0.35355338, %v305_v55 }
 0x415   :  { %v318_v57 = vadd.f32 %v314_v56, %v1498_v33 }
 0x417   :  { %v324_v58 = vsel %vm74_vm0, %v318_v57, -inf }
 0x418   :  { %325 = vmax.xlane.f32.xlu0 %v324_v58 }
 0x41a   :  { %v308_v59 = vpop.f32.mrf.mxu3 }
 0x41b   :  { %v315_v60 = vmul.f32 0.35355338, %v308_v59 }
 0x41d   :  { %v319_v61 = vadd.f32 %v315_v60, %v1505_v38 }
 0x41f   :  { %v327_v62 = vsel %vm74_vm0, %v319_v61, -inf }
 0x420   :  { %328 = vmax.xlane.f32.xlu1 %v327_v62 }
 0x422   :  { %v310_v63 = vpop.f32.mrf.mxu3 }
 0x423   :  { %v316_v0 = vmul.f32 0.35355338, %v310_v63 }
 0x425   :  { %v320_v1 = vadd.f32 %v316_v0, %v1512_v43 }
 0x427   :  { %v330_v2 = vsel %vm74_vm0, %v320_v1, -inf }
 0x428   :  { %331 = vmax.xlane.f32.xlu2 %v330_v2 }
 0x42c   :  { %367 = vrot.lane.b32.xlu0 %v1479_v22, %s1336_s5 }
 0x434   :  { %439 = vrot.lane.b32.xlu0 %v1476_v18, %s1337_s27 }
 0x43c   :  { %596 = vrot.lane.b32.xlu0 %v1479_v22, %s1338_s3 }
 0x444   :  { %437 = vrot.lane.b32.xlu0 %v1479_v22, %s1337_s27 }
 0x44c   :  { %433 = vrot.lane.b32.xlu0 %v1479_v22, %s1339_s28 }
 0x454   :  { %435 = vrot.lane.b32.xlu0 %v1476_v18, %s1339_s28 }
 0x483   :  { %v323_v3 = vpop.xlane.xlu1 %322 }
 0x484   :  { %v333_v4 = vsub.f32 %v317_v53, %v323_v3 }
 0x486   :  { %v337_v8 = vmul.f32 1.442695, %v333_v4 }
 0x488   :  { %1232 = vpow2.f32 %v337_v8 }
 0x48b   :  { %v326_v10 = vpop.xlane.xlu0 %325 }
 0x48c   :  { %v334_v11 = vsub.f32 %v318_v57, %v326_v10 }
 0x48e   :  { %v1233_v12 = vpop.eup %1232  ;;  %v339_v13 = vmul.f32 1.442695, %v334_v11 }
 0x48f   :  { %v345_v14 = vsel %vm74_vm0, %v1233_v12, 0.0 }
 0x490   :  { %1234 = vpow2.f32 %v339_v13  ;;  %346 = vadd.xlane.f32.xlu1 %v345_v14 }
 0x493   :  { %v329_v15 = vpop.xlane.xlu1 %328 }
 0x494   :  { %v335_v16 = vsub.f32 %v319_v61, %v329_v15 }
 0x496   :  { %v1235_v17 = vpop.eup %1234  ;;  %v341_v19 = vmul.f32 1.442695, %v335_v16 }
 0x497   :  { %v348_v20 = vsel %vm74_vm0, %v1235_v17, 0.0 }
 0x498   :  { %1236 = vpow2.f32 %v341_v19  ;;  %349 = vadd.xlane.f32.xlu1 %v348_v20 }
 0x49b   :  { %v332_v32 = vpop.xlane.xlu2 %331 }
 0x49c   :  { %v336_v34 = vsub.f32 %v320_v1, %v332_v32 }
 0x49e   :  { %v1571_v21 = vpop.eup %1236  ;;  %v368_v23 = vpop.permute.xlu0 %367  ;;  %v343_v35 = vmul.f32 1.442695, %v336_v34 }
 0x49f   :  { %v351_v24 = vsel %vm74_vm0, %v1571_v21, 0.0 }
 0x4a0   :  { %352 = vadd.xlane.f32.xlu2 %v351_v24  ;;  %1238 = vpow2.f32 %v343_v35 }
 0x4a6   :  { %v440_v25 = vpop.permute.xlu0 %439  ;;  %v1239_v37 = vpop.eup %1238 }
 0x4a7   :  { %v451_v26 = vsel %vm121_vm1, %v440_v25, 0  ;;  %v354_v39 = vsel %vm74_vm0, %v1239_v37, 0.0 }
 0x4a8   :  { %459 = vmatpush.bf16.xpose.msra.mxu1 %v451_v26 }
 0x4ae   :  { %v597_v27 = vpop.permute.xlu0 %596 }
 0x4af   :  { %v607_v57 = vsel %vm121_vm1, %v597_v27, 0 }
 0x4b1   :  { %369 = vrot.lane.b32.xlu1 %v1476_v18, %s1336_s5 }
 0x4b6   :  { %v438_v29 = vpop.permute.xlu0 %437 }
 0x4b7   :  { %v448_v30 = vsel %vm121_vm1, %v438_v29, 0 }
 0x4b8   :  { %460 = vmatpush.bf16.xpose.msra.mxu1 %v448_v30  ;;  %598 = vrot.lane.b32.xlu2 %v1476_v18, %s1338_s3 }
 0x4be   :  { %v434_v31 = vpop.permute.xlu0 %433 }
 0x4bf   :  { %1175 = vmatmul.msk.bf16.vlgmr.msra.gmra.mxu1 %vm121_vm1, %v434_v31 }
 0x4c0   :  { %592 = vrot.lane.b32.xlu2 %v1479_v22, %s1340_s29 }
 0x4c6   :  { %v436_v36 = vpop.permute.xlu0 %435 }
 0x4c8   :  { %594 = vrot.lane.b32.xlu2 %v1476_v18, %s1340_s29 }
 0x4cf   :  { %1176 = vmatmul.msk.bf16.gmra.mxu1 %vm121_vm1, %v436_v36 }
 0x4db   :  { %355 = vadd.xlane.f32.xlu1 %v354_v39 }
 0x503   :  { %v347_v47 = vpop.xlane.xlu1 %346 }
 0x50b   :  { %v350_v51 = vpop.xlane.xlu1 %349 }
 0x50c   :  { %1240 = vrcp.f32 %v350_v51 }
 0x50d   :  { %1242 = vrcp.f32 %v347_v47 }
 0x512   :  { %v1241_v54 = vpop.eup %1240 }
 0x513   :  { %v353_v49 = vpop.xlane.xlu2 %352  ;;  %v1243_v56 = vpop.eup %1242  ;;  %v362_v58 = vmul.f32 %v1241_v54, %v1235_v17 }
 0x514   :  { %v361_v59 = vmul.f32 %v1243_v56, %v1233_v12  ;;  %1244 = vrcp.f32 %v353_v49 }
 0x516   :  { %v365_v60 = vpack.c.bf16 %v362_v58, %v361_v59 }
 0x51a   :  { %v1245_v14 = vpop.eup %1244 }
 0x51b   :  { %v599_v52 = vpop.permute.xlu2 %598  ;;  %v363_v19 = vmul.f32 %v1245_v14, %v1571_v21 }
 0x51c   :  { %v610_v53 = vsel %vm121_vm1, %v599_v52, 0  ;;  %v270_v52 = vadd.f32 %v1545_v46, %v1538_v44 }
 0x51d   :  { %618 = vmatpush.bf16.xpose.msra.mxu2 %v610_v53 }
 0x523   :  { %v370_v55 = vpop.permute.xlu1 %369  ;;  %v593_v27 = vpop.permute.xlu2 %592 }
 0x524   :  { %385 = vmatpush.bf16.msrb.mxu0 %v370_v55  ;;  %v271_v55 = vadd.f32 %v1545_v46, %v1540_v45 }
 0x525   :  { %619 = vmatpush.bf16.xpose.msra.mxu2 %v607_v57 }
 0x528   :  { %386 = vmatpush.bf16.msrb.mxu0 %v368_v23 }
 0x52b   :  { %1171 = vmatmul.msk.bf16.vlgmr.msrb.gmra.mxu0 %vm74_vm0, %v365_v60  ;;  %v595_v31 = vpop.permute.xlu2 %594 }
 0x53c   :  { %v462_v61 = vpop.f32.mrf.mxu1 }
 0x53d   :  { %v472_v62 = vmul.f32 0.35355338, %v462_v61 }
 0x53f   :  { %v476_v63 = vadd.f32 %v472_v62, %v1491_v28 }
 0x541   :  { %v480_v0 = vsel %vm74_vm0, %v476_v63, -inf }
 0x542   :  { %481 = vmax.xlane.f32.xlu1 %v480_v0 }
 0x544   :  { %v464_v1 = vpop.f32.mrf.mxu1 }
 0x545   :  { %v473_v2 = vmul.f32 0.35355338, %v464_v1 }
 0x547   :  { %v477_v3 = vadd.f32 %v473_v2, %v1498_v33 }
 0x549   :  { %v483_v4 = vsel %vm74_vm0, %v477_v3, -inf }
 0x54a   :  { %484 = vmax.xlane.f32.xlu2 %v483_v4 }
 0x54c   :  { %v467_v8 = vpop.f32.mrf.mxu1 }
 0x54d   :  { %v474_v10 = vmul.f32 0.35355338, %v467_v8 }
 0x54e   :  { %v356_v11 = vpop.xlane.xlu1 %355 }
 0x54f   :  { %1246 = vrcp.f32 %v356_v11  ;;  %v1598_v12 = vadd.f32 %v474_v10, %v1505_v38 }
 0x551   :  { %v486_v13 = vsel %vm74_vm0, %v1598_v12, -inf }
 0x552   :  { %487 = vmax.xlane.f32.xlu1 %v486_v13 }
 0x554   :  { %v469_v15 = vpop.f32.mrf.mxu1 }
 0x555   :  { %v1247_v16 = vpop.eup %1246  ;;  %v475_v17 = vmul.f32 0.35355338, %v469_v15 }
 0x556   :  { %v364_v20 = vmul.f32 %v1247_v16, %v1239_v37 }
 0x557   :  { %v1604_v23 = vadd.f32 %v475_v17, %v1512_v43 }
 0x558   :  { %v366_v24 = vpack.c.bf16 %v364_v20, %v363_v19 }
 0x559   :  { %v489_v25 = vsel %vm74_vm0, %v1604_v23, -inf }
 0x55a   :  { %490 = vmax.xlane.f32.xlu1 %v489_v25  ;;  %1172 = vmatmul.msk.bf16.gmra.mxu0 %vm74_vm0, %v366_v24 }
 0x5a8   :  { %v388_v26 = vpop.f32.mrf.mxu0 }
 0x5b0   :  { %v390_v29 = vpop.f32.mrf.mxu0 }
 0x5b1   :  { %v398_v30 = vpack.c.bf16 %v390_v29, %v388_v26 }
 0x5b3   :  { %1173 = vmatmul.msk.bf16.vlgmr.msrb.gmra.mxu2 %vm121_vm1, %v398_v30 }
 0x5b5   :  { %v482_v32 = vpop.xlane.xlu1 %481 }
 0x5b6   :  { %v492_v21 = vsub.f32 %v476_v63, %v482_v32 }
 0x5b8   :  { %v496_v34 = vmul.f32 1.442695, %v492_v21 }
 0x5ba   :  { %1248 = vpow2.f32 %v496_v34 }
 0x5bd   :  { %v485_v35 = vpop.xlane.xlu2 %484 }
 0x5be   :  { %v493_v36 = vsub.f32 %v477_v3, %v485_v35 }
 0x5c0   :  { %v1610_v37 = vpop.eup %1248  ;;  %v498_v39 = vmul.f32 1.442695, %v493_v36 }
 0x5c1   :  { %v504_v40 = vsel %vm74_vm0, %v1610_v37, 0.0 }
 0x5c2   :  { %1250 = vpow2.f32 %v498_v39  ;;  %505 = vadd.xlane.f32.xlu2 %v504_v40 }
 0x5c5   :  { %v488_v11 = vpop.xlane.xlu1 %487 }
 0x5c6   :  { %v494_v20 = vsub.f32 %v1598_v12, %v488_v11 }
 0x5c8   :  { %v1614_v41 = vpop.eup %1250  ;;  %v500_v25 = vmul.f32 1.442695, %v494_v20  ;;  %v102_v20 = vld [vmem:[%s1854_s4 + $0x10] sm:$0xff] }
 0x5c9   :  { %v507_v42 = vsel %vm74_vm0, %v1614_v41, 0.0 }
 0x5ca   :  { %508 = vadd.xlane.f32.xlu0 %v507_v42 }
 0x5cd   :  { %v491_v13 = vpop.xlane.xlu1 %490 }
 0x5d7   :  { %v393_v47 = vpop.f32.mrf.mxu0 }
 0x5df   :  { %v395_v49 = vpop.f32.mrf.mxu0 }
 0x5e0   :  { %v399_v51 = vpack.c.bf16 %v395_v49, %v393_v47 }
 0x5e2   :  { %1174 = vmatmul.msk.bf16.gmra.mxu2 %vm121_vm1, %v399_v51 }
 0x5f2   :  { %1181 = vmatmul.msk.bf16.vlgmr.msra.gmra.mxu2 %vm121_vm1, %v593_v27 }
 0x602   :  { %1182 = vmatmul.msk.bf16.gmra.mxu2 %vm121_vm1, %v595_v31 }
 0x636   :  { %v419_v53 = vpop.f32.mrf.mxu2 }
 0x637   :  { %v1623_v54 = vadd.f32 %v419_v53, %v270_v52 }
 0x63e   :  { %v421_v56 = vpop.f32.mrf.mxu2 }
 0x63f   :  { %v1627_v57 = vadd.f32 %v421_v56, %v271_v55  ;;  %v506_v56 = vpop.xlane.xlu2 %505 }
 0x665   :  { %v424_v58 = vpop.f32.mrf.mxu2 }
 0x666   :  { %v1630_v59 = vadd.f32 %v424_v58, %v1548_v48 }
 0x66d   :  { %v426_v60 = vpop.f32.mrf.mxu2 }
 0x66e   :  { %v1633_v61 = vadd.f32 %v426_v60, %v1551_v50 }
 0x675   :  { %v621_v62 = vpop.f32.mrf.mxu2 }
 0x676   :  { %v631_v63 = vmul.f32 0.35355338, %v621_v62 }
 0x678   :  { %v635_v44 = vadd.f32 %v631_v63, %v1491_v28 }
 0x67a   :  { %v639_v0 = vsel %vm74_vm0, %v635_v44, -inf }
 0x67b   :  { %640 = vmax.xlane.f32.xlu0 %v639_v0 }
 0x67d   :  { %v623_v1 = vpop.f32.mrf.mxu2 }
 0x67e   :  { %v632_v45 = vmul.f32 0.35355338, %v623_v1 }
 0x680   :  { %v636_v46 = vadd.f32 %v632_v45, %v1498_v33 }
 0x682   :  { %v642_v2 = vsel %vm74_vm0, %v636_v46, -inf }
 0x683   :  { %643 = vmax.xlane.f32.xlu1 %v642_v2 }
 0x685   :  { %v626_v48 = vpop.f32.mrf.mxu2 }
 0x686   :  { %v633_v3 = vmul.f32 0.35355338, %v626_v48 }
 0x688   :  { %v637_v4 = vadd.f32 %v633_v3, %v1505_v38  ;;  %v495_v38 = vsub.f32 %v1604_v23, %v491_v13 }
 0x68a   :  { %v645_v50 = vsel %vm74_vm0, %v637_v4, -inf  ;;  %v502_v14 = vmul.f32 1.442695, %v495_v38 }
 0x68b   :  { %646 = vmax.xlane.f32.xlu1 %v645_v50 }
 0x68c   :  { %1252 = vpow2.f32 %v502_v14 }
 0x68d   :  { %v628_v8 = vpop.f32.mrf.mxu2 }
 0x68e   :  { %v634_v10 = vmul.f32 0.35355338, %v628_v8 }
 0x68f   :  { %528 = vrot.lane.b32.xlu0 %v1476_v18, %s1341_s18 }
 0x690   :  { %v638_v28 = vadd.f32 %v634_v10, %v1512_v43  ;;  %v509_v43 = vpop.xlane.xlu0 %508 }
 0x692   :  { %v648_v33 = vsel %vm74_vm0, %v638_v28, -inf  ;;  %v1648_v15 = vpop.eup %1252 }
 0x693   :  { %649 = vmax.xlane.f32.xlu1 %v648_v33  ;;  %v513_v16 = vsel %vm74_vm0, %v1648_v15, 0.0 }
 0x697   :  { %685 = vrot.lane.b32.xlu0 %v1479_v22, %s1342_s19 }
 0x6ac   :  { %687 = vrot.lane.b32.xlu1 %v1476_v18, %s1342_s19 }
 0x6c1   :  { %514 = vadd.xlane.f32.xlu0 %v513_v16 }
 0x6ee   :  { %v641_v17 = vpop.xlane.xlu0 %640 }
 0x6ef   :  { %v651_v19 = vsub.f32 %v635_v44, %v641_v17  ;;  %v103_v17 = vld [vmem:[%s1854_s4 + $0x18] sm:$0xff]  ;;  %s1150_s4 = sshll.u32 %s1344_s22, 4  ;;  %s1151_s4 = int_to_ptr.vmem [resolvable:$true] %s1150_s4 }
 0x6f1   :  { %v655_v24 = vmul.f32 1.442695, %v651_v19  ;;  %v718_v19 = vpack.c.bf16 %v103_v17, %v103_v17 }
 0x6f3   :  { %1254 = vpow2.f32 %v655_v24  ;;  %v559_v24 = vpack.c.bf16 %v102_v20, %v102_v20 }
 0x6f4   :  { %1256 = vpow2.f32 %v500_v25 }
 0x6f5   :  { %v567_v25 = vsel %vm247_vm2, %v559_v24, 0 }
 0x6f6   :  { %v644_v26 = vpop.xlane.xlu1 %643  ;;  %576 = vmatpush.bf16.msra.mxu0 %v567_v25  ;;  %v868_v25 = vld [vmem:[%s1858_s8 + $0x10] sm:$0xff] }
 0x6f7   :  { %v652_v18 = vsub.f32 %v636_v46, %v644_v26 }
 0x6f9   :  { %v1255_v27 = vpop.eup %1254  ;;  %v657_v23 = vmul.f32 1.442695, %v652_v18 }
 0x6fa   :  { %v663_v29 = vsel %vm74_vm0, %v1255_v27, 0.0  ;;  %v1257_v31 = vpop.eup %1256 }
 0x6fb   :  { %1258 = vpow2.f32 %v657_v23  ;;  %664 = vadd.xlane.f32.xlu1 %v663_v29  ;;  %v510_v12 = vsel %vm74_vm0, %v1257_v31, 0.0 }
 0x6fe   :  { %v647_v30 = vpop.xlane.xlu1 %646 }
 0x6ff   :  { %v653_v51 = vsub.f32 %v637_v4, %v647_v30 }
 0x701   :  { %v1259_v32 = vpop.eup %1258  ;;  %v529_v21 = vpop.permute.xlu0 %528  ;;  %v659_v52 = vmul.f32 1.442695, %v653_v51 }
 0x702   :  { %544 = vmatpush.bf16.msra.mxu3 %v529_v21  ;;  %v666_v34 = vsel %vm74_vm0, %v1259_v32, 0.0 }
 0x703   :  { %667 = vadd.xlane.f32.xlu2 %v666_v34  ;;  %511 = vadd.xlane.f32.xlu1 %v510_v12 }
 0x706   :  { %v650_v35 = vpop.xlane.xlu1 %649 }
 0x707   :  { %v654_v36 = vsub.f32 %v638_v28, %v650_v35 }
 0x709   :  { %v661_v39 = vmul.f32 1.442695, %v654_v36  ;;  %v686_v49 = vpop.permute.xlu0 %685 }
 0x70b   :  { %1260 = vpow2.f32 %v661_v39 }
 0x70c   :  { %1262 = vpow2.f32 %v659_v52 }
 0x70d   :  { %1264 = vrcp.f32 %v509_v43 }
 0x70e   :  { %1266 = vrcp.f32 %v506_v56 }
 0x711   :  { %v1261_v40 = vpop.eup %1260 }
 0x712   :  { %v672_v42 = vsel %vm74_vm0, %v1261_v40, 0.0  ;;  %v1263_v53 = vpop.eup %1262 }
 0x713   :  { %673 = vadd.xlane.f32.xlu1 %v672_v42  ;;  %v669_v55 = vsel %vm74_vm0, %v1263_v53, 0.0  ;;  %v1265_v62 = vpop.eup %1264 }
 0x714   :  { %v521_v44 = vmul.f32 %v1265_v62, %v1614_v41 }
 0x71b   :  { %526 = vrot.lane.b32.xlu2 %v1479_v22, %s1341_s18  ;;  %v1267_v22 = vpop.eup %1266 }
 0x71c   :  { %v520_v1 = vmul.f32 %v1267_v22, %v1610_v37 }
 0x71e   :  { %v688_v47 = vpop.permute.xlu1 %687  ;;  %v524_v48 = vpack.c.bf16 %v521_v44, %v520_v1 }
 0x71f   :  { %703 = vmatpush.bf16.msrb.mxu1 %v688_v47 }
 0x723   :  { %704 = vmatpush.bf16.msrb.mxu1 %v686_v49 }
 0x734   :  { %v515_v50 = vpop.xlane.xlu0 %514 }
 0x744   :  { %670 = vadd.xlane.f32.xlu2 %v669_v55 }
 0x76e   :  { %v665_v58 = vpop.xlane.xlu1 %664 }
 0x76f   :  { %1268 = vrcp.f32 %v665_v58 }
 0x775   :  { %v1269_v63 = vpop.eup %1268 }
 0x776   :  { %v668_v60 = vpop.xlane.xlu2 %667  ;;  %v679_v46 = vmul.f32 %v1269_v63, %v1255_v27  ;;  %v512_v3 = vpop.xlane.xlu1 %511 }
 0x777   :  { %1270 = vrcp.f32 %v668_v60 }
 0x778   :  { %1272 = vrcp.f32 %v512_v3 }
 0x779   :  { %1274 = vrcp.f32 %v515_v50 }
 0x77d   :  { %v1271_v0 = vpop.eup %1270 }
 0x77e   :  { %v527_v45 = vpop.permute.xlu2 %526  ;;  %v680_v2 = vmul.f32 %v1271_v0, %v1259_v32  ;;  %v1273_v8 = vpop.eup %1272 }
 0x77f   :  { %545 = vmatpush.bf16.msra.mxu3 %v527_v45  ;;  %v1275_v10 = vpop.eup %1274  ;;  %v522_v41 = vmul.f32 %v1273_v8, %v1257_v31 }
 0x780   :  { %v683_v4 = vpack.c.bf16 %v680_v2, %v679_v46  ;;  %v523_v28 = vmul.f32 %v1275_v10, %v1648_v15  ;;  %v726_v15 = vsel %vm247_vm2, %v718_v19, 0  ;;  %v1343_v46 = vmov 32.0  }
 0x782   :  { %1177 = vmatmul.msk.bf16.vlgmr.msra.gmra.mxu3 %vm74_vm0, %v524_v48  ;;  %1183 = vmatmul.msk.bf16.vlgmr.msrb.gmra.mxu1 %vm74_vm0, %v683_v4  ;;  %v525_v37 = vpack.c.bf16 %v523_v28, %v522_v41 }
 0x783   :  { %735 = vmatpush.bf16.msrb.mxu3 %v726_v15 }
 0x786   :  { %v674_v33 = vpop.xlane.xlu1 %673 }
 0x787   :  { %1276 = vrcp.f32 %v674_v33 }
 0x78d   :  { %v1277_v13 = vpop.eup %1276 }
 0x78e   :  { %v682_v16 = vmul.f32 %v1277_v13, %v1261_v40 }
 0x792   :  { %1178 = vmatmul.msk.bf16.gmra.mxu3 %vm74_vm0, %v525_v37 }
 0x7b7   :  { %v671_v11 = vpop.xlane.xlu2 %670 }
 0x7b8   :  { %1278 = vrcp.f32 %v671_v11 }
 0x7b9   :  { %1280 = vrcp.f32 %v1343_v46 }
 0x7be   :  { %v1279_v38 = vpop.eup %1278 }
 0x7bf   :  { %v681_v14 = vmul.f32 %v1279_v38, %v1263_v53 }
 0x7c1   :  { %v684_v43 = vpack.c.bf16 %v682_v16, %v681_v14 }
 0x7c3   :  { %1184 = vmatmul.msk.bf16.gmra.mxu1 %vm74_vm0, %v684_v43 }
 0x7ff   :  { %v706_v26 = vpop.f32.mrf.mxu1 }
 0x805   :  { %v547_v18 = vpop.f32.mrf.mxu3 }
 0x807   :  { %v708_v27 = vpop.f32.mrf.mxu1 }
 0x808   :  { %v716_v23 = vpack.c.bf16 %v708_v27, %v706_v26  ;;  %v869_v26 = vld [vmem:[%s1858_s8 + $0x18] sm:$0xff] }
 0x80a   :  { %1185 = vmatmul.msk.bf16.vlgmr.msrb.gmra.mxu3 %vm121_vm1, %v716_v23 }
 0x80d   :  { %v549_v29 = vpop.f32.mrf.mxu3 }
 0x80e   :  { %v557_v30 = vpack.c.bf16 %v549_v29, %v547_v18  ;;  %v873_v18 = vpack.c.bf16 %v869_v26, %v868_v25  ;;  %v866_v29 = vld [vmem:[%s1858_s8] sm:$0xff]  ;;  %v946_v26 = vld [vmem:[%s1860_s10 + $0x38] sm:$0xff] }
 0x810   :  { %1179 = vmatmul.msk.bf16.vlgmr.msra.gmra.mxu0 %vm121_vm1, %v557_v30  ;;  %v867_v30 = vld [vmem:[%s1858_s8 + $0x8] sm:$0xff] }
 0x811   :  { %890 = vmatpush.bf16.msrb.mxu0 %v873_v18 }
 0x815   :  { %v552_v31 = vpop.f32.mrf.mxu3 }
 0x81d   :  { %v554_v32 = vpop.f32.mrf.mxu3 }
 0x81e   :  { %v558_v21 = vpack.c.bf16 %v554_v32, %v552_v31  ;;  %v872_v32 = vpack.c.bf16 %v867_v30, %v866_v29  ;;  %v941_v29 = vld [vmem:[%s1860_s10 + $0x10] sm:$0xff]  ;;  %v942_v30 = vld [vmem:[%s1860_s10 + $0x18] sm:$0xff] }
 0x820   :  { %1180 = vmatmul.msk.bf16.gmra.mxu0 %vm121_vm1, %v558_v21 }
 0x821   :  { %891 = vmatpush.bf16.msrb.mxu0 %v872_v32  ;;  %v1211_v32 = vld [vmem:[%s1859_s9] ss:$0 sm:$0xff] }
 0x840   :  { %v711_v34 = vpop.f32.mrf.mxu1 }
 0x848   :  { %v713_v12 = vpop.f32.mrf.mxu1 }
 0x849   :  { %v717_v35 = vpack.c.bf16 %v713_v12, %v711_v34 }
 0x84b   :  { %1186 = vmatmul.msk.bf16.gmra.mxu3 %vm121_vm1, %v717_v35  ;;  %vm957_vm1 = vcmask 523264  }
 0x88d   :  { %v578_v36 = vpop.f32.mrf.mxu0  ;;  %v737_v40 = vpop.f32.mrf.mxu3 }
 0x88e   :  { %v588_v39 = vadd.f32 %v578_v36, %v1623_v54 }
 0x890   :  { %v747_v42 = vadd.f32 %v737_v40, %v588_v39 }
 0x892   :  { %v751_v47 = vadd.f32 %v747_v42, %v1450_v5 }
 0x894   :  { %v757_v49 = vsel %vm74_vm0, %v751_v47, 0.0 }
 0x895   :  { %v580_v51 = vpop.f32.mrf.mxu0  ;;  %758 = vadd.xlane.f32.xlu0 %v757_v49  ;;  %v739_v53 = vpop.f32.mrf.mxu3 }
 0x896   :  { %v589_v52 = vadd.f32 %v580_v51, %v1627_v57 }
 0x898   :  { %v748_v55 = vadd.f32 %v739_v53, %v589_v52 }
 0x89a   :  { %v752_v56 = vadd.f32 %v748_v55, %v1455_v6 }
 0x89c   :  { %v760_v58 = vsel %vm74_vm0, %v752_v56, 0.0 }
 0x89d   :  { %761 = vadd.xlane.f32.xlu2 %v760_v58  ;;  %v583_v60 = vpop.f32.mrf.mxu0  ;;  %v1209_v58 = vld [vmem:[%s1856_s6] ss:$0 sm:$0xff] }
 0x89e   :  { %v590_v54 = vadd.f32 %v583_v60, %v1630_v59  ;;  %v1281_v59 = vpop.eup %1280 }
 0x89f   :  { %v770_v2 = vmul.f32 32.0, %v1281_v59  ;;  %vm774_vm3 = vweird.f32 %v1281_v59 }
 0x8a1   :  { %v771_v48 = vsub.f32 1.0, %v770_v2 }
 0x8a3   :  { %v772_v3 = vmul.f32 %v1281_v59, %v771_v48 }
 0x8a5   :  { %v585_v63 = vpop.f32.mrf.mxu0 }
 0x8a6   :  { %v591_v57 = vadd.f32 %v585_v63, %v1633_v61 }
 0x8ce   :  { %v742_v62 = vpop.f32.mrf.mxu3 }
 0x8cf   :  { %v749_v22 = vadd.f32 %v742_v62, %v590_v54 }
 0x8d1   :  { %v753_v5 = vadd.f32 %v749_v22, %v1460_v7  ;;  %v773_v7 = vadd.f32 %v1281_v59, %v772_v3  ;;  %v1210_v22 = vld [vmem:[%s1857_s7] ss:$0 sm:$0xff] }
 0x8d3   :  { %v763_v44 = vsel %vm74_vm0, %v753_v5, 0.0  ;;  %v1691_v4 = vsel %vm774_vm3, %v1281_v59, %v773_v7 }
 0x8d4   :  { %764 = vadd.xlane.f32.xlu1 %v763_v44 }
 0x8d6   :  { %v744_v0 = vpop.f32.mrf.mxu3 }
 0x8d7   :  { %v750_v1 = vadd.f32 %v744_v0, %v591_v57 }
 0x8d9   :  { %v754_v6 = vadd.f32 %v750_v1, %v1465_v9 }
 0x8db   :  { %v766_v45 = vsel %vm74_vm0, %v754_v6, 0.0 }
 0x8dc   :  { %767 = vadd.xlane.f32.xlu0 %v766_v45 }
 0x908   :  { %v759_v50 = vpop.xlane.xlu0 %758 }
 0x909   :  { %v776_v61 = vmul.f32 %v1691_v4, %v759_v50 }
 0x90b   :  { %v780_v8 = vsub.f32 %v751_v47, %v776_v61 }
 0x90d   :  { %v784_v10 = vmul.f32 %v780_v8, %v780_v8 }
 0x90f   :  { %v788_v9 = vsel %vm74_vm0, %v784_v10, 0.0 }
 0x910   :  { %789 = vadd.xlane.f32.xlu2 %v788_v9  ;;  %v762_v41 = vpop.xlane.xlu2 %761 }
 0x911   :  { %v777_v28 = vmul.f32 %v1691_v4, %v762_v41 }
 0x913   :  { %v781_v37 = vsub.f32 %v752_v56, %v777_v28 }
 0x915   :  { %v785_v33 = vmul.f32 %v781_v37, %v781_v37 }
 0x917   :  { %v791_v11 = vsel %vm74_vm0, %v785_v33, 0.0 }
 0x918   :  { %792 = vadd.xlane.f32.xlu1 %v791_v11 }
 0x947   :  { %v765_v13 = vpop.xlane.xlu1 %764 }
 0x948   :  { %v778_v38 = vmul.f32 %v1691_v4, %v765_v13 }
 0x94a   :  { %v1698_v14 = vsub.f32 %v753_v5, %v778_v38 }
 0x94c   :  { %v786_v16 = vmul.f32 %v1698_v14, %v1698_v14 }
 0x94e   :  { %v794_v43 = vsel %vm74_vm0, %v786_v16, 0.0 }
 0x94f   :  { %795 = vadd.xlane.f32.xlu0 %v794_v43  ;;  %v768_v17 = vpop.xlane.xlu0 %767 }
 0x950   :  { %v779_v19 = vmul.f32 %v1691_v4, %v768_v17 }
 0x952   :  { %v1704_v15 = vsub.f32 %v754_v6, %v779_v19 }
 0x954   :  { %v787_v20 = vmul.f32 %v1704_v15, %v1704_v15 }
 0x956   :  { %v797_v24 = vsel %vm74_vm0, %v787_v20, 0.0 }
 0x957   :  { %798 = vadd.xlane.f32.xlu2 %v797_v24 }
 0x983   :  { %v790_v27 = vpop.xlane.xlu2 %789 }
 0x984   :  { %v800_v23 = vmul.f32 %v790_v27, %v1691_v4  ;;  %v944_v27 = vld [vmem:[%s1860_s10 + $0x28] sm:$0xff] }
 0x986   :  { %v804_v31 = vadd.f32 1e-05, %v800_v23 }
 0x988   :  { %1282 = vrsqrt.f32 %v804_v31  ;;  %vm814_vm5 = vweird.f32 %v804_v31 }
 0x98b   :  { %v793_v21 = vpop.xlane.xlu1 %792 }
 0x98c   :  { %v801_v34 = vmul.f32 %v793_v21, %v1691_v4  ;;  %v939_v21 = vld [vmem:[%s1860_s10] sm:$0xff] }
 0x98e   :  { %v1283_v12 = vpop.eup %1282  ;;  %v805_v35 = vadd.f32 1e-05, %v801_v34  ;;  %v940_v34 = vld [vmem:[%s1860_s10 + $0x8] sm:$0xff] }
 0x98f   :  { %v809_v36 = vmul.f32 %v1283_v12, %v804_v31  ;;  %vm815_vm4 = vweird.f32 %v1283_v12  ;;  %v950_v31 = vpack.c.bf16 %v942_v30, %v941_v29 }
 0x990   :  { %1284 = vrsqrt.f32 %v805_v35  ;;  %vm816_vm6 = vmor %vm814_vm5, %vm815_vm4  ;;  %vm824_vm8 = vweird.f32 %v805_v35 }
 0x991   :  { %v810_v39 = vmul.f32 %v1283_v12, %v809_v36 }
 0x993   :  { %v811_v40 = vmul.f32 0.5, %v810_v39 }
 0x995   :  { %v812_v42 = vsub.f32 1.5, %v811_v40 }
 0x996   :  { %v1285_v47 = vpop.eup %1284 }
 0x997   :  { %v813_v49 = vmul.f32 %v1283_v12, %v812_v42  ;;  %v819_v51 = vmul.f32 %v1285_v47, %v805_v35  ;;  %vm825_vm7 = vweird.f32 %v1285_v47  ;;  %v949_v35 = vpack.c.bf16 %v940_v34, %v939_v21 }
 0x998   :  { %vm826_vm9 = vmor %vm824_vm8, %vm825_vm7 }
 0x999   :  { %v820_v52 = vmul.f32 %v1285_v47, %v819_v51  ;;  %v817_v53 = vsel %vm816_vm6, %v1283_v12, %v813_v49 }
 0x99a   :  { %v848_v60 = vmul.f32 %v817_v53, %v780_v8 }
 0x99b   :  { %v821_v55 = vmul.f32 0.5, %v820_v52 }
 0x99c   :  { %v855_v5 = vmul.f32 %v1209_v58, %v848_v60 }
 0x99d   :  { %v822_v56 = vsub.f32 1.5, %v821_v55 }
 0x99e   :  { %v1729_v57 = vadd.f32 %v1210_v22, %v855_v5 }
 0x99f   :  { %v823_v54 = vmul.f32 %v1285_v47, %v822_v56 }
 0x9a1   :  { %v827_v62 = vsel %vm826_vm9, %v1285_v47, %v823_v54 }
 0x9a2   :  { %v849_v63 = vmul.f32 %v827_v62, %v781_v37 }
 0x9a4   :  { %v856_v44 = vmul.f32 %v1209_v58, %v849_v63 }
 0x9a6   :  { %v1731_v0 = vadd.f32 %v1210_v22, %v856_v44 }
 0x9a8   :  { %v870_v1 = vpack.c.bf16 %v1731_v0, %v1729_v57 }
 0x9aa   :  { %1187 = vmatmul.msk.bf16.vlgmr.msrb.gmra.mxu0 %vm74_vm0, %v870_v1 }
 0x9c2   :  { %v796_v6 = vpop.xlane.xlu0 %795 }
 0x9c3   :  { %v802_v45 = vmul.f32 %v796_v6, %v1691_v4 }
 0x9c5   :  { %v806_v46 = vadd.f32 1e-05, %v802_v45 }
 0x9c7   :  { %1286 = vrsqrt.f32 %v806_v46  ;;  %vm834_vm11 = vweird.f32 %v806_v46 }
 0x9ca   :  { %v799_v59 = vpop.xlane.xlu2 %798 }
 0x9cb   :  { %v803_v2 = vmul.f32 %v799_v59, %v1691_v4 }
 0x9cd   :  { %v1287_v48 = vpop.eup %1286  ;;  %v807_v3 = vadd.f32 1e-05, %v803_v2 }
 0x9ce   :  { %v829_v7 = vmul.f32 %v1287_v48, %v806_v46  ;;  %vm835_vm10 = vweird.f32 %v1287_v48 }
 0x9cf   :  { %1288 = vrsqrt.f32 %v807_v3  ;;  %vm836_vm12 = vmor %vm834_vm11, %vm835_vm10  ;;  %vm844_vm14 = vweird.f32 %v807_v3 }
 0x9d0   :  { %v830_v50 = vmul.f32 %v1287_v48, %v829_v7 }
 0x9d2   :  { %v831_v61 = vmul.f32 0.5, %v830_v50 }
 0x9d4   :  { %v832_v8 = vsub.f32 1.5, %v831_v61 }
 0x9d5   :  { %v1289_v10 = vpop.eup %1288 }
 0x9d6   :  { %v833_v9 = vmul.f32 %v1287_v48, %v832_v8  ;;  %v839_v41 = vmul.f32 %v1289_v10, %v807_v3  ;;  %vm845_vm13 = vweird.f32 %v1289_v10 }
 0x9d7   :  { %vm846_vm15 = vmor %vm844_vm14, %vm845_vm13 }
 0x9d8   :  { %v837_v28 = vsel %vm836_vm12, %v1287_v48, %v833_v9  ;;  %v840_v37 = vmul.f32 %v1289_v10, %v839_v41 }
 0x9d9   :  { %v850_v33 = vmul.f32 %v837_v28, %v1698_v14  ;;  %v945_v14 = vld [vmem:[%s1860_s10 + $0x30] sm:$0xff] }
 0x9da   :  { %v841_v11 = vmul.f32 0.5, %v840_v37  ;;  %v952_v18 = vpack.c.bf16 %v946_v26, %v945_v14  ;;  %v1212_v26 = vld [vmem:[%s1861_s11] ss:$0 sm:$0xff] }
 0x9db   :  { %v857_v13 = vmul.f32 %v1209_v58, %v850_v33 }
 0x9dc   :  { %v842_v38 = vsub.f32 1.5, %v841_v11  ;;  %968 = vmatpush.bf16.msrb.mxu2 %v952_v18 }
 0x9dd   :  { %v1739_v16 = vadd.f32 %v1210_v22, %v857_v13 }
 0x9de   :  { %v843_v43 = vmul.f32 %v1289_v10, %v842_v38 }
 0x9e0   :  { %v847_v17 = vsel %vm846_vm15, %v1289_v10, %v843_v43 }
 0x9e1   :  { %v851_v19 = vmul.f32 %v847_v17, %v1704_v15  ;;  %v943_v15 = vld [vmem:[%s1860_s10 + $0x20] sm:$0xff] }
 0x9e2   :  { %v951_v23 = vpack.c.bf16 %v944_v27, %v943_v15 }
 0x9e3   :  { %v858_v20 = vmul.f32 %v1209_v58, %v851_v19 }
 0x9e4   :  { %969 = vmatpush.bf16.msrb.mxu2 %v951_v23 }
 0x9e5   :  { %v1742_v24 = vadd.f32 %v1210_v22, %v858_v20 }
 0x9e7   :  { %v871_v25 = vpack.c.bf16 %v1742_v24, %v1739_v16 }
 0x9e8   :  { %970 = vmatpush.bf16.msrb.mxu2 %v950_v31 }
 0x9e9   :  { %1188 = vmatmul.msk.bf16.gmra.mxu0 %vm74_vm0, %v871_v25 }
 0x9ec   :  { %971 = vmatpush.bf16.msrb.mxu2 %v949_v35 }
 0xa27   :  { %v893_v12 = vpop.f32.mrf.mxu0 }
 0xa28   :  { %v894_v36 = vadd.f32 %v1211_v32, %v893_v12 }
 0xa2a   :  { %v903_v39 = vmul.f32 %v894_v36, %v894_v36 }
 0xa2c   :  { %v907_v40 = vmul.f32 %v903_v39, %v894_v36 }
 0xa2e   :  { %v911_v42 = vmul.f32 0.044715, %v907_v40 }
 0xa2f   :  { %v895_v47 = vpop.f32.mrf.mxu0 }
 0xa30   :  { %v915_v49 = vadd.f32 %v911_v42, %v894_v36  ;;  %v896_v51 = vadd.f32 %v1211_v32, %v895_v47 }
 0xa32   :  { %v919_v52 = vmul.f32 0.7978846, %v915_v49  ;;  %v904_v53 = vmul.f32 %v896_v51, %v896_v51 }
 0xa34   :  { %v908_v55 = vmul.f32 %v904_v53, %v896_v51  ;;  %1290 = vtanh.f32 %v919_v52 }
 0xa36   :  { %v912_v56 = vmul.f32 0.044715, %v908_v55 }
 0xa38   :  { %v916_v58 = vadd.f32 %v912_v56, %v896_v51 }
 0xa3a   :  { %v920_v60 = vmul.f32 0.7978846, %v916_v58  ;;  %v1291_v54 = vpop.eup %1290 }
 0xa3b   :  { %v927_v62 = vadd.f32 1.0, %v1291_v54 }
 0xa3c   :  { %1292 = vtanh.f32 %v920_v60 }
 0xa3d   :  { %v931_v5 = vmul.f32 0.5, %v927_v62 }
 0xa3f   :  { %v935_v1 = vmul.f32 %v931_v5, %v894_v36 }
 0xa42   :  { %v1293_v22 = vpop.eup %1292 }
 0xa43   :  { %v928_v63 = vadd.f32 1.0, %v1293_v22 }
 0xa45   :  { %v932_v44 = vmul.f32 0.5, %v928_v63 }
 0xa47   :  { %v936_v6 = vmul.f32 %v932_v44, %v896_v51 }
 0xa49   :  { %v947_v45 = vpack.c.bf16 %v936_v6, %v935_v1 }
 0xa4b   :  { %1189 = vmatmul.msk.bf16.vlgmr.msrb.gmra.mxu2 %vm957_vm1, %v947_v45 }
 0xa66   :  { %v898_v46 = vpop.f32.mrf.mxu0 }
 0xa67   :  { %v899_v59 = vadd.f32 %v1211_v32, %v898_v46 }
 0xa69   :  { %v905_v2 = vmul.f32 %v899_v59, %v899_v59 }
 0xa6b   :  { %v909_v48 = vmul.f32 %v905_v2, %v899_v59 }
 0xa6d   :  { %v913_v3 = vmul.f32 0.044715, %v909_v48 }
 0xa6e   :  { %v900_v7 = vpop.f32.mrf.mxu0 }
 0xa6f   :  { %v917_v50 = vadd.f32 %v913_v3, %v899_v59  ;;  %v901_v61 = vadd.f32 %v1211_v32, %v900_v7 }
 0xa71   :  { %v921_v8 = vmul.f32 0.7978846, %v917_v50  ;;  %v906_v10 = vmul.f32 %v901_v61, %v901_v61  ;;  %v1213_v50 = vld [vmem:[%s1862_s12] ss:$0 sm:$0xff] }
 0xa73   :  { %v910_v9 = vmul.f32 %v906_v10, %v901_v61  ;;  %1294 = vtanh.f32 %v921_v8  ;;  %v1214_v10 = vld [vmem:[%s1863_s13] ss:$0 sm:$0xff] }
 0xa75   :  { %v914_v41 = vmul.f32 0.044715, %v910_v9 }
 0xa77   :  { %v918_v28 = vadd.f32 %v914_v41, %v901_v61 }
 0xa79   :  { %v922_v37 = vmul.f32 0.7978846, %v918_v28  ;;  %v1295_v33 = vpop.eup %1294 }
 0xa7a   :  { %v929_v11 = vadd.f32 1.0, %v1295_v33 }
 0xa7b   :  { %1296 = vtanh.f32 %v922_v37 }
 0xa7c   :  { %v933_v43 = vmul.f32 0.5, %v929_v11 }
 0xa7e   :  { %v937_v19 = vmul.f32 %v933_v43, %v899_v59 }
 0xa81   :  { %v1297_v13 = vpop.eup %1296 }
 0xa82   :  { %v930_v38 = vadd.f32 1.0, %v1297_v13 }
 0xa84   :  { %v934_v17 = vmul.f32 0.5, %v930_v38 }
 0xa86   :  { %v938_v20 = vmul.f32 %v934_v17, %v901_v61 }
 0xa88   :  { %v948_v25 = vpack.c.bf16 %v938_v20, %v937_v19 }
 0xa8a   :  { %1190 = vmatmul.msk.bf16.gmra.mxu2 %vm957_vm1, %v948_v25 }
 0xace   :  { %v973_v14 = vpop.f32.mrf.mxu2 }
 0xacf   :  { %v974_v35 = vadd.f32 %v1212_v26, %v973_v14 }
 0xad6   :  { %v975_v18 = vpop.f32.mrf.mxu2 }
 0xad7   :  { %v976_v15 = vadd.f32 %v1212_v26, %v975_v18 }
 0xad9   :  { %v984_v27 = vadd.f32 %v976_v15, %v1731_v0  ;;  %v983_v0 = vadd.f32 %v974_v35, %v1729_v57 }
 0xadb   :  { %v992_v23 = vsel %vm74_vm0, %v984_v27, 0.0  ;;  %v989_v39 = vsel %vm74_vm0, %v983_v0, 0.0 }
 0xadc   :  { %993 = vadd.xlane.f32.xlu2 %v992_v23 }
 0xb0d   :  { %v978_v29 = vpop.f32.mrf.mxu2 }
 0xb0e   :  { %v979_v30 = vadd.f32 %v1212_v26, %v978_v29 }
 0xb10   :  { %v985_v31 = vadd.f32 %v979_v30, %v1739_v16 }
 0xb12   :  { %v995_v32 = vsel %vm74_vm0, %v985_v31, 0.0 }
 0xb13   :  { %996 = vadd.xlane.f32.xlu0 %v995_v32 }
 0xb15   :  { %v980_v21 = vpop.f32.mrf.mxu2 }
 0xb16   :  { %v981_v34 = vadd.f32 %v1212_v26, %v980_v21 }
 0xb18   :  { %v986_v12 = vadd.f32 %v981_v34, %v1742_v24 }
 0xb1a   :  { %v998_v36 = vsel %vm74_vm0, %v986_v12, 0.0 }
 0xb1b   :  { %999 = vadd.xlane.f32.xlu1 %v998_v36 }
 0xb23   :  { %990 = vadd.xlane.f32.xlu1 %v989_v39 }
 0xb4f   :  { %v994_v40 = vpop.xlane.xlu2 %993 }
 0xb50   :  { %v1002_v42 = vmul.f32 %v994_v40, %v1691_v4 }
 0xb52   :  { %v1006_v16 = vsub.f32 %v984_v27, %v1002_v42 }
 0xb54   :  { %v1010_v47 = vmul.f32 %v1006_v16, %v1006_v16 }
 0xb56   :  { %v1016_v49 = vsel %vm74_vm0, %v1010_v47, 0.0 }
 0xb57   :  { %1017 = vadd.xlane.f32.xlu1 %v1016_v49 }
 0xb86   :  { %v997_v51 = vpop.xlane.xlu0 %996 }
 0xb87   :  { %v1003_v24 = vmul.f32 %v997_v51, %v1691_v4 }
 0xb89   :  { %v1790_v52 = vsub.f32 %v985_v31, %v1003_v24 }
 0xb8b   :  { %v1011_v53 = vmul.f32 %v1790_v52, %v1790_v52 }
 0xb8d   :  { %v1019_v57 = vsel %vm74_vm0, %v1011_v53, 0.0 }
 0xb8e   :  { %v1000_v55 = vpop.xlane.xlu1 %999  ;;  %1020 = vadd.xlane.f32.xlu2 %v1019_v57 }
 0xb8f   :  { %v1004_v56 = vmul.f32 %v1000_v55, %v1691_v4 }
 0xb91   :  { %v1796_v58 = vsub.f32 %v986_v12, %v1004_v56 }
 0xb93   :  { %v1012_v60 = vmul.f32 %v1796_v58, %v1796_v58 }
 0xb95   :  { %v1022_v54 = vsel %vm74_vm0, %v1012_v60, 0.0 }
 0xb96   :  { %v991_v62 = vpop.xlane.xlu1 %990  ;;  %1023 = vadd.xlane.f32.xlu0 %v1022_v54 }
 0xb97   :  { %v1001_v22 = vmul.f32 %v991_v62, %v1691_v4 }
 0xb99   :  { %v1802_v5 = vsub.f32 %v983_v0, %v1001_v22 }
 0xb9b   :  { %v1009_v63 = vmul.f32 %v1802_v5, %v1802_v5 }
 0xb9d   :  { %v1013_v44 = vsel %vm74_vm0, %v1009_v63, 0.0  ;;  %v1110_v63 = vld [vmem:[%s1865_s15 + $0x18] sm:$0xff] }
 0xb9e   :  { %1014 = vadd.xlane.f32.xlu0 %v1013_v44 }
 0xbca   :  { %v1018_v1 = vpop.xlane.xlu1 %1017 }
 0xbcb   :  { %v1026_v6 = vmul.f32 %v1018_v1, %v1691_v4 }
 0xbcd   :  { %v1030_v45 = vadd.f32 1e-05, %v1026_v6 }
 0xbcf   :  { %1298 = vrsqrt.f32 %v1030_v45  ;;  %vm1049_vm3 = vweird.f32 %v1030_v45 }
 0xbd5   :  { %v1299_v46 = vpop.eup %1298 }
 0xbd6   :  { %v1044_v59 = vmul.f32 %v1299_v46, %v1030_v45  ;;  %vm1050_vm2 = vweird.f32 %v1299_v46 }
 0xbd7   :  { %vm1051_vm4 = vmor %vm1049_vm3, %vm1050_vm2 }
 0xbd8   :  { %v1045_v2 = vmul.f32 %v1299_v46, %v1044_v59  ;;  %v1108_v59 = vld [vmem:[%s1865_s15 + $0x8] sm:$0xff] }
 0xbda   :  { %v1046_v48 = vmul.f32 0.5, %v1045_v2 }
 0xbdc   :  { %v1047_v3 = vsub.f32 1.5, %v1046_v48 }
 0xbde   :  { %v1048_v7 = vmul.f32 %v1299_v46, %v1047_v3  ;;  %v1107_v3 = vld [vmem:[%s1865_s15] sm:$0xff] }
 0xbe0   :  { %v1052_v61 = vsel %vm1051_vm4, %v1299_v46, %v1048_v7 }
 0xbe1   :  { %v1074_v8 = vmul.f32 %v1052_v61, %v1006_v16 }
 0xbe3   :  { %v1081_v9 = vmul.f32 %v1213_v50, %v1074_v8  ;;  %v1115_v8 = vld [vmem:[%s1864_s14] sm:$0x3] }
 0xbe5   :  { %v1088_v41 = vadd.f32 %v1214_v10, %v1081_v9 }
 0xbe7   :  { %v1094_v28 = vsel %vm74_vm0, %v1088_v41, 0.0 }
 0xbe8   :  { %1095 = vadd.xlane.f32.xlu0 %v1094_v28 }
 0xc01   :  { %v1021_v37 = vpop.xlane.xlu2 %1020 }
 0xc02   :  { %v1027_v33 = vmul.f32 %v1021_v37, %v1691_v4 }
 0xc04   :  { %v1031_v11 = vadd.f32 1e-05, %v1027_v33 }
 0xc06   :  { %1300 = vrsqrt.f32 %v1031_v11  ;;  %vm1059_vm6 = vweird.f32 %v1031_v11 }
 0xc09   :  { %v1024_v13 = vpop.xlane.xlu0 %1023 }
 0xc0a   :  { %v1028_v38 = vmul.f32 %v1024_v13, %v1691_v4 }
 0xc0c   :  { %v1301_v43 = vpop.eup %1300  ;;  %v1032_v17 = vadd.f32 1e-05, %v1028_v38 }
 0xc0d   :  { %v1054_v19 = vmul.f32 %v1301_v43, %v1031_v11  ;;  %vm1060_vm5 = vweird.f32 %v1301_v43 }
 0xc0e   :  { %1302 = vrsqrt.f32 %v1032_v17  ;;  %vm1061_vm7 = vmor %vm1059_vm6, %vm1060_vm5  ;;  %vm1069_vm9 = vweird.f32 %v1032_v17 }
 0xc0f   :  { %v1055_v20 = vmul.f32 %v1301_v43, %v1054_v19 }
 0xc11   :  { %v1056_v25 = vmul.f32 0.5, %v1055_v20  ;;  %v1015_v14 = vpop.xlane.xlu0 %1014 }
 0xc12   :  { %v1025_v26 = vmul.f32 %v1015_v14, %v1691_v4 }
 0xc13   :  { %v1057_v18 = vsub.f32 1.5, %v1056_v25 }
 0xc14   :  { %v1303_v15 = vpop.eup %1302  ;;  %v1029_v27 = vadd.f32 1e-05, %v1025_v26 }
 0xc15   :  { %v1058_v23 = vmul.f32 %v1301_v43, %v1057_v18  ;;  %v1064_v29 = vmul.f32 %v1303_v15, %v1032_v17  ;;  %vm1070_vm8 = vweird.f32 %v1303_v15 }
 0xc16   :  { %1304 = vrsqrt.f32 %v1029_v27  ;;  %vm1071_vm10 = vmor %vm1069_vm9, %vm1070_vm8  ;;  %vm1039_vm12 = vweird.f32 %v1029_v27 }
 0xc17   :  { %v1065_v30 = vmul.f32 %v1303_v15, %v1064_v29  ;;  %v1062_v31 = vsel %vm1061_vm7, %v1301_v43, %v1058_v23 }
 0xc18   :  { %v1075_v32 = vmul.f32 %v1062_v31, %v1790_v52 }
 0xc19   :  { %v1066_v21 = vmul.f32 0.5, %v1065_v30 }
 0xc1a   :  { %v1082_v34 = vmul.f32 %v1213_v50, %v1075_v32 }
 0xc1b   :  { %v1067_v12 = vsub.f32 1.5, %v1066_v21 }
 0xc1c   :  { %v1305_v35 = vpop.eup %1304  ;;  %v1089_v36 = vadd.f32 %v1214_v10, %v1082_v34 }
 0xc1d   :  { %v1068_v0 = vmul.f32 %v1303_v15, %v1067_v12  ;;  %v1034_v39 = vmul.f32 %v1305_v35, %v1029_v27  ;;  %vm1040_vm11 = vweird.f32 %v1305_v35 }
 0xc1e   :  { %v1097_v40 = vsel %vm74_vm0, %v1089_v36, 0.0  ;;  %vm1041_vm13 = vmor %vm1039_vm12, %vm1040_vm11 }
 0xc1f   :  { %v1035_v42 = vmul.f32 %v1305_v35, %v1034_v39  ;;  %1098 = vadd.xlane.f32.xlu1 %v1097_v40  ;;  %v1072_v16 = vsel %vm1071_vm10, %v1303_v15, %v1068_v0 }
 0xc20   :  { %v1076_v47 = vmul.f32 %v1072_v16, %v1796_v58 }
 0xc21   :  { %v1036_v49 = vmul.f32 0.5, %v1035_v42 }
 0xc22   :  { %v1083_v51 = vmul.f32 %v1213_v50, %v1076_v47 }
 0xc23   :  { %v1037_v24 = vsub.f32 1.5, %v1036_v49 }
 0xc24   :  { %v1090_v52 = vadd.f32 %v1214_v10, %v1083_v51 }
 0xc25   :  { %v1038_v53 = vmul.f32 %v1305_v35, %v1037_v24 }
 0xc26   :  { %v1100_v57 = vsel %vm74_vm0, %v1090_v52, 0.0 }
 0xc27   :  { %1101 = vadd.xlane.f32.xlu2 %v1100_v57  ;;  %v1042_v55 = vsel %vm1041_vm13, %v1305_v35, %v1038_v53 }
 0xc28   :  { %v1073_v56 = vmul.f32 %v1042_v55, %v1802_v5  ;;  %v1109_v5 = vld [vmem:[%s1865_s15 + $0x10] sm:$0xff] }
 0xc2a   :  { %v1080_v60 = vmul.f32 %v1213_v50, %v1073_v56 }
 0xc2c   :  { %v1087_v54 = vadd.f32 %v1214_v10, %v1080_v60  ;;  %v1215_v10 = vld [vmem:[%s1866_s16] ss:$0 sm:$0xff] }
 0xc2e   :  { %v1091_v62 = vsel %vm74_vm0, %v1087_v54, 0.0 }
 0xc2f   :  { %1092 = vadd.xlane.f32.xlu2 %v1091_v62 }
 0xc5b   :  { %v1096_v22 = vpop.xlane.xlu0 %1095 }
 0xc5c   :  { %v1104_v45 = vmul.f32 %v1096_v22, %v1691_v4 }
 0xc5e   :  { %v1112_v48 = vmul.f32 %v1108_v59, %v1104_v45 }
 0xc92   :  { %v1099_v58 = vpop.xlane.xlu1 %1098 }
 0xc93   :  { %v1105_v1 = vmul.f32 %v1099_v58, %v1691_v4 }
 0xc95   :  { %v1113_v2 = vmul.f32 %v1109_v5, %v1105_v1 }
 0xc9a   :  { %v1102_v44 = vpop.xlane.xlu2 %1101 }
 0xc9b   :  { %v1106_v6 = vmul.f32 %v1102_v44, %v1691_v4 }
 0xc9d   :  { %v1114_v46 = vmul.f32 %v1110_v63, %v1106_v6 }
 0xc9f   :  { %1135 = vmatpush.msra.mxu1 %v1114_v46 }
 0xca1   :  { %1136 = vmatpush.msra.mxu1 %v1113_v2 }
 0xca2   :  { %v1093_v7 = vpop.xlane.xlu2 %1092 }
 0xca3   :  { %v1103_v50 = vmul.f32 %v1093_v7, %v1691_v4  ;;  %1137 = vmatpush.msra.mxu1 %v1112_v48 }
 0xca5   :  { %v1111_v61 = vmul.f32 %v1107_v3, %v1103_v50 }
 0xca7   :  { %1138 = vmatpush.msra.mxu1 %v1111_v61 }
 0xca8   :  { %1191 = vmatmul.msk.f32.vlgmr.msra.gmra.mxu1 %vm74_vm0, %v1115_v8 }
 0xd25   :  { %v1140_v9 = vpop.f32.mrf.mxu1 }
 0xd26   :  { %v1141_v4 = vadd.f32 %v1215_v10, %v1140_v9 }
 0xd28   :  { %v1143_v41 = vmax.f32 %v1141_v4, 0.0 }
 0xd2a   :  { %1144 = vst [vmem:[#allocation2] sm:$0x3] %v1143_v41 }
 0xd2b   :  { %1155 = dma.vmem_to_hbm [thread:$0]  %s1151_s4, 32, %s1153_s24, [#allocation3]  }
 0xd2c   :  { %1330 = dma.done.wait [#allocation3], 32  }
 0xd2d   :  { %1331 = vsyncadd [#allocation3], 4294967264 }
 0xd2e   :  { %1160 = vsyncpa [#allocation3], 1 }

</bundles_post_ra>
